<compile_context>
chip_gen: v7x
topology: tpu7x:2x2x1
jax: 0.10.0
libtpu: 0.0.40
codegen_flags: <defaults>
</compile_context>

<pallas_src>
import jax
import jax.numpy as jnp
from jax import lax
from jax.experimental import pallas as pl
from jax.experimental.pallas import tpu as pltpu


# ---------------------------------------------------------------------------
# Kernel helpers
# ---------------------------------------------------------------------------
def _chunk_rows(m_total, cout):
    """Per-layer matmul M-chunk: f32 accumulator capped at ~64 KiB, multiple of 8."""
    limit = max(8, (min(256, (64 * 1024) // (4 * cout)) // 8) * 8)
    return min(m_total, limit)


def _pool2x2(y_ref, base, pitch, wp):
    """2x2 max-pool producing one pooled row; y is row-flattened at row pitch."""
    def _colmax(row_base):
        if wp > 1:
            e = y_ref[pl.ds(row_base, wp, stride=2), :]
            o = y_ref[pl.ds(row_base + 1, wp, stride=2), :]
        else:
            e = y_ref[pl.ds(row_base, 1), :]
            o = y_ref[pl.ds(row_base + 1, 1), :]
        return jnp.maximum(e, o)
    return jnp.maximum(_colmax(base), _colmax(base + pitch))


def _make_kernel(imgs, conv_meta):
    n_layers = len(conv_meta)

    def kernel(*refs):
        idx = 0
        x_ref = refs[idx]; idx += 1
        wsb = []
        for _ in range(n_layers):
            wsb.append(refs[idx:idx + 3]); idx += 3
        wf1_ref, bf1_ref, wf2_ref, bf2_ref = refs[idx:idx + 4]; idx += 4
        o_ref = refs[idx]; idx += 1
        scratch = refs[idx:]
        y_refs = [scratch[0]]     # conv outputs per layer
        p_refs = [None]           # padded inputs for layers 2..n (layer 1 is im2col input)
        s = 1
        for _ in range(1, n_layers):
            p_refs.append(scratch[s]); y_refs.append(scratch[s + 1]); s += 2

        # Halo init.  Only the 1-pixel halos must be zero, but after dropping the
        # layer-1 buffer the remaining padded scratches are tiny, so a full zero
        # is the same number of vector stores as halo-strip zeroing and simpler.
        # Unconditional (not program_id-gated) so every TensorCore inits its own
        # scratch under the 'parallel' batch grid.
        for l in range(1, n_layers):
            p_refs[l][...] = jnp.zeros(p_refs[l].shape, p_refs[l].dtype)

        feat_pieces = []
        for l in range(n_layers):
            meta = conv_meta[l]
            w_ref, s_ref, b_ref = wsb[l]
            y_ref = y_refs[l]
            pitch, yblk = meta["pitch"], meta["yblk"]
            hc, wc, cout = meta["h"], meta["w"], meta["cout"]
            m_total, chunk = meta["m_total"], meta["chunk"]
            src = x_ref if l == 0 else p_refs[l]

            # Conv as a few large MXU matmuls over the row-flattened slab
            # (all packed images at once).
            for c0 in range(0, m_total, chunk):
                csz = min(chunk, m_total - c0)
                if l == 0:
                    # Layer 1: wrapper-side im2col -> one dense K=32 dot.
                    acc = jnp.dot(src[pl.ds(c0, csz), :], w_ref[...],
                                  preferred_element_type=jnp.float32)
                elif meta["fuse_k"]:
                    # cin % 128 == 0: fuse the 9 taps into K (128-lane aligned).
                    patch = jnp.concatenate(
                        [src[pl.ds(c0 + dy * pitch + dx, csz), :]
                         for dy in range(3) for dx in range(3)], axis=1)
                    acc = jnp.dot(patch.astype(jnp.bfloat16), w_ref[...],
                                  preferred_element_type=jnp.float32)
                else:
                    acc = jnp.zeros((csz, cout), jnp.float32)
                    for dy in range(3):
                        for dx in range(3):
                            tap = src[pl.ds(c0 + dy * pitch + dx, csz), :]
                            acc = acc + jnp.dot(tap.astype(jnp.bfloat16),
                                                w_ref[dy * 3 + dx],
                                                preferred_element_type=jnp.float32)
                # Folded BatchNorm (eval) + conv bias + ReLU in f32.
                y_ref[pl.ds(c0, csz), :] = jnp.maximum(
                    acc * s_ref[...] + b_ref[...], 0.0)

            # 2x2 max-pool written straight into the next layer's padded scratch,
            # or reduced to the global-average-pool feature for the last layer.
            hp, wp = hc // 2, wc // 2
            if l + 1 < n_layers:
                nxt = conv_meta[l + 1]
                dst, dpitch, dblk = p_refs[l + 1], nxt["pitch"], nxt["pblk"]
                for i in range(imgs):
                    for r2 in range(hp):
                        pooled = _pool2x2(y_ref, i * yblk + 2 * r2 * pitch, pitch, wp)
                        dst[pl.ds(i * dblk + (r2 + 1) * dpitch + 1, wp), :] = (
                            pooled.astype(dst.dtype))
            else:
                inv = 1.0 / float(hp * wp)
                for i in range(imgs):
                    fsum = jnp.zeros((1, cout), jnp.float32)
                    for r2 in range(hp):
                        pooled = _pool2x2(y_ref, i * yblk + 2 * r2 * pitch, pitch, wp)
                        fsum = fsum + jnp.sum(pooled, axis=0, keepdims=True)
                    feat_pieces.append(fsum * inv)          # adaptive_avg_pool2d(1)

        feats = jnp.concatenate(feat_pieces, axis=0)        # (imgs, 256)

        # Head: fc1 -> ReLU -> fc2, run with M = imgs; lane-dense (128-wide) output.
        # TODO(synk): nn.Dropout(0.5) is identity in eval mode; training-mode RNG mask not implemented.
        h = jnp.dot(feats.astype(jnp.bfloat16), wf1_ref[...],
                    preferred_element_type=jnp.float32) + bf1_ref[...]
        h = jnp.maximum(h, 0.0)
        out = jnp.dot(h.astype(jnp.bfloat16), wf2_ref[...],
                      preferred_element_type=jnp.float32) + bf2_ref[...]
        o_ref[0] = out.astype(o_ref.dtype)

    return kernel


# ---------------------------------------------------------------------------
# Wrapper: one pallas_call for the whole network
# ---------------------------------------------------------------------------
def cnn_forward(x_nchw, params, imgs_per_step=8):
    x = jnp.transpose(x_nchw, (0, 2, 3, 1)).astype(jnp.float32)   # NCHW -> NHWC
    B, H, W, cin0 = x.shape
    convs = params["convs"]
    n_layers = len(convs)
    (wf1, bf1), (wf2, bf2) = params["fc1"], params["fc2"]
    num_classes = wf2.shape[1]

    heights = [H // (2 ** l) for l in range(n_layers)]
    widths = [W // (2 ** l) for l in range(n_layers)]
    cins = [c["w_hwio"].shape[2] for c in convs]
    couts = [c["w_hwio"].shape[3] for c in convs]
    assert all(h % 2 == 0 and w % 2 == 0 for h, w in zip(heights, widths))

    # Pack several images per grid step; zero-pad the batch to a multiple.
    imgs = max(1, min(imgs_per_step, B))
    Bp = -(-B // imgs) * imgs
    if Bp != B:
        x = jnp.concatenate([x, jnp.zeros((Bp - B, H, W, cin0), x.dtype)], axis=0)
    G = Bp // imgs

    # Layer-1 prep in the wrapper: im2col slab (Bp*H*W, 27 -> 32) in bf16.
    xp = jnp.pad(x, ((0, 0), (1, 1), (1, 1), (0, 0)))
    cols = jnp.concatenate(
        [xp[:, dy:dy + H, dx:dx + W, :] for dy in range(3) for dx in range(3)],
        axis=-1).reshape(Bp * H * W, 9 * cin0)
    k1 = 9 * cin0
    k1p = -(-k1 // 32) * 32
    if k1p != k1:
        cols = jnp.pad(cols, ((0, 0), (0, k1p - k1)))
    cols = cols.astype(jnp.bfloat16)
    w1c = convs[0]["w_hwio"].reshape(k1, couts[0])
    if k1p != k1:
        w1c = jnp.pad(w1c, ((0, k1p - k1), (0, 0)))
    w1c = w1c.astype(jnp.bfloat16)

    # Static per-layer geometry.  Layers >= 2 use a row-flattened layout with a
    # 1-pixel halo at pitch (w+2); images are stacked with per-image block pblk
    # so the conv is one flat M sweep (inter-image rows are garbage, never read).
    conv_meta = []
    for l in range(n_layers):
        hc, wc, cout = heights[l], widths[l], couts[l]
        if l == 0:
            pitch, yblk = wc, hc * wc
            m_total = imgs * yblk
            conv_meta.append(dict(h=hc, w=wc, cout=cout, pitch=pitch, yblk=yblk,
                                  pblk=None, m_total=m_total, fuse_k=False,
                                  chunk=_chunk_rows(m_total, cout)))
        else:
            pitch = wc + 2
            pblk = (hc + 2) * pitch
            m_total = imgs * pblk - 2 * pitch
            fuse_k = (cins[l] % 128 == 0)
            chunk = _chunk_rows(m_total, cout)
            if fuse_k:
                chunk = min(chunk, 64)          # bound the (chunk, 9*cin) patch
            conv_meta.append(dict(h=hc, w=wc, cout=cout, pitch=pitch, yblk=pblk,
                                  pblk=pblk, m_total=m_total, fuse_k=fuse_k,
                                  chunk=chunk))

    # Operands + BlockSpecs.  All weights/scales/biases have constant index maps
    # and stay VMEM-resident across the grid.
    operands = [cols]
    in_specs = [pl.BlockSpec((imgs * H * W, k1p), lambda g: (g, 0))]
    operands += [w1c, convs[0]["scale"], convs[0]["bias"]]
    in_specs += [pl.BlockSpec((k1p, couts[0]), lambda g: (0, 0)),
                 pl.BlockSpec((1, couts[0]), lambda g: (0, 0)),
                 pl.BlockSpec((1, couts[0]), lambda g: (0, 0))]
    for l in range(1, n_layers):
        ci, co = cins[l], couts[l]
        if conv_meta[l]["fuse_k"]:
            w = convs[l]["w_hwio"].reshape(9 * ci, co).astype(jnp.bfloat16)
            wspec = pl.BlockSpec((9 * ci, co), lambda g: (0, 0))
        else:
            w = convs[l]["w_hwio"].reshape(9, ci, co).astype(jnp.bfloat16)
            wspec = pl.BlockSpec((9, ci, co), lambda g: (0, 0, 0))
        operands += [w, convs[l]["scale"], convs[l]["bias"]]
        in_specs += [wspec,
                     pl.BlockSpec((1, co), lambda g: (0, 0)),
                     pl.BlockSpec((1, co), lambda g: (0, 0))]

    nc_pad = -(-num_classes // 128) * 128            # lane-dense output store
    wf2p = jnp.pad(wf2, ((0, 0), (0, nc_pad - num_classes))).astype(jnp.bfloat16)
    bf2p = jnp.pad(bf2, ((0, 0), (0, nc_pad - num_classes)))
    operands += [wf1.astype(jnp.bfloat16), bf1, wf2p, bf2p]
    in_specs += [pl.BlockSpec(wf1.shape, lambda g: (0, 0)),
                 pl.BlockSpec(bf1.shape, lambda g: (0, 0)),
                 pl.BlockSpec(wf2p.shape, lambda g: (0, 0)),
                 pl.BlockSpec(bf2p.shape, lambda g: (0, 0))]

    # VMEM scratch: per-step activations (a few hundred KB total for imgs=2..8).
    scratch_shapes = [pltpu.VMEM((imgs * H * W, couts[0]), jnp.float32)]
    for l in range(1, n_layers):
        pblk = conv_meta[l]["pblk"]
        scratch_shapes.append(pltpu.VMEM((imgs * pblk + 8, cins[l]), jnp.float32))
        scratch_shapes.append(pltpu.VMEM((imgs * pblk, couts[l]), jnp.float32))

    out = pl.pallas_call(
        _make_kernel(imgs, conv_meta),
        out_shape=jax.ShapeDtypeStruct((G, imgs, nc_pad), jnp.float32),
        grid_spec=pltpu.PrefetchScalarGridSpec(
            num_scalar_prefetch=0,
            grid=(G,),
            in_specs=in_specs,
            out_specs=pl.BlockSpec((1, imgs, nc_pad), lambda g: (g, 0, 0)),
            scratch_shapes=scratch_shapes),
        compiler_params=pltpu.CompilerParams(
            dimension_semantics=("parallel",)),
    )(*operands)
    return out.reshape(Bp, nc_pad)[:B, :num_classes]


# ---------------------------------------------------------------------------
# Parameters (deterministic, synthetic) and pure-JAX references
# ---------------------------------------------------------------------------
def init_params(key, num_classes):
    eps = 1e-5
    conv_dims = [(3, 32), (32, 64), (64, 128), (128, 256)]
    keys = iter(jax.random.split(key, 32))
    convs = []
    for cin, cout in conv_dims:
        w = 0.1 * jax.random.normal(next(keys), (3, 3, cin, cout), jnp.float32)  # HWIO
        b = 0.05 * jax.random.normal(next(keys), (cout,), jnp.float32)
        gamma = 1.0 + 0.1 * jax.random.normal(next(keys), (cout,), jnp.float32)
        beta = 0.05 * jax.random.normal(next(keys), (cout,), jnp.float32)
        mean = 0.05 * jax.random.normal(next(keys), (cout,), jnp.float32)
        var = jax.random.uniform(next(keys), (cout,), jnp.float32, 0.5, 1.5)
        scale = gamma * lax.rsqrt(var + eps)
        bias = beta + (b - mean) * scale              # fold conv bias + BN (eval)
        convs.append(dict(w_hwio=w,
                          scale=scale.reshape(1, cout),
                          bias=bias.reshape(1, cout)))
    w1 = 0.05 * jax.random.normal(next(keys), (256, 256), jnp.float32)
    b1 = 0.05 * jax.random.normal(next(keys), (256,), jnp.float32)
    w2 = 0.05 * jax.random.normal(next(keys), (256, num_classes), jnp.float32)
    b2 = 0.05 * jax.random.normal(next(keys), (num_classes,), jnp.float32)
    return dict(convs=convs,
                fc1=(w1, b1.reshape(1, -1)),
                fc2=(w2, b2.reshape(1, -1)))


def reference_forward(x_nchw, params, matmul_dtype=jnp.float32):
    # matmul_dtype=jnp.bfloat16 mirrors the kernel's MXU operand precision.
    x = jnp.transpose(x_nchw, (0, 2, 3, 1)).astype(jnp.float32)
    for layer in params["convs"]:
        y = lax.conv_general_dilated(
            x.astype(matmul_dtype), layer["w_hwio"].astype(matmul_dtype),
            (1, 1), "SAME", dimension_numbers=("NHWC", "HWIO", "NHWC"),
            preferred_element_type=jnp.float32)
        y = jnp.maximum(y * layer["scale"].reshape(1, 1, 1, -1)
                        + layer["bias"].reshape(1, 1, 1, -1), 0.0)
        x = lax.reduce_window(y, -jnp.inf, lax.max,
                              (1, 2, 2, 1), (1, 2, 2, 1), "VALID")
    feat = jnp.mean(x, axis=(1, 2))
    (w1, b1), (w2, b2) = params["fc1"], params["fc2"]
    h = jnp.maximum(
        jnp.dot(feat.astype(matmul_dtype), w1.astype(matmul_dtype),
                preferred_element_type=jnp.float32) + b1, 0.0)
    return jnp.dot(h.astype(matmul_dtype), w2.astype(matmul_dtype),
                   preferred_element_type=jnp.float32) + b2


if __name__ == "__main__":
    num_classes = 10
    x = jax.random.normal(jax.random.PRNGKey(0), (2, 3, 16, 16), jnp.float32)  # NCHW
    params = init_params(jax.random.PRNGKey(1), num_classes)

    out = jax.block_until_ready(cnn_forward(x, params))
    assert out.shape == (2, num_classes)

    ref_bf16 = jax.block_until_ready(reference_forward(x, params, jnp.bfloat16))
    ref_f32 = jax.block_until_ready(reference_forward(x, params, jnp.float32))
    err_bf16 = float(jnp.max(jnp.abs(out - ref_bf16)))
    err_f32 = float(jnp.max(jnp.abs(out - ref_f32)))
    assert err_bf16 < 2.5e-2, f"mismatch vs bf16-matched reference: {err_bf16}"
    assert err_f32 < 8e-2, f"mismatch vs f32 reference: {err_f32}"

    print("KERNEL_OK")
</pallas_src>

<mosaic_0001>
module attributes {stable_mosaic.version = 11 : i64} {
  func.func @kernel(%arg0: i32, %arg1: memref<512x32xbf16, #tpu.memory_space<vmem>>, %arg2: memref<32x32xbf16, #tpu.memory_space<vmem>>, %arg3: memref<1x32xf32, #tpu.memory_space<vmem>>, %arg4: memref<1x32xf32, #tpu.memory_space<vmem>>, %arg5: memref<9x32x64xbf16, #tpu.memory_space<vmem>>, %arg6: memref<1x64xf32, #tpu.memory_space<vmem>>, %arg7: memref<1x64xf32, #tpu.memory_space<vmem>>, %arg8: memref<9x64x128xbf16, #tpu.memory_space<vmem>>, %arg9: memref<1x128xf32, #tpu.memory_space<vmem>>, %arg10: memref<1x128xf32, #tpu.memory_space<vmem>>, %arg11: memref<1152x256xbf16, #tpu.memory_space<vmem>>, %arg12: memref<1x256xf32, #tpu.memory_space<vmem>>, %arg13: memref<1x256xf32, #tpu.memory_space<vmem>>, %arg14: memref<256x256xbf16, #tpu.memory_space<vmem>>, %arg15: memref<1x256xf32, #tpu.memory_space<vmem>>, %arg16: memref<256x128xbf16, #tpu.memory_space<vmem>>, %arg17: memref<1x128xf32, #tpu.memory_space<vmem>>, %arg18: memref<1x2x128xf32, #tpu.memory_space<vmem>>, %arg19: memref<512x32xf32, #tpu.memory_space<vmem>>, %arg20: memref<208x32xf32, #tpu.memory_space<vmem>>, %arg21: memref<200x64xf32, #tpu.memory_space<vmem>>, %arg22: memref<80x64xf32, #tpu.memory_space<vmem>>, %arg23: memref<72x128xf32, #tpu.memory_space<vmem>>, %arg24: memref<40x128xf32, #tpu.memory_space<vmem>>, %arg25: memref<32x256xf32, #tpu.memory_space<vmem>>) attributes {dimension_semantics = [#tpu.dimension_semantics<parallel>], iteration_bounds = array<i64: 1>, scalar_prefetch = 0 : i64, scratch_operands = 7 : i64, tpu.core_type = #tpu.core_type<tc>, window_params = [{transform_indices = @transform_0, window_bounds = array<i64: 512, 32>}, {pipeline_mode = #tpu.pipeline_mode<synchronous>, transform_indices = @transform_1, window_bounds = array<i64: 32, 32>}, {pipeline_mode = #tpu.pipeline_mode<synchronous>, transform_indices = @transform_2, window_bounds = array<i64: 1, 32>}, {pipeline_mode = #tpu.pipeline_mode<synchronous>, transform_indices = @transform_3, window_bounds = array<i64: 1, 32>}, {pipeline_mode = #tpu.pipeline_mode<synchronous>, transform_indices = @transform_4, window_bounds = array<i64: 9, 32, 64>}, {pipeline_mode = #tpu.pipeline_mode<synchronous>, transform_indices = @transform_5, window_bounds = array<i64: 1, 64>}, {pipeline_mode = #tpu.pipeline_mode<synchronous>, transform_indices = @transform_6, window_bounds = array<i64: 1, 64>}, {pipeline_mode = #tpu.pipeline_mode<synchronous>, transform_indices = @transform_7, window_bounds = array<i64: 9, 64, 128>}, {pipeline_mode = #tpu.pipeline_mode<synchronous>, transform_indices = @transform_8, window_bounds = array<i64: 1, 128>}, {pipeline_mode = #tpu.pipeline_mode<synchronous>, transform_indices = @transform_9, window_bounds = array<i64: 1, 128>}, {pipeline_mode = #tpu.pipeline_mode<synchronous>, transform_indices = @transform_10, window_bounds = array<i64: 1152, 256>}, {pipeline_mode = #tpu.pipeline_mode<synchronous>, transform_indices = @transform_11, window_bounds = array<i64: 1, 256>}, {pipeline_mode = #tpu.pipeline_mode<synchronous>, transform_indices = @transform_12, window_bounds = array<i64: 1, 256>}, {pipeline_mode = #tpu.pipeline_mode<synchronous>, transform_indices = @transform_13, window_bounds = array<i64: 256, 256>}, {pipeline_mode = #tpu.pipeline_mode<synchronous>, transform_indices = @transform_14, window_bounds = array<i64: 1, 256>}, {pipeline_mode = #tpu.pipeline_mode<synchronous>, transform_indices = @transform_15, window_bounds = array<i64: 256, 128>}, {pipeline_mode = #tpu.pipeline_mode<synchronous>, transform_indices = @transform_16, window_bounds = array<i64: 1, 128>}, {transform_indices = @transform_17, window_bounds = array<i64: 1, 2, 128>}]} {
    %cst = arith.constant 0.000000e+00 : f32
    %0 = vector.broadcast %cst : f32 to vector<208x32xf32>
    %c0 = arith.constant 0 : index
    %c0_0 = arith.constant 0 : index
    %1 = vector.load %arg20[%c0, %c0_0] : memref<208x32xf32, #tpu.memory_space<vmem>>, vector<208x32xf32>
    tpu.vector_store %arg20[%c0, %c0_0], %0 {strides = array<i32>} : memref<208x32xf32, #tpu.memory_space<vmem>>, vector<208x32xf32>,
    %cst_1 = arith.constant 0.000000e+00 : f32
    %2 = vector.broadcast %cst_1 : f32 to vector<80x64xf32>
    %c0_2 = arith.constant 0 : index
    %c0_3 = arith.constant 0 : index
    %3 = vector.load %arg22[%c0_2, %c0_3] : memref<80x64xf32, #tpu.memory_space<vmem>>, vector<80x64xf32>
    tpu.vector_store %arg22[%c0_2, %c0_3], %2 {strides = array<i32>} : memref<80x64xf32, #tpu.memory_space<vmem>>, vector<80x64xf32>,
    %cst_4 = arith.constant 0.000000e+00 : f32
    %4 = vector.broadcast %cst_4 : f32 to vector<40x128xf32>
    %c0_5 = arith.constant 0 : index
    %c0_6 = arith.constant 0 : index
    %5 = vector.load %arg24[%c0_5, %c0_6] : memref<40x128xf32, #tpu.memory_space<vmem>>, vector<40x128xf32>
    tpu.vector_store %arg24[%c0_5, %c0_6], %4 {strides = array<i32>} : memref<40x128xf32, #tpu.memory_space<vmem>>, vector<40x128xf32>,
    %c0_7 = arith.constant 0 : index
    %c0_8 = arith.constant 0 : index
    %6 = vector.load %arg1[%c0_7, %c0_8] : memref<512x32xbf16, #tpu.memory_space<vmem>>, vector<256x32xbf16>
    %c0_9 = arith.constant 0 : index
    %c0_10 = arith.constant 0 : index
    %7 = vector.load %arg2[%c0_9, %c0_10] : memref<32x32xbf16, #tpu.memory_space<vmem>>, vector<32x32xbf16>
    %cst_11 = arith.constant dense<0.000000e+00> : vector<256x32xf32>
    %8 = tpu.matmul %6, %7, %cst_11 {dimension_numbers = #tpu.dot_dimension_numbers<[1], [0], [0], [1], [0, 0, 1, 1], [], []>} : vector<256x32xbf16>, vector<32x32xbf16>, vector<256x32xf32> -> vector<256x32xf32>
    %c0_12 = arith.constant 0 : index
    %c0_13 = arith.constant 0 : index
    %9 = vector.load %arg3[%c0_12, %c0_13] : memref<1x32xf32, #tpu.memory_space<vmem>>, vector<1x32xf32>
    %10 = vector.broadcast %9 : vector<1x32xf32> to vector<256x32xf32>
    %11 = arith.mulf %8, %10 : vector<256x32xf32>
    %c0_14 = arith.constant 0 : index
    %c0_15 = arith.constant 0 : index
    %12 = vector.load %arg4[%c0_14, %c0_15] : memref<1x32xf32, #tpu.memory_space<vmem>>, vector<1x32xf32>
    %13 = vector.broadcast %12 : vector<1x32xf32> to vector<256x32xf32>
    %14 = arith.addf %11, %13 : vector<256x32xf32>
    %cst_16 = arith.constant 0.000000e+00 : f32
    %15 = vector.broadcast %cst_16 : f32 to vector<256x32xf32>
    %16 = arith.maximumf %14, %15 : vector<256x32xf32>
    %c0_17 = arith.constant 0 : index
    %c0_18 = arith.constant 0 : index
    %17 = vector.load %arg19[%c0_17, %c0_18] : memref<512x32xf32, #tpu.memory_space<vmem>>, vector<256x32xf32>
    tpu.vector_store %arg19[%c0_17, %c0_18], %16 {strides = array<i32>} : memref<512x32xf32, #tpu.memory_space<vmem>>, vector<256x32xf32>,
    %c256 = arith.constant 256 : index
    %c0_19 = arith.constant 0 : index
    %18 = vector.load %arg1[%c256, %c0_19] : memref<512x32xbf16, #tpu.memory_space<vmem>>, vector<256x32xbf16>
    %c0_20 = arith.constant 0 : index
    %c0_21 = arith.constant 0 : index
    %19 = vector.load %arg2[%c0_20, %c0_21] : memref<32x32xbf16, #tpu.memory_space<vmem>>, vector<32x32xbf16>
    %cst_22 = arith.constant dense<0.000000e+00> : vector<256x32xf32>
    %20 = tpu.matmul %18, %19, %cst_22 {dimension_numbers = #tpu.dot_dimension_numbers<[1], [0], [0], [1], [0, 0, 1, 1], [], []>} : vector<256x32xbf16>, vector<32x32xbf16>, vector<256x32xf32> -> vector<256x32xf32>
    %c0_23 = arith.constant 0 : index
    %c0_24 = arith.constant 0 : index
    %21 = vector.load %arg3[%c0_23, %c0_24] : memref<1x32xf32, #tpu.memory_space<vmem>>, vector<1x32xf32>
    %22 = vector.broadcast %21 : vector<1x32xf32> to vector<256x32xf32>
    %23 = arith.mulf %20, %22 : vector<256x32xf32>
    %c0_25 = arith.constant 0 : index
    %c0_26 = arith.constant 0 : index
    %24 = vector.load %arg4[%c0_25, %c0_26] : memref<1x32xf32, #tpu.memory_space<vmem>>, vector<1x32xf32>
    %25 = vector.broadcast %24 : vector<1x32xf32> to vector<256x32xf32>
    %26 = arith.addf %23, %25 : vector<256x32xf32>
    %cst_27 = arith.constant 0.000000e+00 : f32
    %27 = vector.broadcast %cst_27 : f32 to vector<256x32xf32>
    %28 = arith.maximumf %26, %27 : vector<256x32xf32>
    %c256_28 = arith.constant 256 : index
    %c0_29 = arith.constant 0 : index
    %29 = vector.load %arg19[%c256_28, %c0_29] : memref<512x32xf32, #tpu.memory_space<vmem>>, vector<256x32xf32>
    tpu.vector_store %arg19[%c256_28, %c0_29], %28 {strides = array<i32>} : memref<512x32xf32, #tpu.memory_space<vmem>>, vector<256x32xf32>,
    %c0_30 = arith.constant 0 : index
    %c0_31 = arith.constant 0 : index
    %30 = tpu.strided_load %arg19[%c0_30, %c0_31] {strides = array<i32: 2, 1>} : memref<512x32xf32, #tpu.memory_space<vmem>>, vector<8x32xf32>
    %c1 = arith.constant 1 : index
    %c0_32 = arith.constant 0 : index
    %31 = tpu.strided_load %arg19[%c1, %c0_32] {strides = array<i32: 2, 1>} : memref<512x32xf32, #tpu.memory_space<vmem>>, vector<8x32xf32>
    %32 = arith.maximumf %30, %31 : vector<8x32xf32>
    %c16 = arith.constant 16 : index
    %c0_33 = arith.constant 0 : index
    %33 = tpu.strided_load %arg19[%c16, %c0_33] {strides = array<i32: 2, 1>} : memref<512x32xf32, #tpu.memory_space<vmem>>, vector<8x32xf32>
    %c17 = arith.constant 17 : index
    %c0_34 = arith.constant 0 : index
    %34 = tpu.strided_load %arg19[%c17, %c0_34] {strides = array<i32: 2, 1>} : memref<512x32xf32, #tpu.memory_space<vmem>>, vector<8x32xf32>
    %35 = arith.maximumf %33, %34 : vector<8x32xf32>
    %36 = arith.maximumf %32, %35 : vector<8x32xf32>
    %c11 = arith.constant 11 : index
    %c0_35 = arith.constant 0 : index
    %37 = vector.load %arg20[%c11, %c0_35] : memref<208x32xf32, #tpu.memory_space<vmem>>, vector<8x32xf32>
    tpu.vector_store %arg20[%c11, %c0_35], %36 {strides = array<i32>} : memref<208x32xf32, #tpu.memory_space<vmem>>, vector<8x32xf32>,
    %c32 = arith.constant 32 : index
    %c0_36 = arith.constant 0 : index
    %38 = tpu.strided_load %arg19[%c32, %c0_36] {strides = array<i32: 2, 1>} : memref<512x32xf32, #tpu.memory_space<vmem>>, vector<8x32xf32>
    %c33 = arith.constant 33 : index
    %c0_37 = arith.constant 0 : index
    %39 = tpu.strided_load %arg19[%c33, %c0_37] {strides = array<i32: 2, 1>} : memref<512x32xf32, #tpu.memory_space<vmem>>, vector<8x32xf32>
    %40 = arith.maximumf %38, %39 : vector<8x32xf32>
    %c48 = arith.constant 48 : index
    %c0_38 = arith.constant 0 : index
    %41 = tpu.strided_load %arg19[%c48, %c0_38] {strides = array<i32: 2, 1>} : memref<512x32xf32, #tpu.memory_space<vmem>>, vector<8x32xf32>
    %c49 = arith.constant 49 : index
    %c0_39 = arith.constant 0 : index
    %42 = tpu.strided_load %arg19[%c49, %c0_39] {strides = array<i32: 2, 1>} : memref<512x32xf32, #tpu.memory_space<vmem>>, vector<8x32xf32>
    %43 = arith.maximumf %41, %42 : vector<8x32xf32>
    %44 = arith.maximumf %40, %43 : vector<8x32xf32>
    %c21 = arith.constant 21 : index
    %c0_40 = arith.constant 0 : index
    %45 = vector.load %arg20[%c21, %c0_40] : memref<208x32xf32, #tpu.memory_space<vmem>>, vector<8x32xf32>
    tpu.vector_store %arg20[%c21, %c0_40], %44 {strides = array<i32>} : memref<208x32xf32, #tpu.memory_space<vmem>>, vector<8x32xf32>,
    %c64 = arith.constant 64 : index
    %c0_41 = arith.constant 0 : index
    %46 = tpu.strided_load %arg19[%c64, %c0_41] {strides = array<i32: 2, 1>} : memref<512x32xf32, #tpu.memory_space<vmem>>, vector<8x32xf32>
    %c65 = arith.constant 65 : index
    %c0_42 = arith.constant 0 : index
    %47 = tpu.strided_load %arg19[%c65, %c0_42] {strides = array<i32: 2, 1>} : memref<512x32xf32, #tpu.memory_space<vmem>>, vector<8x32xf32>
    %48 = arith.maximumf %46, %47 : vector<8x32xf32>
    %c80 = arith.constant 80 : index
    %c0_43 = arith.constant 0 : index
    %49 = tpu.strided_load %arg19[%c80, %c0_43] {strides = array<i32: 2, 1>} : memref<512x32xf32, #tpu.memory_space<vmem>>, vector<8x32xf32>
    %c81 = arith.constant 81 : index
    %c0_44 = arith.constant 0 : index
    %50 = tpu.strided_load %arg19[%c81, %c0_44] {strides = array<i32: 2, 1>} : memref<512x32xf32, #tpu.memory_space<vmem>>, vector<8x32xf32>
    %51 = arith.maximumf %49, %50 : vector<8x32xf32>
    %52 = arith.maximumf %48, %51 : vector<8x32xf32>
    %c31 = arith.constant 31 : index
    %c0_45 = arith.constant 0 : index
    %53 = vector.load %arg20[%c31, %c0_45] : memref<208x32xf32, #tpu.memory_space<vmem>>, vector<8x32xf32>
    tpu.vector_store %arg20[%c31, %c0_45], %52 {strides = array<i32>} : memref<208x32xf32, #tpu.memory_space<vmem>>, vector<8x32xf32>,
    %c96 = arith.constant 96 : index
    %c0_46 = arith.constant 0 : index
    %54 = tpu.strided_load %arg19[%c96, %c0_46] {strides = array<i32: 2, 1>} : memref<512x32xf32, #tpu.memory_space<vmem>>, vector<8x32xf32>
    %c97 = arith.constant 97 : index
    %c0_47 = arith.constant 0 : index
    %55 = tpu.strided_load %arg19[%c97, %c0_47] {strides = array<i32: 2, 1>} : memref<512x32xf32, #tpu.memory_space<vmem>>, vector<8x32xf32>
    %56 = arith.maximumf %54, %55 : vector<8x32xf32>
    %c112 = arith.constant 112 : index
    %c0_48 = arith.constant 0 : index
    %57 = tpu.strided_load %arg19[%c112, %c0_48] {strides = array<i32: 2, 1>} : memref<512x32xf32, #tpu.memory_space<vmem>>, vector<8x32xf32>
    %c113 = arith.constant 113 : index
    %c0_49 = arith.constant 0 : index
    %58 = tpu.strided_load %arg19[%c113, %c0_49] {strides = array<i32: 2, 1>} : memref<512x32xf32, #tpu.memory_space<vmem>>, vector<8x32xf32>
    %59 = arith.maximumf %57, %58 : vector<8x32xf32>
    %60 = arith.maximumf %56, %59 : vector<8x32xf32>
    %c41 = arith.constant 41 : index
    %c0_50 = arith.constant 0 : index
    %61 = vector.load %arg20[%c41, %c0_50] : memref<208x32xf32, #tpu.memory_space<vmem>>, vector<8x32xf32>
    tpu.vector_store %arg20[%c41, %c0_50], %60 {strides = array<i32>} : memref<208x32xf32, #tpu.memory_space<vmem>>, vector<8x32xf32>,
    %c128 = arith.constant 128 : index
    %c0_51 = arith.constant 0 : index
    %62 = tpu.strided_load %arg19[%c128, %c0_51] {strides = array<i32: 2, 1>} : memref<512x32xf32, #tpu.memory_space<vmem>>, vector<8x32xf32>
    %c129 = arith.constant 129 : index
    %c0_52 = arith.constant 0 : index
    %63 = tpu.strided_load %arg19[%c129, %c0_52] {strides = array<i32: 2, 1>} : memref<512x32xf32, #tpu.memory_space<vmem>>, vector<8x32xf32>
    %64 = arith.maximumf %62, %63 : vector<8x32xf32>
    %c144 = arith.constant 144 : index
    %c0_53 = arith.constant 0 : index
    %65 = tpu.strided_load %arg19[%c144, %c0_53] {strides = array<i32: 2, 1>} : memref<512x32xf32, #tpu.memory_space<vmem>>, vector<8x32xf32>
    %c145 = arith.constant 145 : index
    %c0_54 = arith.constant 0 : index
    %66 = tpu.strided_load %arg19[%c145, %c0_54] {strides = array<i32: 2, 1>} : memref<512x32xf32, #tpu.memory_space<vmem>>, vector<8x32xf32>
    %67 = arith.maximumf %65, %66 : vector<8x32xf32>
    %68 = arith.maximumf %64, %67 : vector<8x32xf32>
    %c51 = arith.constant 51 : index
    %c0_55 = arith.constant 0 : index
    %69 = vector.load %arg20[%c51, %c0_55] : memref<208x32xf32, #tpu.memory_space<vmem>>, vector<8x32xf32>
    tpu.vector_store %arg20[%c51, %c0_55], %68 {strides = array<i32>} : memref<208x32xf32, #tpu.memory_space<vmem>>, vector<8x32xf32>,
    %c160 = arith.constant 160 : index
    %c0_56 = arith.constant 0 : index
    %70 = tpu.strided_load %arg19[%c160, %c0_56] {strides = array<i32: 2, 1>} : memref<512x32xf32, #tpu.memory_space<vmem>>, vector<8x32xf32>
    %c161 = arith.constant 161 : index
    %c0_57 = arith.constant 0 : index
    %71 = tpu.strided_load %arg19[%c161, %c0_57] {strides = array<i32: 2, 1>} : memref<512x32xf32, #tpu.memory_space<vmem>>, vector<8x32xf32>
    %72 = arith.maximumf %70, %71 : vector<8x32xf32>
    %c176 = arith.constant 176 : index
    %c0_58 = arith.constant 0 : index
    %73 = tpu.strided_load %arg19[%c176, %c0_58] {strides = array<i32: 2, 1>} : memref<512x32xf32, #tpu.memory_space<vmem>>, vector<8x32xf32>
    %c177 = arith.constant 177 : index
    %c0_59 = arith.constant 0 : index
    %74 = tpu.strided_load %arg19[%c177, %c0_59] {strides = array<i32: 2, 1>} : memref<512x32xf32, #tpu.memory_space<vmem>>, vector<8x32xf32>
    %75 = arith.maximumf %73, %74 : vector<8x32xf32>
    %76 = arith.maximumf %72, %75 : vector<8x32xf32>
    %c61 = arith.constant 61 : index
    %c0_60 = arith.constant 0 : index
    %77 = vector.load %arg20[%c61, %c0_60] : memref<208x32xf32, #tpu.memory_space<vmem>>, vector<8x32xf32>
    tpu.vector_store %arg20[%c61, %c0_60], %76 {strides = array<i32>} : memref<208x32xf32, #tpu.memory_space<vmem>>, vector<8x32xf32>,
    %c192 = arith.constant 192 : index
    %c0_61 = arith.constant 0 : index
    %78 = tpu.strided_load %arg19[%c192, %c0_61] {strides = array<i32: 2, 1>} : memref<512x32xf32, #tpu.memory_space<vmem>>, vector<8x32xf32>
    %c193 = arith.constant 193 : index
    %c0_62 = arith.constant 0 : index
    %79 = tpu.strided_load %arg19[%c193, %c0_62] {strides = array<i32: 2, 1>} : memref<512x32xf32, #tpu.memory_space<vmem>>, vector<8x32xf32>
    %80 = arith.maximumf %78, %79 : vector<8x32xf32>
    %c208 = arith.constant 208 : index
    %c0_63 = arith.constant 0 : index
    %81 = tpu.strided_load %arg19[%c208, %c0_63] {strides = array<i32: 2, 1>} : memref<512x32xf32, #tpu.memory_space<vmem>>, vector<8x32xf32>
    %c209 = arith.constant 209 : index
    %c0_64 = arith.constant 0 : index
    %82 = tpu.strided_load %arg19[%c209, %c0_64] {strides = array<i32: 2, 1>} : memref<512x32xf32, #tpu.memory_space<vmem>>, vector<8x32xf32>
    %83 = arith.maximumf %81, %82 : vector<8x32xf32>
    %84 = arith.maximumf %80, %83 : vector<8x32xf32>
    %c71 = arith.constant 71 : index
    %c0_65 = arith.constant 0 : index
    %85 = vector.load %arg20[%c71, %c0_65] : memref<208x32xf32, #tpu.memory_space<vmem>>, vector<8x32xf32>
    tpu.vector_store %arg20[%c71, %c0_65], %84 {strides = array<i32>} : memref<208x32xf32, #tpu.memory_space<vmem>>, vector<8x32xf32>,
    %c224 = arith.constant 224 : index
    %c0_66 = arith.constant 0 : index
    %86 = tpu.strided_load %arg19[%c224, %c0_66] {strides = array<i32: 2, 1>} : memref<512x32xf32, #tpu.memory_space<vmem>>, vector<8x32xf32>
    %c225 = arith.constant 225 : index
    %c0_67 = arith.constant 0 : index
    %87 = tpu.strided_load %arg19[%c225, %c0_67] {strides = array<i32: 2, 1>} : memref<512x32xf32, #tpu.memory_space<vmem>>, vector<8x32xf32>
    %88 = arith.maximumf %86, %87 : vector<8x32xf32>
    %c240 = arith.constant 240 : index
    %c0_68 = arith.constant 0 : index
    %89 = tpu.strided_load %arg19[%c240, %c0_68] {strides = array<i32: 2, 1>} : memref<512x32xf32, #tpu.memory_space<vmem>>, vector<8x32xf32>
    %c241 = arith.constant 241 : index
    %c0_69 = arith.constant 0 : index
    %90 = tpu.strided_load %arg19[%c241, %c0_69] {strides = array<i32: 2, 1>} : memref<512x32xf32, #tpu.memory_space<vmem>>, vector<8x32xf32>
    %91 = arith.maximumf %89, %90 : vector<8x32xf32>
    %92 = arith.maximumf %88, %91 : vector<8x32xf32>
    %c81_70 = arith.constant 81 : index
    %c0_71 = arith.constant 0 : index
    %93 = vector.load %arg20[%c81_70, %c0_71] : memref<208x32xf32, #tpu.memory_space<vmem>>, vector<8x32xf32>
    tpu.vector_store %arg20[%c81_70, %c0_71], %92 {strides = array<i32>} : memref<208x32xf32, #tpu.memory_space<vmem>>, vector<8x32xf32>,
    %c256_72 = arith.constant 256 : index
    %c0_73 = arith.constant 0 : index
    %94 = tpu.strided_load %arg19[%c256_72, %c0_73] {strides = array<i32: 2, 1>} : memref<512x32xf32, #tpu.memory_space<vmem>>, vector<8x32xf32>
    %c257 = arith.constant 257 : index
    %c0_74 = arith.constant 0 : index
    %95 = tpu.strided_load %arg19[%c257, %c0_74] {strides = array<i32: 2, 1>} : memref<512x32xf32, #tpu.memory_space<vmem>>, vector<8x32xf32>
    %96 = arith.maximumf %94, %95 : vector<8x32xf32>
    %c272 = arith.constant 272 : index
    %c0_75 = arith.constant 0 : index
    %97 = tpu.strided_load %arg19[%c272, %c0_75] {strides = array<i32: 2, 1>} : memref<512x32xf32, #tpu.memory_space<vmem>>, vector<8x32xf32>
    %c273 = arith.constant 273 : index
    %c0_76 = arith.constant 0 : index
    %98 = tpu.strided_load %arg19[%c273, %c0_76] {strides = array<i32: 2, 1>} : memref<512x32xf32, #tpu.memory_space<vmem>>, vector<8x32xf32>
    %99 = arith.maximumf %97, %98 : vector<8x32xf32>
    %100 = arith.maximumf %96, %99 : vector<8x32xf32>
    %c111 = arith.constant 111 : index
    %c0_77 = arith.constant 0 : index
    %101 = vector.load %arg20[%c111, %c0_77] : memref<208x32xf32, #tpu.memory_space<vmem>>, vector<8x32xf32>
    tpu.vector_store %arg20[%c111, %c0_77], %100 {strides = array<i32>} : memref<208x32xf32, #tpu.memory_space<vmem>>, vector<8x32xf32>,
    %c288 = arith.constant 288 : index
    %c0_78 = arith.constant 0 : index
    %102 = tpu.strided_load %arg19[%c288, %c0_78] {strides = array<i32: 2, 1>} : memref<512x32xf32, #tpu.memory_space<vmem>>, vector<8x32xf32>
    %c289 = arith.constant 289 : index
    %c0_79 = arith.constant 0 : index
    %103 = tpu.strided_load %arg19[%c289, %c0_79] {strides = array<i32: 2, 1>} : memref<512x32xf32, #tpu.memory_space<vmem>>, vector<8x32xf32>
    %104 = arith.maximumf %102, %103 : vector<8x32xf32>
    %c304 = arith.constant 304 : index
    %c0_80 = arith.constant 0 : index
    %105 = tpu.strided_load %arg19[%c304, %c0_80] {strides = array<i32: 2, 1>} : memref<512x32xf32, #tpu.memory_space<vmem>>, vector<8x32xf32>
    %c305 = arith.constant 305 : index
    %c0_81 = arith.constant 0 : index
    %106 = tpu.strided_load %arg19[%c305, %c0_81] {strides = array<i32: 2, 1>} : memref<512x32xf32, #tpu.memory_space<vmem>>, vector<8x32xf32>
    %107 = arith.maximumf %105, %106 : vector<8x32xf32>
    %108 = arith.maximumf %104, %107 : vector<8x32xf32>
    %c121 = arith.constant 121 : index
    %c0_82 = arith.constant 0 : index
    %109 = vector.load %arg20[%c121, %c0_82] : memref<208x32xf32, #tpu.memory_space<vmem>>, vector<8x32xf32>
    tpu.vector_store %arg20[%c121, %c0_82], %108 {strides = array<i32>} : memref<208x32xf32, #tpu.memory_space<vmem>>, vector<8x32xf32>,
    %c320 = arith.constant 320 : index
    %c0_83 = arith.constant 0 : index
    %110 = tpu.strided_load %arg19[%c320, %c0_83] {strides = array<i32: 2, 1>} : memref<512x32xf32, #tpu.memory_space<vmem>>, vector<8x32xf32>
    %c321 = arith.constant 321 : index
    %c0_84 = arith.constant 0 : index
    %111 = tpu.strided_load %arg19[%c321, %c0_84] {strides = array<i32: 2, 1>} : memref<512x32xf32, #tpu.memory_space<vmem>>, vector<8x32xf32>
    %112 = arith.maximumf %110, %111 : vector<8x32xf32>
    %c336 = arith.constant 336 : index
    %c0_85 = arith.constant 0 : index
    %113 = tpu.strided_load %arg19[%c336, %c0_85] {strides = array<i32: 2, 1>} : memref<512x32xf32, #tpu.memory_space<vmem>>, vector<8x32xf32>
    %c337 = arith.constant 337 : index
    %c0_86 = arith.constant 0 : index
    %114 = tpu.strided_load %arg19[%c337, %c0_86] {strides = array<i32: 2, 1>} : memref<512x32xf32, #tpu.memory_space<vmem>>, vector<8x32xf32>
    %115 = arith.maximumf %113, %114 : vector<8x32xf32>
    %116 = arith.maximumf %112, %115 : vector<8x32xf32>
    %c131 = arith.constant 131 : index
    %c0_87 = arith.constant 0 : index
    %117 = vector.load %arg20[%c131, %c0_87] : memref<208x32xf32, #tpu.memory_space<vmem>>, vector<8x32xf32>
    tpu.vector_store %arg20[%c131, %c0_87], %116 {strides = array<i32>} : memref<208x32xf32, #tpu.memory_space<vmem>>, vector<8x32xf32>,
    %c352 = arith.constant 352 : index
    %c0_88 = arith.constant 0 : index
    %118 = tpu.strided_load %arg19[%c352, %c0_88] {strides = array<i32: 2, 1>} : memref<512x32xf32, #tpu.memory_space<vmem>>, vector<8x32xf32>
    %c353 = arith.constant 353 : index
    %c0_89 = arith.constant 0 : index
    %119 = tpu.strided_load %arg19[%c353, %c0_89] {strides = array<i32: 2, 1>} : memref<512x32xf32, #tpu.memory_space<vmem>>, vector<8x32xf32>
    %120 = arith.maximumf %118, %119 : vector<8x32xf32>
    %c368 = arith.constant 368 : index
    %c0_90 = arith.constant 0 : index
    %121 = tpu.strided_load %arg19[%c368, %c0_90] {strides = array<i32: 2, 1>} : memref<512x32xf32, #tpu.memory_space<vmem>>, vector<8x32xf32>
    %c369 = arith.constant 369 : index
    %c0_91 = arith.constant 0 : index
    %122 = tpu.strided_load %arg19[%c369, %c0_91] {strides = array<i32: 2, 1>} : memref<512x32xf32, #tpu.memory_space<vmem>>, vector<8x32xf32>
    %123 = arith.maximumf %121, %122 : vector<8x32xf32>
    %124 = arith.maximumf %120, %123 : vector<8x32xf32>
    %c141 = arith.constant 141 : index
    %c0_92 = arith.constant 0 : index
    %125 = vector.load %arg20[%c141, %c0_92] : memref<208x32xf32, #tpu.memory_space<vmem>>, vector<8x32xf32>
    tpu.vector_store %arg20[%c141, %c0_92], %124 {strides = array<i32>} : memref<208x32xf32, #tpu.memory_space<vmem>>, vector<8x32xf32>,
    %c384 = arith.constant 384 : index
    %c0_93 = arith.constant 0 : index
    %126 = tpu.strided_load %arg19[%c384, %c0_93] {strides = array<i32: 2, 1>} : memref<512x32xf32, #tpu.memory_space<vmem>>, vector<8x32xf32>
    %c385 = arith.constant 385 : index
    %c0_94 = arith.constant 0 : index
    %127 = tpu.strided_load %arg19[%c385, %c0_94] {strides = array<i32: 2, 1>} : memref<512x32xf32, #tpu.memory_space<vmem>>, vector<8x32xf32>
    %128 = arith.maximumf %126, %127 : vector<8x32xf32>
    %c400 = arith.constant 400 : index
    %c0_95 = arith.constant 0 : index
    %129 = tpu.strided_load %arg19[%c400, %c0_95] {strides = array<i32: 2, 1>} : memref<512x32xf32, #tpu.memory_space<vmem>>, vector<8x32xf32>
    %c401 = arith.constant 401 : index
    %c0_96 = arith.constant 0 : index
    %130 = tpu.strided_load %arg19[%c401, %c0_96] {strides = array<i32: 2, 1>} : memref<512x32xf32, #tpu.memory_space<vmem>>, vector<8x32xf32>
    %131 = arith.maximumf %129, %130 : vector<8x32xf32>
    %132 = arith.maximumf %128, %131 : vector<8x32xf32>
    %c151 = arith.constant 151 : index
    %c0_97 = arith.constant 0 : index
    %133 = vector.load %arg20[%c151, %c0_97] : memref<208x32xf32, #tpu.memory_space<vmem>>, vector<8x32xf32>
    tpu.vector_store %arg20[%c151, %c0_97], %132 {strides = array<i32>} : memref<208x32xf32, #tpu.memory_space<vmem>>, vector<8x32xf32>,
    %c416 = arith.constant 416 : index
    %c0_98 = arith.constant 0 : index
    %134 = tpu.strided_load %arg19[%c416, %c0_98] {strides = array<i32: 2, 1>} : memref<512x32xf32, #tpu.memory_space<vmem>>, vector<8x32xf32>
    %c417 = arith.constant 417 : index
    %c0_99 = arith.constant 0 : index
    %135 = tpu.strided_load %arg19[%c417, %c0_99] {strides = array<i32: 2, 1>} : memref<512x32xf32, #tpu.memory_space<vmem>>, vector<8x32xf32>
    %136 = arith.maximumf %134, %135 : vector<8x32xf32>
    %c432 = arith.constant 432 : index
    %c0_100 = arith.constant 0 : index
    %137 = tpu.strided_load %arg19[%c432, %c0_100] {strides = array<i32: 2, 1>} : memref<512x32xf32, #tpu.memory_space<vmem>>, vector<8x32xf32>
    %c433 = arith.constant 433 : index
    %c0_101 = arith.constant 0 : index
    %138 = tpu.strided_load %arg19[%c433, %c0_101] {strides = array<i32: 2, 1>} : memref<512x32xf32, #tpu.memory_space<vmem>>, vector<8x32xf32>
    %139 = arith.maximumf %137, %138 : vector<8x32xf32>
    %140 = arith.maximumf %136, %139 : vector<8x32xf32>
    %c161_102 = arith.constant 161 : index
    %c0_103 = arith.constant 0 : index
    %141 = vector.load %arg20[%c161_102, %c0_103] : memref<208x32xf32, #tpu.memory_space<vmem>>, vector<8x32xf32>
    tpu.vector_store %arg20[%c161_102, %c0_103], %140 {strides = array<i32>} : memref<208x32xf32, #tpu.memory_space<vmem>>, vector<8x32xf32>,
    %c448 = arith.constant 448 : index
    %c0_104 = arith.constant 0 : index
    %142 = tpu.strided_load %arg19[%c448, %c0_104] {strides = array<i32: 2, 1>} : memref<512x32xf32, #tpu.memory_space<vmem>>, vector<8x32xf32>
    %c449 = arith.constant 449 : index
    %c0_105 = arith.constant 0 : index
    %143 = tpu.strided_load %arg19[%c449, %c0_105] {strides = array<i32: 2, 1>} : memref<512x32xf32, #tpu.memory_space<vmem>>, vector<8x32xf32>
    %144 = arith.maximumf %142, %143 : vector<8x32xf32>
    %c464 = arith.constant 464 : index
    %c0_106 = arith.constant 0 : index
    %145 = tpu.strided_load %arg19[%c464, %c0_106] {strides = array<i32: 2, 1>} : memref<512x32xf32, #tpu.memory_space<vmem>>, vector<8x32xf32>
    %c465 = arith.constant 465 : index
    %c0_107 = arith.constant 0 : index
    %146 = tpu.strided_load %arg19[%c465, %c0_107] {strides = array<i32: 2, 1>} : memref<512x32xf32, #tpu.memory_space<vmem>>, vector<8x32xf32>
    %147 = arith.maximumf %145, %146 : vector<8x32xf32>
    %148 = arith.maximumf %144, %147 : vector<8x32xf32>
    %c171 = arith.constant 171 : index
    %c0_108 = arith.constant 0 : index
    %149 = vector.load %arg20[%c171, %c0_108] : memref<208x32xf32, #tpu.memory_space<vmem>>, vector<8x32xf32>
    tpu.vector_store %arg20[%c171, %c0_108], %148 {strides = array<i32>} : memref<208x32xf32, #tpu.memory_space<vmem>>, vector<8x32xf32>,
    %c480 = arith.constant 480 : index
    %c0_109 = arith.constant 0 : index
    %150 = tpu.strided_load %arg19[%c480, %c0_109] {strides = array<i32: 2, 1>} : memref<512x32xf32, #tpu.memory_space<vmem>>, vector<8x32xf32>
    %c481 = arith.constant 481 : index
    %c0_110 = arith.constant 0 : index
    %151 = tpu.strided_load %arg19[%c481, %c0_110] {strides = array<i32: 2, 1>} : memref<512x32xf32, #tpu.memory_space<vmem>>, vector<8x32xf32>
    %152 = arith.maximumf %150, %151 : vector<8x32xf32>
    %c496 = arith.constant 496 : index
    %c0_111 = arith.constant 0 : index
    %153 = tpu.strided_load %arg19[%c496, %c0_111] {strides = array<i32: 2, 1>} : memref<512x32xf32, #tpu.memory_space<vmem>>, vector<8x32xf32>
    %c497 = arith.constant 497 : index
    %c0_112 = arith.constant 0 : index
    %154 = tpu.strided_load %arg19[%c497, %c0_112] {strides = array<i32: 2, 1>} : memref<512x32xf32, #tpu.memory_space<vmem>>, vector<8x32xf32>
    %155 = arith.maximumf %153, %154 : vector<8x32xf32>
    %156 = arith.maximumf %152, %155 : vector<8x32xf32>
    %c181 = arith.constant 181 : index
    %c0_113 = arith.constant 0 : index
    %157 = vector.load %arg20[%c181, %c0_113] : memref<208x32xf32, #tpu.memory_space<vmem>>, vector<8x32xf32>
    tpu.vector_store %arg20[%c181, %c0_113], %156 {strides = array<i32>} : memref<208x32xf32, #tpu.memory_space<vmem>>, vector<8x32xf32>,
    %cst_114 = arith.constant 0.000000e+00 : f32
    %158 = vector.broadcast %cst_114 : f32 to vector<180x64xf32>
    %c0_115 = arith.constant 0 : index
    %c0_116 = arith.constant 0 : index
    %159 = vector.load %arg20[%c0_115, %c0_116] : memref<208x32xf32, #tpu.memory_space<vmem>>, vector<180x32xf32>
    %160 = arith.truncf %159 : vector<180x32xf32> to vector<180x32xbf16>
    %c0_117 = arith.constant 0 : index
    %c0_118 = arith.constant 0 : index
    %c0_119 = arith.constant 0 : index
    %161 = vector.load %arg5[%c0_117, %c0_118, %c0_119] : memref<9x32x64xbf16, #tpu.memory_space<vmem>>, vector<1x32x64xbf16>
    %162 = vector.shape_cast %161 : vector<1x32x64xbf16> to vector<32x64xbf16>
    %cst_120 = arith.constant dense<0.000000e+00> : vector<180x64xf32>
    %163 = tpu.matmul %160, %162, %cst_120 {dimension_numbers = #tpu.dot_dimension_numbers<[1], [0], [0], [1], [0, 0, 1, 1], [], []>} : vector<180x32xbf16>, vector<32x64xbf16>, vector<180x64xf32> -> vector<180x64xf32>
    %164 = arith.addf %158, %163 : vector<180x64xf32>
    %c1_121 = arith.constant 1 : index
    %c0_122 = arith.constant 0 : index
    %165 = vector.load %arg20[%c1_121, %c0_122] : memref<208x32xf32, #tpu.memory_space<vmem>>, vector<180x32xf32>
    %166 = arith.truncf %165 : vector<180x32xf32> to vector<180x32xbf16>
    %c1_123 = arith.constant 1 : index
    %c0_124 = arith.constant 0 : index
    %c0_125 = arith.constant 0 : index
    %167 = vector.load %arg5[%c1_123, %c0_124, %c0_125] : memref<9x32x64xbf16, #tpu.memory_space<vmem>>, vector<1x32x64xbf16>
    %168 = vector.shape_cast %167 : vector<1x32x64xbf16> to vector<32x64xbf16>
    %cst_126 = arith.constant dense<0.000000e+00> : vector<180x64xf32>
    %169 = tpu.matmul %166, %168, %cst_126 {dimension_numbers = #tpu.dot_dimension_numbers<[1], [0], [0], [1], [0, 0, 1, 1], [], []>} : vector<180x32xbf16>, vector<32x64xbf16>, vector<180x64xf32> -> vector<180x64xf32>
    %170 = arith.addf %164, %169 : vector<180x64xf32>
    %c2 = arith.constant 2 : index
    %c0_127 = arith.constant 0 : index
    %171 = vector.load %arg20[%c2, %c0_127] : memref<208x32xf32, #tpu.memory_space<vmem>>, vector<180x32xf32>
    %172 = arith.truncf %171 : vector<180x32xf32> to vector<180x32xbf16>
    %c2_128 = arith.constant 2 : index
    %c0_129 = arith.constant 0 : index
    %c0_130 = arith.constant 0 : index
    %173 = vector.load %arg5[%c2_128, %c0_129, %c0_130] : memref<9x32x64xbf16, #tpu.memory_space<vmem>>, vector<1x32x64xbf16>
    %174 = vector.shape_cast %173 : vector<1x32x64xbf16> to vector<32x64xbf16>
    %cst_131 = arith.constant dense<0.000000e+00> : vector<180x64xf32>
    %175 = tpu.matmul %172, %174, %cst_131 {dimension_numbers = #tpu.dot_dimension_numbers<[1], [0], [0], [1], [0, 0, 1, 1], [], []>} : vector<180x32xbf16>, vector<32x64xbf16>, vector<180x64xf32> -> vector<180x64xf32>
    %176 = arith.addf %170, %175 : vector<180x64xf32>
    %c10 = arith.constant 10 : index
    %c0_132 = arith.constant 0 : index
    %177 = vector.load %arg20[%c10, %c0_132] : memref<208x32xf32, #tpu.memory_space<vmem>>, vector<180x32xf32>
    %178 = arith.truncf %177 : vector<180x32xf32> to vector<180x32xbf16>
    %c3 = arith.constant 3 : index
    %c0_133 = arith.constant 0 : index
    %c0_134 = arith.constant 0 : index
    %179 = vector.load %arg5[%c3, %c0_133, %c0_134] : memref<9x32x64xbf16, #tpu.memory_space<vmem>>, vector<1x32x64xbf16>
    %180 = vector.shape_cast %179 : vector<1x32x64xbf16> to vector<32x64xbf16>
    %cst_135 = arith.constant dense<0.000000e+00> : vector<180x64xf32>
    %181 = tpu.matmul %178, %180, %cst_135 {dimension_numbers = #tpu.dot_dimension_numbers<[1], [0], [0], [1], [0, 0, 1, 1], [], []>} : vector<180x32xbf16>, vector<32x64xbf16>, vector<180x64xf32> -> vector<180x64xf32>
    %182 = arith.addf %176, %181 : vector<180x64xf32>
    %c11_136 = arith.constant 11 : index
    %c0_137 = arith.constant 0 : index
    %183 = vector.load %arg20[%c11_136, %c0_137] : memref<208x32xf32, #tpu.memory_space<vmem>>, vector<180x32xf32>
    %184 = arith.truncf %183 : vector<180x32xf32> to vector<180x32xbf16>
    %c4 = arith.constant 4 : index
    %c0_138 = arith.constant 0 : index
    %c0_139 = arith.constant 0 : index
    %185 = vector.load %arg5[%c4, %c0_138, %c0_139] : memref<9x32x64xbf16, #tpu.memory_space<vmem>>, vector<1x32x64xbf16>
    %186 = vector.shape_cast %185 : vector<1x32x64xbf16> to vector<32x64xbf16>
    %cst_140 = arith.constant dense<0.000000e+00> : vector<180x64xf32>
    %187 = tpu.matmul %184, %186, %cst_140 {dimension_numbers = #tpu.dot_dimension_numbers<[1], [0], [0], [1], [0, 0, 1, 1], [], []>} : vector<180x32xbf16>, vector<32x64xbf16>, vector<180x64xf32> -> vector<180x64xf32>
    %188 = arith.addf %182, %187 : vector<180x64xf32>
    %c12 = arith.constant 12 : index
    %c0_141 = arith.constant 0 : index
    %189 = vector.load %arg20[%c12, %c0_141] : memref<208x32xf32, #tpu.memory_space<vmem>>, vector<180x32xf32>
    %190 = arith.truncf %189 : vector<180x32xf32> to vector<180x32xbf16>
    %c5 = arith.constant 5 : index
    %c0_142 = arith.constant 0 : index
    %c0_143 = arith.constant 0 : index
    %191 = vector.load %arg5[%c5, %c0_142, %c0_143] : memref<9x32x64xbf16, #tpu.memory_space<vmem>>, vector<1x32x64xbf16>
    %192 = vector.shape_cast %191 : vector<1x32x64xbf16> to vector<32x64xbf16>
    %cst_144 = arith.constant dense<0.000000e+00> : vector<180x64xf32>
    %193 = tpu.matmul %190, %192, %cst_144 {dimension_numbers = #tpu.dot_dimension_numbers<[1], [0], [0], [1], [0, 0, 1, 1], [], []>} : vector<180x32xbf16>, vector<32x64xbf16>, vector<180x64xf32> -> vector<180x64xf32>
    %194 = arith.addf %188, %193 : vector<180x64xf32>
    %c20 = arith.constant 20 : index
    %c0_145 = arith.constant 0 : index
    %195 = vector.load %arg20[%c20, %c0_145] : memref<208x32xf32, #tpu.memory_space<vmem>>, vector<180x32xf32>
    %196 = arith.truncf %195 : vector<180x32xf32> to vector<180x32xbf16>
    %c6 = arith.constant 6 : index
    %c0_146 = arith.constant 0 : index
    %c0_147 = arith.constant 0 : index
    %197 = vector.load %arg5[%c6, %c0_146, %c0_147] : memref<9x32x64xbf16, #tpu.memory_space<vmem>>, vector<1x32x64xbf16>
    %198 = vector.shape_cast %197 : vector<1x32x64xbf16> to vector<32x64xbf16>
    %cst_148 = arith.constant dense<0.000000e+00> : vector<180x64xf32>
    %199 = tpu.matmul %196, %198, %cst_148 {dimension_numbers = #tpu.dot_dimension_numbers<[1], [0], [0], [1], [0, 0, 1, 1], [], []>} : vector<180x32xbf16>, vector<32x64xbf16>, vector<180x64xf32> -> vector<180x64xf32>
    %200 = arith.addf %194, %199 : vector<180x64xf32>
    %c21_149 = arith.constant 21 : index
    %c0_150 = arith.constant 0 : index
    %201 = vector.load %arg20[%c21_149, %c0_150] : memref<208x32xf32, #tpu.memory_space<vmem>>, vector<180x32xf32>
    %202 = arith.truncf %201 : vector<180x32xf32> to vector<180x32xbf16>
    %c7 = arith.constant 7 : index
    %c0_151 = arith.constant 0 : index
    %c0_152 = arith.constant 0 : index
    %203 = vector.load %arg5[%c7, %c0_151, %c0_152] : memref<9x32x64xbf16, #tpu.memory_space<vmem>>, vector<1x32x64xbf16>
    %204 = vector.shape_cast %203 : vector<1x32x64xbf16> to vector<32x64xbf16>
    %cst_153 = arith.constant dense<0.000000e+00> : vector<180x64xf32>
    %205 = tpu.matmul %202, %204, %cst_153 {dimension_numbers = #tpu.dot_dimension_numbers<[1], [0], [0], [1], [0, 0, 1, 1], [], []>} : vector<180x32xbf16>, vector<32x64xbf16>, vector<180x64xf32> -> vector<180x64xf32>
    %206 = arith.addf %200, %205 : vector<180x64xf32>
    %c22 = arith.constant 22 : index
    %c0_154 = arith.constant 0 : index
    %207 = vector.load %arg20[%c22, %c0_154] : memref<208x32xf32, #tpu.memory_space<vmem>>, vector<180x32xf32>
    %208 = arith.truncf %207 : vector<180x32xf32> to vector<180x32xbf16>
    %c8 = arith.constant 8 : index
    %c0_155 = arith.constant 0 : index
    %c0_156 = arith.constant 0 : index
    %209 = vector.load %arg5[%c8, %c0_155, %c0_156] : memref<9x32x64xbf16, #tpu.memory_space<vmem>>, vector<1x32x64xbf16>
    %210 = vector.shape_cast %209 : vector<1x32x64xbf16> to vector<32x64xbf16>
    %cst_157 = arith.constant dense<0.000000e+00> : vector<180x64xf32>
    %211 = tpu.matmul %208, %210, %cst_157 {dimension_numbers = #tpu.dot_dimension_numbers<[1], [0], [0], [1], [0, 0, 1, 1], [], []>} : vector<180x32xbf16>, vector<32x64xbf16>, vector<180x64xf32> -> vector<180x64xf32>
    %212 = arith.addf %206, %211 : vector<180x64xf32>
    %c0_158 = arith.constant 0 : index
    %c0_159 = arith.constant 0 : index
    %213 = vector.load %arg6[%c0_158, %c0_159] : memref<1x64xf32, #tpu.memory_space<vmem>>, vector<1x64xf32>
    %214 = vector.broadcast %213 : vector<1x64xf32> to vector<180x64xf32>
    %215 = arith.mulf %212, %214 : vector<180x64xf32>
    %c0_160 = arith.constant 0 : index
    %c0_161 = arith.constant 0 : index
    %216 = vector.load %arg7[%c0_160, %c0_161] : memref<1x64xf32, #tpu.memory_space<vmem>>, vector<1x64xf32>
    %217 = vector.broadcast %216 : vector<1x64xf32> to vector<180x64xf32>
    %218 = arith.addf %215, %217 : vector<180x64xf32>
    %cst_162 = arith.constant 0.000000e+00 : f32
    %219 = vector.broadcast %cst_162 : f32 to vector<180x64xf32>
    %220 = arith.maximumf %218, %219 : vector<180x64xf32>
    %c0_163 = arith.constant 0 : index
    %c0_164 = arith.constant 0 : index
    %221 = vector.load %arg21[%c0_163, %c0_164] : memref<200x64xf32, #tpu.memory_space<vmem>>, vector<180x64xf32>
    tpu.vector_store %arg21[%c0_163, %c0_164], %220 {strides = array<i32>} : memref<200x64xf32, #tpu.memory_space<vmem>>, vector<180x64xf32>,
    %c0_165 = arith.constant 0 : index
    %c0_166 = arith.constant 0 : index
    %222 = tpu.strided_load %arg21[%c0_165, %c0_166] {strides = array<i32: 2, 1>} : memref<200x64xf32, #tpu.memory_space<vmem>>, vector<4x64xf32>
    %c1_167 = arith.constant 1 : index
    %c0_168 = arith.constant 0 : index
    %223 = tpu.strided_load %arg21[%c1_167, %c0_168] {strides = array<i32: 2, 1>} : memref<200x64xf32, #tpu.memory_space<vmem>>, vector<4x64xf32>
    %224 = arith.maximumf %222, %223 : vector<4x64xf32>
    %c10_169 = arith.constant 10 : index
    %c0_170 = arith.constant 0 : index
    %225 = tpu.strided_load %arg21[%c10_169, %c0_170] {strides = array<i32: 2, 1>} : memref<200x64xf32, #tpu.memory_space<vmem>>, vector<4x64xf32>
    %c11_171 = arith.constant 11 : index
    %c0_172 = arith.constant 0 : index
    %226 = tpu.strided_load %arg21[%c11_171, %c0_172] {strides = array<i32: 2, 1>} : memref<200x64xf32, #tpu.memory_space<vmem>>, vector<4x64xf32>
    %227 = arith.maximumf %225, %226 : vector<4x64xf32>
    %228 = arith.maximumf %224, %227 : vector<4x64xf32>
    %c7_173 = arith.constant 7 : index
    %c0_174 = arith.constant 0 : index
    %229 = vector.load %arg22[%c7_173, %c0_174] : memref<80x64xf32, #tpu.memory_space<vmem>>, vector<4x64xf32>
    tpu.vector_store %arg22[%c7_173, %c0_174], %228 {strides = array<i32>} : memref<80x64xf32, #tpu.memory_space<vmem>>, vector<4x64xf32>,
    %c20_175 = arith.constant 20 : index
    %c0_176 = arith.constant 0 : index
    %230 = tpu.strided_load %arg21[%c20_175, %c0_176] {strides = array<i32: 2, 1>} : memref<200x64xf32, #tpu.memory_space<vmem>>, vector<4x64xf32>
    %c21_177 = arith.constant 21 : index
    %c0_178 = arith.constant 0 : index
    %231 = tpu.strided_load %arg21[%c21_177, %c0_178] {strides = array<i32: 2, 1>} : memref<200x64xf32, #tpu.memory_space<vmem>>, vector<4x64xf32>
    %232 = arith.maximumf %230, %231 : vector<4x64xf32>
    %c30 = arith.constant 30 : index
    %c0_179 = arith.constant 0 : index
    %233 = tpu.strided_load %arg21[%c30, %c0_179] {strides = array<i32: 2, 1>} : memref<200x64xf32, #tpu.memory_space<vmem>>, vector<4x64xf32>
    %c31_180 = arith.constant 31 : index
    %c0_181 = arith.constant 0 : index
    %234 = tpu.strided_load %arg21[%c31_180, %c0_181] {strides = array<i32: 2, 1>} : memref<200x64xf32, #tpu.memory_space<vmem>>, vector<4x64xf32>
    %235 = arith.maximumf %233, %234 : vector<4x64xf32>
    %236 = arith.maximumf %232, %235 : vector<4x64xf32>
    %c13 = arith.constant 13 : index
    %c0_182 = arith.constant 0 : index
    %237 = vector.load %arg22[%c13, %c0_182] : memref<80x64xf32, #tpu.memory_space<vmem>>, vector<4x64xf32>
    tpu.vector_store %arg22[%c13, %c0_182], %236 {strides = array<i32>} : memref<80x64xf32, #tpu.memory_space<vmem>>, vector<4x64xf32>,
    %c40 = arith.constant 40 : index
    %c0_183 = arith.constant 0 : index
    %238 = tpu.strided_load %arg21[%c40, %c0_183] {strides = array<i32: 2, 1>} : memref<200x64xf32, #tpu.memory_space<vmem>>, vector<4x64xf32>
    %c41_184 = arith.constant 41 : index
    %c0_185 = arith.constant 0 : index
    %239 = tpu.strided_load %arg21[%c41_184, %c0_185] {strides = array<i32: 2, 1>} : memref<200x64xf32, #tpu.memory_space<vmem>>, vector<4x64xf32>
    %240 = arith.maximumf %238, %239 : vector<4x64xf32>
    %c50 = arith.constant 50 : index
    %c0_186 = arith.constant 0 : index
    %241 = tpu.strided_load %arg21[%c50, %c0_186] {strides = array<i32: 2, 1>} : memref<200x64xf32, #tpu.memory_space<vmem>>, vector<4x64xf32>
    %c51_187 = arith.constant 51 : index
    %c0_188 = arith.constant 0 : index
    %242 = tpu.strided_load %arg21[%c51_187, %c0_188] {strides = array<i32: 2, 1>} : memref<200x64xf32, #tpu.memory_space<vmem>>, vector<4x64xf32>
    %243 = arith.maximumf %241, %242 : vector<4x64xf32>
    %244 = arith.maximumf %240, %243 : vector<4x64xf32>
    %c19 = arith.constant 19 : index
    %c0_189 = arith.constant 0 : index
    %245 = vector.load %arg22[%c19, %c0_189] : memref<80x64xf32, #tpu.memory_space<vmem>>, vector<4x64xf32>
    tpu.vector_store %arg22[%c19, %c0_189], %244 {strides = array<i32>} : memref<80x64xf32, #tpu.memory_space<vmem>>, vector<4x64xf32>,
    %c60 = arith.constant 60 : index
    %c0_190 = arith.constant 0 : index
    %246 = tpu.strided_load %arg21[%c60, %c0_190] {strides = array<i32: 2, 1>} : memref<200x64xf32, #tpu.memory_space<vmem>>, vector<4x64xf32>
    %c61_191 = arith.constant 61 : index
    %c0_192 = arith.constant 0 : index
    %247 = tpu.strided_load %arg21[%c61_191, %c0_192] {strides = array<i32: 2, 1>} : memref<200x64xf32, #tpu.memory_space<vmem>>, vector<4x64xf32>
    %248 = arith.maximumf %246, %247 : vector<4x64xf32>
    %c70 = arith.constant 70 : index
    %c0_193 = arith.constant 0 : index
    %249 = tpu.strided_load %arg21[%c70, %c0_193] {strides = array<i32: 2, 1>} : memref<200x64xf32, #tpu.memory_space<vmem>>, vector<4x64xf32>
    %c71_194 = arith.constant 71 : index
    %c0_195 = arith.constant 0 : index
    %250 = tpu.strided_load %arg21[%c71_194, %c0_195] {strides = array<i32: 2, 1>} : memref<200x64xf32, #tpu.memory_space<vmem>>, vector<4x64xf32>
    %251 = arith.maximumf %249, %250 : vector<4x64xf32>
    %252 = arith.maximumf %248, %251 : vector<4x64xf32>
    %c25 = arith.constant 25 : index
    %c0_196 = arith.constant 0 : index
    %253 = vector.load %arg22[%c25, %c0_196] : memref<80x64xf32, #tpu.memory_space<vmem>>, vector<4x64xf32>
    tpu.vector_store %arg22[%c25, %c0_196], %252 {strides = array<i32>} : memref<80x64xf32, #tpu.memory_space<vmem>>, vector<4x64xf32>,
    %c100 = arith.constant 100 : index
    %c0_197 = arith.constant 0 : index
    %254 = tpu.strided_load %arg21[%c100, %c0_197] {strides = array<i32: 2, 1>} : memref<200x64xf32, #tpu.memory_space<vmem>>, vector<4x64xf32>
    %c101 = arith.constant 101 : index
    %c0_198 = arith.constant 0 : index
    %255 = tpu.strided_load %arg21[%c101, %c0_198] {strides = array<i32: 2, 1>} : memref<200x64xf32, #tpu.memory_space<vmem>>, vector<4x64xf32>
    %256 = arith.maximumf %254, %255 : vector<4x64xf32>
    %c110 = arith.constant 110 : index
    %c0_199 = arith.constant 0 : index
    %257 = tpu.strided_load %arg21[%c110, %c0_199] {strides = array<i32: 2, 1>} : memref<200x64xf32, #tpu.memory_space<vmem>>, vector<4x64xf32>
    %c111_200 = arith.constant 111 : index
    %c0_201 = arith.constant 0 : index
    %258 = tpu.strided_load %arg21[%c111_200, %c0_201] {strides = array<i32: 2, 1>} : memref<200x64xf32, #tpu.memory_space<vmem>>, vector<4x64xf32>
    %259 = arith.maximumf %257, %258 : vector<4x64xf32>
    %260 = arith.maximumf %256, %259 : vector<4x64xf32>
    %c43 = arith.constant 43 : index
    %c0_202 = arith.constant 0 : index
    %261 = vector.load %arg22[%c43, %c0_202] : memref<80x64xf32, #tpu.memory_space<vmem>>, vector<4x64xf32>
    tpu.vector_store %arg22[%c43, %c0_202], %260 {strides = array<i32>} : memref<80x64xf32, #tpu.memory_space<vmem>>, vector<4x64xf32>,
    %c120 = arith.constant 120 : index
    %c0_203 = arith.constant 0 : index
    %262 = tpu.strided_load %arg21[%c120, %c0_203] {strides = array<i32: 2, 1>} : memref<200x64xf32, #tpu.memory_space<vmem>>, vector<4x64xf32>
    %c121_204 = arith.constant 121 : index
    %c0_205 = arith.constant 0 : index
    %263 = tpu.strided_load %arg21[%c121_204, %c0_205] {strides = array<i32: 2, 1>} : memref<200x64xf32, #tpu.memory_space<vmem>>, vector<4x64xf32>
    %264 = arith.maximumf %262, %263 : vector<4x64xf32>
    %c130 = arith.constant 130 : index
    %c0_206 = arith.constant 0 : index
    %265 = tpu.strided_load %arg21[%c130, %c0_206] {strides = array<i32: 2, 1>} : memref<200x64xf32, #tpu.memory_space<vmem>>, vector<4x64xf32>
    %c131_207 = arith.constant 131 : index
    %c0_208 = arith.constant 0 : index
    %266 = tpu.strided_load %arg21[%c131_207, %c0_208] {strides = array<i32: 2, 1>} : memref<200x64xf32, #tpu.memory_space<vmem>>, vector<4x64xf32>
    %267 = arith.maximumf %265, %266 : vector<4x64xf32>
    %268 = arith.maximumf %264, %267 : vector<4x64xf32>
    %c49_209 = arith.constant 49 : index
    %c0_210 = arith.constant 0 : index
    %269 = vector.load %arg22[%c49_209, %c0_210] : memref<80x64xf32, #tpu.memory_space<vmem>>, vector<4x64xf32>
    tpu.vector_store %arg22[%c49_209, %c0_210], %268 {strides = array<i32>} : memref<80x64xf32, #tpu.memory_space<vmem>>, vector<4x64xf32>,
    %c140 = arith.constant 140 : index
    %c0_211 = arith.constant 0 : index
    %270 = tpu.strided_load %arg21[%c140, %c0_211] {strides = array<i32: 2, 1>} : memref<200x64xf32, #tpu.memory_space<vmem>>, vector<4x64xf32>
    %c141_212 = arith.constant 141 : index
    %c0_213 = arith.constant 0 : index
    %271 = tpu.strided_load %arg21[%c141_212, %c0_213] {strides = array<i32: 2, 1>} : memref<200x64xf32, #tpu.memory_space<vmem>>, vector<4x64xf32>
    %272 = arith.maximumf %270, %271 : vector<4x64xf32>
    %c150 = arith.constant 150 : index
    %c0_214 = arith.constant 0 : index
    %273 = tpu.strided_load %arg21[%c150, %c0_214] {strides = array<i32: 2, 1>} : memref<200x64xf32, #tpu.memory_space<vmem>>, vector<4x64xf32>
    %c151_215 = arith.constant 151 : index
    %c0_216 = arith.constant 0 : index
    %274 = tpu.strided_load %arg21[%c151_215, %c0_216] {strides = array<i32: 2, 1>} : memref<200x64xf32, #tpu.memory_space<vmem>>, vector<4x64xf32>
    %275 = arith.maximumf %273, %274 : vector<4x64xf32>
    %276 = arith.maximumf %272, %275 : vector<4x64xf32>
    %c55 = arith.constant 55 : index
    %c0_217 = arith.constant 0 : index
    %277 = vector.load %arg22[%c55, %c0_217] : memref<80x64xf32, #tpu.memory_space<vmem>>, vector<4x64xf32>
    tpu.vector_store %arg22[%c55, %c0_217], %276 {strides = array<i32>} : memref<80x64xf32, #tpu.memory_space<vmem>>, vector<4x64xf32>,
    %c160_218 = arith.constant 160 : index
    %c0_219 = arith.constant 0 : index
    %278 = tpu.strided_load %arg21[%c160_218, %c0_219] {strides = array<i32: 2, 1>} : memref<200x64xf32, #tpu.memory_space<vmem>>, vector<4x64xf32>
    %c161_220 = arith.constant 161 : index
    %c0_221 = arith.constant 0 : index
    %279 = tpu.strided_load %arg21[%c161_220, %c0_221] {strides = array<i32: 2, 1>} : memref<200x64xf32, #tpu.memory_space<vmem>>, vector<4x64xf32>
    %280 = arith.maximumf %278, %279 : vector<4x64xf32>
    %c170 = arith.constant 170 : index
    %c0_222 = arith.constant 0 : index
    %281 = tpu.strided_load %arg21[%c170, %c0_222] {strides = array<i32: 2, 1>} : memref<200x64xf32, #tpu.memory_space<vmem>>, vector<4x64xf32>
    %c171_223 = arith.constant 171 : index
    %c0_224 = arith.constant 0 : index
    %282 = tpu.strided_load %arg21[%c171_223, %c0_224] {strides = array<i32: 2, 1>} : memref<200x64xf32, #tpu.memory_space<vmem>>, vector<4x64xf32>
    %283 = arith.maximumf %281, %282 : vector<4x64xf32>
    %284 = arith.maximumf %280, %283 : vector<4x64xf32>
    %c61_225 = arith.constant 61 : index
    %c0_226 = arith.constant 0 : index
    %285 = vector.load %arg22[%c61_225, %c0_226] : memref<80x64xf32, #tpu.memory_space<vmem>>, vector<4x64xf32>
    tpu.vector_store %arg22[%c61_225, %c0_226], %284 {strides = array<i32>} : memref<80x64xf32, #tpu.memory_space<vmem>>, vector<4x64xf32>,
    %cst_227 = arith.constant 0.000000e+00 : f32
    %286 = vector.broadcast %cst_227 : f32 to vector<60x128xf32>
    %c0_228 = arith.constant 0 : index
    %c0_229 = arith.constant 0 : index
    %287 = vector.load %arg22[%c0_228, %c0_229] : memref<80x64xf32, #tpu.memory_space<vmem>>, vector<60x64xf32>
    %288 = arith.truncf %287 : vector<60x64xf32> to vector<60x64xbf16>
    %c0_230 = arith.constant 0 : index
    %c0_231 = arith.constant 0 : index
    %c0_232 = arith.constant 0 : index
    %289 = vector.load %arg8[%c0_230, %c0_231, %c0_232] : memref<9x64x128xbf16, #tpu.memory_space<vmem>>, vector<1x64x128xbf16>
    %290 = vector.shape_cast %289 : vector<1x64x128xbf16> to vector<64x128xbf16>
    %cst_233 = arith.constant dense<0.000000e+00> : vector<60x128xf32>
    %291 = tpu.matmul %288, %290, %cst_233 {dimension_numbers = #tpu.dot_dimension_numbers<[1], [0], [0], [1], [0, 0, 1, 1], [], []>} : vector<60x64xbf16>, vector<64x128xbf16>, vector<60x128xf32> -> vector<60x128xf32>
    %292 = arith.addf %286, %291 : vector<60x128xf32>
    %c1_234 = arith.constant 1 : index
    %c0_235 = arith.constant 0 : index
    %293 = vector.load %arg22[%c1_234, %c0_235] : memref<80x64xf32, #tpu.memory_space<vmem>>, vector<60x64xf32>
    %294 = arith.truncf %293 : vector<60x64xf32> to vector<60x64xbf16>
    %c1_236 = arith.constant 1 : index
    %c0_237 = arith.constant 0 : index
    %c0_238 = arith.constant 0 : index
    %295 = vector.load %arg8[%c1_236, %c0_237, %c0_238] : memref<9x64x128xbf16, #tpu.memory_space<vmem>>, vector<1x64x128xbf16>
    %296 = vector.shape_cast %295 : vector<1x64x128xbf16> to vector<64x128xbf16>
    %cst_239 = arith.constant dense<0.000000e+00> : vector<60x128xf32>
    %297 = tpu.matmul %294, %296, %cst_239 {dimension_numbers = #tpu.dot_dimension_numbers<[1], [0], [0], [1], [0, 0, 1, 1], [], []>} : vector<60x64xbf16>, vector<64x128xbf16>, vector<60x128xf32> -> vector<60x128xf32>
    %298 = arith.addf %292, %297 : vector<60x128xf32>
    %c2_240 = arith.constant 2 : index
    %c0_241 = arith.constant 0 : index
    %299 = vector.load %arg22[%c2_240, %c0_241] : memref<80x64xf32, #tpu.memory_space<vmem>>, vector<60x64xf32>
    %300 = arith.truncf %299 : vector<60x64xf32> to vector<60x64xbf16>
    %c2_242 = arith.constant 2 : index
    %c0_243 = arith.constant 0 : index
    %c0_244 = arith.constant 0 : index
    %301 = vector.load %arg8[%c2_242, %c0_243, %c0_244] : memref<9x64x128xbf16, #tpu.memory_space<vmem>>, vector<1x64x128xbf16>
    %302 = vector.shape_cast %301 : vector<1x64x128xbf16> to vector<64x128xbf16>
    %cst_245 = arith.constant dense<0.000000e+00> : vector<60x128xf32>
    %303 = tpu.matmul %300, %302, %cst_245 {dimension_numbers = #tpu.dot_dimension_numbers<[1], [0], [0], [1], [0, 0, 1, 1], [], []>} : vector<60x64xbf16>, vector<64x128xbf16>, vector<60x128xf32> -> vector<60x128xf32>
    %304 = arith.addf %298, %303 : vector<60x128xf32>
    %c6_246 = arith.constant 6 : index
    %c0_247 = arith.constant 0 : index
    %305 = vector.load %arg22[%c6_246, %c0_247] : memref<80x64xf32, #tpu.memory_space<vmem>>, vector<60x64xf32>
    %306 = arith.truncf %305 : vector<60x64xf32> to vector<60x64xbf16>
    %c3_248 = arith.constant 3 : index
    %c0_249 = arith.constant 0 : index
    %c0_250 = arith.constant 0 : index
    %307 = vector.load %arg8[%c3_248, %c0_249, %c0_250] : memref<9x64x128xbf16, #tpu.memory_space<vmem>>, vector<1x64x128xbf16>
    %308 = vector.shape_cast %307 : vector<1x64x128xbf16> to vector<64x128xbf16>
    %cst_251 = arith.constant dense<0.000000e+00> : vector<60x128xf32>
    %309 = tpu.matmul %306, %308, %cst_251 {dimension_numbers = #tpu.dot_dimension_numbers<[1], [0], [0], [1], [0, 0, 1, 1], [], []>} : vector<60x64xbf16>, vector<64x128xbf16>, vector<60x128xf32> -> vector<60x128xf32>
    %310 = arith.addf %304, %309 : vector<60x128xf32>
    %c7_252 = arith.constant 7 : index
    %c0_253 = arith.constant 0 : index
    %311 = vector.load %arg22[%c7_252, %c0_253] : memref<80x64xf32, #tpu.memory_space<vmem>>, vector<60x64xf32>
    %312 = arith.truncf %311 : vector<60x64xf32> to vector<60x64xbf16>
    %c4_254 = arith.constant 4 : index
    %c0_255 = arith.constant 0 : index
    %c0_256 = arith.constant 0 : index
    %313 = vector.load %arg8[%c4_254, %c0_255, %c0_256] : memref<9x64x128xbf16, #tpu.memory_space<vmem>>, vector<1x64x128xbf16>
    %314 = vector.shape_cast %313 : vector<1x64x128xbf16> to vector<64x128xbf16>
    %cst_257 = arith.constant dense<0.000000e+00> : vector<60x128xf32>
    %315 = tpu.matmul %312, %314, %cst_257 {dimension_numbers = #tpu.dot_dimension_numbers<[1], [0], [0], [1], [0, 0, 1, 1], [], []>} : vector<60x64xbf16>, vector<64x128xbf16>, vector<60x128xf32> -> vector<60x128xf32>
    %316 = arith.addf %310, %315 : vector<60x128xf32>
    %c8_258 = arith.constant 8 : index
    %c0_259 = arith.constant 0 : index
    %317 = vector.load %arg22[%c8_258, %c0_259] : memref<80x64xf32, #tpu.memory_space<vmem>>, vector<60x64xf32>
    %318 = arith.truncf %317 : vector<60x64xf32> to vector<60x64xbf16>
    %c5_260 = arith.constant 5 : index
    %c0_261 = arith.constant 0 : index
    %c0_262 = arith.constant 0 : index
    %319 = vector.load %arg8[%c5_260, %c0_261, %c0_262] : memref<9x64x128xbf16, #tpu.memory_space<vmem>>, vector<1x64x128xbf16>
    %320 = vector.shape_cast %319 : vector<1x64x128xbf16> to vector<64x128xbf16>
    %cst_263 = arith.constant dense<0.000000e+00> : vector<60x128xf32>
    %321 = tpu.matmul %318, %320, %cst_263 {dimension_numbers = #tpu.dot_dimension_numbers<[1], [0], [0], [1], [0, 0, 1, 1], [], []>} : vector<60x64xbf16>, vector<64x128xbf16>, vector<60x128xf32> -> vector<60x128xf32>
    %322 = arith.addf %316, %321 : vector<60x128xf32>
    %c12_264 = arith.constant 12 : index
    %c0_265 = arith.constant 0 : index
    %323 = vector.load %arg22[%c12_264, %c0_265] : memref<80x64xf32, #tpu.memory_space<vmem>>, vector<60x64xf32>
    %324 = arith.truncf %323 : vector<60x64xf32> to vector<60x64xbf16>
    %c6_266 = arith.constant 6 : index
    %c0_267 = arith.constant 0 : index
    %c0_268 = arith.constant 0 : index
    %325 = vector.load %arg8[%c6_266, %c0_267, %c0_268] : memref<9x64x128xbf16, #tpu.memory_space<vmem>>, vector<1x64x128xbf16>
    %326 = vector.shape_cast %325 : vector<1x64x128xbf16> to vector<64x128xbf16>
    %cst_269 = arith.constant dense<0.000000e+00> : vector<60x128xf32>
    %327 = tpu.matmul %324, %326, %cst_269 {dimension_numbers = #tpu.dot_dimension_numbers<[1], [0], [0], [1], [0, 0, 1, 1], [], []>} : vector<60x64xbf16>, vector<64x128xbf16>, vector<60x128xf32> -> vector<60x128xf32>
    %328 = arith.addf %322, %327 : vector<60x128xf32>
    %c13_270 = arith.constant 13 : index
    %c0_271 = arith.constant 0 : index
    %329 = vector.load %arg22[%c13_270, %c0_271] : memref<80x64xf32, #tpu.memory_space<vmem>>, vector<60x64xf32>
    %330 = arith.truncf %329 : vector<60x64xf32> to vector<60x64xbf16>
    %c7_272 = arith.constant 7 : index
    %c0_273 = arith.constant 0 : index
    %c0_274 = arith.constant 0 : index
    %331 = vector.load %arg8[%c7_272, %c0_273, %c0_274] : memref<9x64x128xbf16, #tpu.memory_space<vmem>>, vector<1x64x128xbf16>
    %332 = vector.shape_cast %331 : vector<1x64x128xbf16> to vector<64x128xbf16>
    %cst_275 = arith.constant dense<0.000000e+00> : vector<60x128xf32>
    %333 = tpu.matmul %330, %332, %cst_275 {dimension_numbers = #tpu.dot_dimension_numbers<[1], [0], [0], [1], [0, 0, 1, 1], [], []>} : vector<60x64xbf16>, vector<64x128xbf16>, vector<60x128xf32> -> vector<60x128xf32>
    %334 = arith.addf %328, %333 : vector<60x128xf32>
    %c14 = arith.constant 14 : index
    %c0_276 = arith.constant 0 : index
    %335 = vector.load %arg22[%c14, %c0_276] : memref<80x64xf32, #tpu.memory_space<vmem>>, vector<60x64xf32>
    %336 = arith.truncf %335 : vector<60x64xf32> to vector<60x64xbf16>
    %c8_277 = arith.constant 8 : index
    %c0_278 = arith.constant 0 : index
    %c0_279 = arith.constant 0 : index
    %337 = vector.load %arg8[%c8_277, %c0_278, %c0_279] : memref<9x64x128xbf16, #tpu.memory_space<vmem>>, vector<1x64x128xbf16>
    %338 = vector.shape_cast %337 : vector<1x64x128xbf16> to vector<64x128xbf16>
    %cst_280 = arith.constant dense<0.000000e+00> : vector<60x128xf32>
    %339 = tpu.matmul %336, %338, %cst_280 {dimension_numbers = #tpu.dot_dimension_numbers<[1], [0], [0], [1], [0, 0, 1, 1], [], []>} : vector<60x64xbf16>, vector<64x128xbf16>, vector<60x128xf32> -> vector<60x128xf32>
    %340 = arith.addf %334, %339 : vector<60x128xf32>
    %c0_281 = arith.constant 0 : index
    %c0_282 = arith.constant 0 : index
    %341 = vector.load %arg9[%c0_281, %c0_282] : memref<1x128xf32, #tpu.memory_space<vmem>>, vector<1x128xf32>
    %342 = vector.broadcast %341 : vector<1x128xf32> to vector<60x128xf32>
    %343 = arith.mulf %340, %342 : vector<60x128xf32>
    %c0_283 = arith.constant 0 : index
    %c0_284 = arith.constant 0 : index
    %344 = vector.load %arg10[%c0_283, %c0_284] : memref<1x128xf32, #tpu.memory_space<vmem>>, vector<1x128xf32>
    %345 = vector.broadcast %344 : vector<1x128xf32> to vector<60x128xf32>
    %346 = arith.addf %343, %345 : vector<60x128xf32>
    %cst_285 = arith.constant 0.000000e+00 : f32
    %347 = vector.broadcast %cst_285 : f32 to vector<60x128xf32>
    %348 = arith.maximumf %346, %347 : vector<60x128xf32>
    %c0_286 = arith.constant 0 : index
    %c0_287 = arith.constant 0 : index
    %349 = vector.load %arg23[%c0_286, %c0_287] : memref<72x128xf32, #tpu.memory_space<vmem>>, vector<60x128xf32>
    tpu.vector_store %arg23[%c0_286, %c0_287], %348 {strides = array<i32>} : memref<72x128xf32, #tpu.memory_space<vmem>>, vector<60x128xf32>,
    %c0_288 = arith.constant 0 : index
    %c0_289 = arith.constant 0 : index
    %350 = tpu.strided_load %arg23[%c0_288, %c0_289] {strides = array<i32: 2, 1>} : memref<72x128xf32, #tpu.memory_space<vmem>>, vector<2x128xf32>
    %c1_290 = arith.constant 1 : index
    %c0_291 = arith.constant 0 : index
    %351 = tpu.strided_load %arg23[%c1_290, %c0_291] {strides = array<i32: 2, 1>} : memref<72x128xf32, #tpu.memory_space<vmem>>, vector<2x128xf32>
    %352 = arith.maximumf %350, %351 : vector<2x128xf32>
    %c6_292 = arith.constant 6 : index
    %c0_293 = arith.constant 0 : index
    %353 = tpu.strided_load %arg23[%c6_292, %c0_293] {strides = array<i32: 2, 1>} : memref<72x128xf32, #tpu.memory_space<vmem>>, vector<2x128xf32>
    %c7_294 = arith.constant 7 : index
    %c0_295 = arith.constant 0 : index
    %354 = tpu.strided_load %arg23[%c7_294, %c0_295] {strides = array<i32: 2, 1>} : memref<72x128xf32, #tpu.memory_space<vmem>>, vector<2x128xf32>
    %355 = arith.maximumf %353, %354 : vector<2x128xf32>
    %356 = arith.maximumf %352, %355 : vector<2x128xf32>
    %c5_296 = arith.constant 5 : index
    %c0_297 = arith.constant 0 : index
    %357 = vector.load %arg24[%c5_296, %c0_297] : memref<40x128xf32, #tpu.memory_space<vmem>>, vector<2x128xf32>
    tpu.vector_store %arg24[%c5_296, %c0_297], %356 {strides = array<i32>} : memref<40x128xf32, #tpu.memory_space<vmem>>, vector<2x128xf32>,
    %c12_298 = arith.constant 12 : index
    %c0_299 = arith.constant 0 : index
    %358 = tpu.strided_load %arg23[%c12_298, %c0_299] {strides = array<i32: 2, 1>} : memref<72x128xf32, #tpu.memory_space<vmem>>, vector<2x128xf32>
    %c13_300 = arith.constant 13 : index
    %c0_301 = arith.constant 0 : index
    %359 = tpu.strided_load %arg23[%c13_300, %c0_301] {strides = array<i32: 2, 1>} : memref<72x128xf32, #tpu.memory_space<vmem>>, vector<2x128xf32>
    %360 = arith.maximumf %358, %359 : vector<2x128xf32>
    %c18 = arith.constant 18 : index
    %c0_302 = arith.constant 0 : index
    %361 = tpu.strided_load %arg23[%c18, %c0_302] {strides = array<i32: 2, 1>} : memref<72x128xf32, #tpu.memory_space<vmem>>, vector<2x128xf32>
    %c19_303 = arith.constant 19 : index
    %c0_304 = arith.constant 0 : index
    %362 = tpu.strided_load %arg23[%c19_303, %c0_304] {strides = array<i32: 2, 1>} : memref<72x128xf32, #tpu.memory_space<vmem>>, vector<2x128xf32>
    %363 = arith.maximumf %361, %362 : vector<2x128xf32>
    %364 = arith.maximumf %360, %363 : vector<2x128xf32>
    %c9 = arith.constant 9 : index
    %c0_305 = arith.constant 0 : index
    %365 = vector.load %arg24[%c9, %c0_305] : memref<40x128xf32, #tpu.memory_space<vmem>>, vector<2x128xf32>
    tpu.vector_store %arg24[%c9, %c0_305], %364 {strides = array<i32>} : memref<40x128xf32, #tpu.memory_space<vmem>>, vector<2x128xf32>,
    %c36 = arith.constant 36 : index
    %c0_306 = arith.constant 0 : index
    %366 = tpu.strided_load %arg23[%c36, %c0_306] {strides = array<i32: 2, 1>} : memref<72x128xf32, #tpu.memory_space<vmem>>, vector<2x128xf32>
    %c37 = arith.constant 37 : index
    %c0_307 = arith.constant 0 : index
    %367 = tpu.strided_load %arg23[%c37, %c0_307] {strides = array<i32: 2, 1>} : memref<72x128xf32, #tpu.memory_space<vmem>>, vector<2x128xf32>
    %368 = arith.maximumf %366, %367 : vector<2x128xf32>
    %c42 = arith.constant 42 : index
    %c0_308 = arith.constant 0 : index
    %369 = tpu.strided_load %arg23[%c42, %c0_308] {strides = array<i32: 2, 1>} : memref<72x128xf32, #tpu.memory_space<vmem>>, vector<2x128xf32>
    %c43_309 = arith.constant 43 : index
    %c0_310 = arith.constant 0 : index
    %370 = tpu.strided_load %arg23[%c43_309, %c0_310] {strides = array<i32: 2, 1>} : memref<72x128xf32, #tpu.memory_space<vmem>>, vector<2x128xf32>
    %371 = arith.maximumf %369, %370 : vector<2x128xf32>
    %372 = arith.maximumf %368, %371 : vector<2x128xf32>
    %c21_311 = arith.constant 21 : index
    %c0_312 = arith.constant 0 : index
    %373 = vector.load %arg24[%c21_311, %c0_312] : memref<40x128xf32, #tpu.memory_space<vmem>>, vector<2x128xf32>
    tpu.vector_store %arg24[%c21_311, %c0_312], %372 {strides = array<i32>} : memref<40x128xf32, #tpu.memory_space<vmem>>, vector<2x128xf32>,
    %c48_313 = arith.constant 48 : index
    %c0_314 = arith.constant 0 : index
    %374 = tpu.strided_load %arg23[%c48_313, %c0_314] {strides = array<i32: 2, 1>} : memref<72x128xf32, #tpu.memory_space<vmem>>, vector<2x128xf32>
    %c49_315 = arith.constant 49 : index
    %c0_316 = arith.constant 0 : index
    %375 = tpu.strided_load %arg23[%c49_315, %c0_316] {strides = array<i32: 2, 1>} : memref<72x128xf32, #tpu.memory_space<vmem>>, vector<2x128xf32>
    %376 = arith.maximumf %374, %375 : vector<2x128xf32>
    %c54 = arith.constant 54 : index
    %c0_317 = arith.constant 0 : index
    %377 = tpu.strided_load %arg23[%c54, %c0_317] {strides = array<i32: 2, 1>} : memref<72x128xf32, #tpu.memory_space<vmem>>, vector<2x128xf32>
    %c55_318 = arith.constant 55 : index
    %c0_319 = arith.constant 0 : index
    %378 = tpu.strided_load %arg23[%c55_318, %c0_319] {strides = array<i32: 2, 1>} : memref<72x128xf32, #tpu.memory_space<vmem>>, vector<2x128xf32>
    %379 = arith.maximumf %377, %378 : vector<2x128xf32>
    %380 = arith.maximumf %376, %379 : vector<2x128xf32>
    %c25_320 = arith.constant 25 : index
    %c0_321 = arith.constant 0 : index
    %381 = vector.load %arg24[%c25_320, %c0_321] : memref<40x128xf32, #tpu.memory_space<vmem>>, vector<2x128xf32>
    tpu.vector_store %arg24[%c25_320, %c0_321], %380 {strides = array<i32>} : memref<40x128xf32, #tpu.memory_space<vmem>>, vector<2x128xf32>,
    %c0_322 = arith.constant 0 : index
    %c0_323 = arith.constant 0 : index
    %382 = vector.load %arg24[%c0_322, %c0_323] : memref<40x128xf32, #tpu.memory_space<vmem>>, vector<24x128xf32>
    %c1_324 = arith.constant 1 : index
    %c0_325 = arith.constant 0 : index
    %383 = vector.load %arg24[%c1_324, %c0_325] : memref<40x128xf32, #tpu.memory_space<vmem>>, vector<24x128xf32>
    %c2_326 = arith.constant 2 : index
    %c0_327 = arith.constant 0 : index
    %384 = vector.load %arg24[%c2_326, %c0_327] : memref<40x128xf32, #tpu.memory_space<vmem>>, vector<24x128xf32>
    %c4_328 = arith.constant 4 : index
    %c0_329 = arith.constant 0 : index
    %385 = vector.load %arg24[%c4_328, %c0_329] : memref<40x128xf32, #tpu.memory_space<vmem>>, vector<24x128xf32>
    %c5_330 = arith.constant 5 : index
    %c0_331 = arith.constant 0 : index
    %386 = vector.load %arg24[%c5_330, %c0_331] : memref<40x128xf32, #tpu.memory_space<vmem>>, vector<24x128xf32>
    %c6_332 = arith.constant 6 : index
    %c0_333 = arith.constant 0 : index
    %387 = vector.load %arg24[%c6_332, %c0_333] : memref<40x128xf32, #tpu.memory_space<vmem>>, vector<24x128xf32>
    %c8_334 = arith.constant 8 : index
    %c0_335 = arith.constant 0 : index
    %388 = vector.load %arg24[%c8_334, %c0_335] : memref<40x128xf32, #tpu.memory_space<vmem>>, vector<24x128xf32>
    %c9_336 = arith.constant 9 : index
    %c0_337 = arith.constant 0 : index
    %389 = vector.load %arg24[%c9_336, %c0_337] : memref<40x128xf32, #tpu.memory_space<vmem>>, vector<24x128xf32>
    %c10_338 = arith.constant 10 : index
    %c0_339 = arith.constant 0 : index
    %390 = vector.load %arg24[%c10_338, %c0_339] : memref<40x128xf32, #tpu.memory_space<vmem>>, vector<24x128xf32>
    %391 = tpu.concatenate %382, %383, %384, %385, %386, %387, %388, %389, %390 in 1 : vector<24x128xf32>, vector<24x128xf32>, vector<24x128xf32>, vector<24x128xf32>, vector<24x128xf32>, vector<24x128xf32>, vector<24x128xf32>, vector<24x128xf32>, vector<24x128xf32> -> vector<24x1152xf32>
    %392 = arith.truncf %391 : vector<24x1152xf32> to vector<24x1152xbf16>
    %c0_340 = arith.constant 0 : index
    %c0_341 = arith.constant 0 : index
    %393 = vector.load %arg11[%c0_340, %c0_341] : memref<1152x256xbf16, #tpu.memory_space<vmem>>, vector<1152x256xbf16>
    %cst_342 = arith.constant dense<0.000000e+00> : vector<24x256xf32>
    %394 = tpu.matmul %392, %393, %cst_342 {dimension_numbers = #tpu.dot_dimension_numbers<[1], [0], [0], [1], [0, 0, 1, 1], [], []>} : vector<24x1152xbf16>, vector<1152x256xbf16>, vector<24x256xf32> -> vector<24x256xf32>
    %c0_343 = arith.constant 0 : index
    %c0_344 = arith.constant 0 : index
    %395 = vector.load %arg12[%c0_343, %c0_344] : memref<1x256xf32, #tpu.memory_space<vmem>>, vector<1x256xf32>
    %396 = vector.broadcast %395 : vector<1x256xf32> to vector<24x256xf32>
    %397 = arith.mulf %394, %396 : vector<24x256xf32>
    %c0_345 = arith.constant 0 : index
    %c0_346 = arith.constant 0 : index
    %398 = vector.load %arg13[%c0_345, %c0_346] : memref<1x256xf32, #tpu.memory_space<vmem>>, vector<1x256xf32>
    %399 = vector.broadcast %398 : vector<1x256xf32> to vector<24x256xf32>
    %400 = arith.addf %397, %399 : vector<24x256xf32>
    %cst_347 = arith.constant 0.000000e+00 : f32
    %401 = vector.broadcast %cst_347 : f32 to vector<24x256xf32>
    %402 = arith.maximumf %400, %401 : vector<24x256xf32>
    %c0_348 = arith.constant 0 : index
    %c0_349 = arith.constant 0 : index
    %403 = vector.load %arg25[%c0_348, %c0_349] : memref<32x256xf32, #tpu.memory_space<vmem>>, vector<24x256xf32>
    tpu.vector_store %arg25[%c0_348, %c0_349], %402 {strides = array<i32>} : memref<32x256xf32, #tpu.memory_space<vmem>>, vector<24x256xf32>,
    %cst_350 = arith.constant 0.000000e+00 : f32
    %404 = vector.broadcast %cst_350 : f32 to vector<1x256xf32>
    %c0_351 = arith.constant 0 : index
    %c0_352 = arith.constant 0 : index
    %405 = vector.load %arg25[%c0_351, %c0_352] : memref<32x256xf32, #tpu.memory_space<vmem>>, vector<1x256xf32>
    %c1_353 = arith.constant 1 : index
    %c0_354 = arith.constant 0 : index
    %406 = vector.load %arg25[%c1_353, %c0_354] : memref<32x256xf32, #tpu.memory_space<vmem>>, vector<1x256xf32>
    %407 = arith.maximumf %405, %406 : vector<1x256xf32>
    %c4_355 = arith.constant 4 : index
    %c0_356 = arith.constant 0 : index
    %408 = vector.load %arg25[%c4_355, %c0_356] : memref<32x256xf32, #tpu.memory_space<vmem>>, vector<1x256xf32>
    %c5_357 = arith.constant 5 : index
    %c0_358 = arith.constant 0 : index
    %409 = vector.load %arg25[%c5_357, %c0_358] : memref<32x256xf32, #tpu.memory_space<vmem>>, vector<1x256xf32>
    %410 = arith.maximumf %408, %409 : vector<1x256xf32>
    %411 = arith.maximumf %407, %410 : vector<1x256xf32>
    %cst_359 = arith.constant dense<0.000000e+00> : vector<256xf32>
    %412 = vector.multi_reduction <add>, %411, %cst_359 [0] : vector<1x256xf32> to vector<256xf32>
    %413 = vector.shape_cast %412 : vector<256xf32> to vector<1x256xf32>
    %414 = arith.addf %404, %413 : vector<1x256xf32>
    %cst_360 = arith.constant 1.000000e+00 : f32
    %415 = vector.broadcast %cst_360 : f32 to vector<1x256xf32>
    %416 = arith.mulf %414, %415 : vector<1x256xf32>
    %cst_361 = arith.constant 0.000000e+00 : f32
    %417 = vector.broadcast %cst_361 : f32 to vector<1x256xf32>
    %c16_362 = arith.constant 16 : index
    %c0_363 = arith.constant 0 : index
    %418 = vector.load %arg25[%c16_362, %c0_363] : memref<32x256xf32, #tpu.memory_space<vmem>>, vector<1x256xf32>
    %c17_364 = arith.constant 17 : index
    %c0_365 = arith.constant 0 : index
    %419 = vector.load %arg25[%c17_364, %c0_365] : memref<32x256xf32, #tpu.memory_space<vmem>>, vector<1x256xf32>
    %420 = arith.maximumf %418, %419 : vector<1x256xf32>
    %c20_366 = arith.constant 20 : index
    %c0_367 = arith.constant 0 : index
    %421 = vector.load %arg25[%c20_366, %c0_367] : memref<32x256xf32, #tpu.memory_space<vmem>>, vector<1x256xf32>
    %c21_368 = arith.constant 21 : index
    %c0_369 = arith.constant 0 : index
    %422 = vector.load %arg25[%c21_368, %c0_369] : memref<32x256xf32, #tpu.memory_space<vmem>>, vector<1x256xf32>
    %423 = arith.maximumf %421, %422 : vector<1x256xf32>
    %424 = arith.maximumf %420, %423 : vector<1x256xf32>
    %cst_370 = arith.constant dense<0.000000e+00> : vector<256xf32>
    %425 = vector.multi_reduction <add>, %424, %cst_370 [0] : vector<1x256xf32> to vector<256xf32>
    %426 = vector.shape_cast %425 : vector<256xf32> to vector<1x256xf32>
    %427 = arith.addf %417, %426 : vector<1x256xf32>
    %cst_371 = arith.constant 1.000000e+00 : f32
    %428 = vector.broadcast %cst_371 : f32 to vector<1x256xf32>
    %429 = arith.mulf %427, %428 : vector<1x256xf32>
    %430 = tpu.concatenate %416, %429 in 0 : vector<1x256xf32>, vector<1x256xf32> -> vector<2x256xf32>
    %431 = arith.truncf %430 : vector<2x256xf32> to vector<2x256xbf16>
    %c0_372 = arith.constant 0 : index
    %c0_373 = arith.constant 0 : index
    %432 = vector.load %arg14[%c0_372, %c0_373] : memref<256x256xbf16, #tpu.memory_space<vmem>>, vector<256x256xbf16>
    %cst_374 = arith.constant dense<0.000000e+00> : vector<2x256xf32>
    %433 = tpu.matmul %431, %432, %cst_374 {dimension_numbers = #tpu.dot_dimension_numbers<[1], [0], [0], [1], [0, 0, 1, 1], [], []>} : vector<2x256xbf16>, vector<256x256xbf16>, vector<2x256xf32> -> vector<2x256xf32>
    %c0_375 = arith.constant 0 : index
    %c0_376 = arith.constant 0 : index
    %434 = vector.load %arg15[%c0_375, %c0_376] : memref<1x256xf32, #tpu.memory_space<vmem>>, vector<1x256xf32>
    %435 = vector.broadcast %434 : vector<1x256xf32> to vector<2x256xf32>
    %436 = arith.addf %433, %435 : vector<2x256xf32>
    %cst_377 = arith.constant 0.000000e+00 : f32
    %437 = vector.broadcast %cst_377 : f32 to vector<2x256xf32>
    %438 = arith.maximumf %436, %437 : vector<2x256xf32>
    %439 = arith.truncf %438 : vector<2x256xf32> to vector<2x256xbf16>
    %c0_378 = arith.constant 0 : index
    %c0_379 = arith.constant 0 : index
    %440 = vector.load %arg16[%c0_378, %c0_379] : memref<256x128xbf16, #tpu.memory_space<vmem>>, vector<256x128xbf16>
    %cst_380 = arith.constant dense<0.000000e+00> : vector<2x128xf32>
    %441 = tpu.matmul %439, %440, %cst_380 {dimension_numbers = #tpu.dot_dimension_numbers<[1], [0], [0], [1], [0, 0, 1, 1], [], []>} : vector<2x256xbf16>, vector<256x128xbf16>, vector<2x128xf32> -> vector<2x128xf32>
    %c0_381 = arith.constant 0 : index
    %c0_382 = arith.constant 0 : index
    %442 = vector.load %arg17[%c0_381, %c0_382] : memref<1x128xf32, #tpu.memory_space<vmem>>, vector<1x128xf32>
    %443 = vector.broadcast %442 : vector<1x128xf32> to vector<2x128xf32>
    %444 = arith.addf %441, %443 : vector<2x128xf32>
    %c0_383 = arith.constant 0 : index
    %c0_384 = arith.constant 0 : index
    %c0_385 = arith.constant 0 : index
    %445 = vector.load %arg18[%c0_383, %c0_384, %c0_385] : memref<1x2x128xf32, #tpu.memory_space<vmem>>, vector<1x2x128xf32>
    %446 = vector.shape_cast %445 : vector<1x2x128xf32> to vector<2x128xf32>
    %447 = vector.shape_cast %444 : vector<2x128xf32> to vector<1x2x128xf32>
    tpu.vector_store %arg18[%c0_383, %c0_384, %c0_385], %447 {strides = array<i32>} : memref<1x2x128xf32, #tpu.memory_space<vmem>>, vector<1x2x128xf32>,
    return
  }
  func.func @transform_0(%arg0: i32) -> (i32, i32) {
    %c0_i32 = arith.constant 0 : i32
    %c0_i32_0 = arith.constant 0 : i32
    return %arg0, %c0_i32 : i32, i32
  }
  func.func @transform_1(%arg0: i32) -> (i32, i32) {
    %c0_i32 = arith.constant 0 : i32
    %c0_i32_0 = arith.constant 0 : i32
    %c0_i32_1 = arith.constant 0 : i32
    return %c0_i32, %c0_i32_0 : i32, i32
  }
  func.func @transform_2(%arg0: i32) -> (i32, i32) {
    %c0_i32 = arith.constant 0 : i32
    %c0_i32_0 = arith.constant 0 : i32
    %c0_i32_1 = arith.constant 0 : i32
    return %c0_i32, %c0_i32_0 : i32, i32
  }
  func.func @transform_3(%arg0: i32) -> (i32, i32) {
    %c0_i32 = arith.constant 0 : i32
    %c0_i32_0 = arith.constant 0 : i32
    %c0_i32_1 = arith.constant 0 : i32
    return %c0_i32, %c0_i32_0 : i32, i32
  }
  func.func @transform_4(%arg0: i32) -> (i32, i32, i32) {
    %c0_i32 = arith.constant 0 : i32
    %c0_i32_0 = arith.constant 0 : i32
    %c0_i32_1 = arith.constant 0 : i32
    %c0_i32_2 = arith.constant 0 : i32
    return %c0_i32, %c0_i32_0, %c0_i32_1 : i32, i32, i32
  }
  func.func @transform_5(%arg0: i32) -> (i32, i32) {
    %c0_i32 = arith.constant 0 : i32
    %c0_i32_0 = arith.constant 0 : i32
    %c0_i32_1 = arith.constant 0 : i32
    return %c0_i32, %c0_i32_0 : i32, i32
  }
  func.func @transform_6(%arg0: i32) -> (i32, i32) {
    %c0_i32 = arith.constant 0 : i32
    %c0_i32_0 = arith.constant 0 : i32
    %c0_i32_1 = arith.constant 0 : i32
    return %c0_i32, %c0_i32_0 : i32, i32
  }
  func.func @transform_7(%arg0: i32) -> (i32, i32, i32) {
    %c0_i32 = arith.constant 0 : i32
    %c0_i32_0 = arith.constant 0 : i32
    %c0_i32_1 = arith.constant 0 : i32
    %c0_i32_2 = arith.constant 0 : i32
    return %c0_i32, %c0_i32_0, %c0_i32_1 : i32, i32, i32
  }
  func.func @transform_8(%arg0: i32) -> (i32, i32) {
    %c0_i32 = arith.constant 0 : i32
    %c0_i32_0 = arith.constant 0 : i32
    %c0_i32_1 = arith.constant 0 : i32
    return %c0_i32, %c0_i32_0 : i32, i32
  }
  func.func @transform_9(%arg0: i32) -> (i32, i32) {
    %c0_i32 = arith.constant 0 : i32
    %c0_i32_0 = arith.constant 0 : i32
    %c0_i32_1 = arith.constant 0 : i32
    return %c0_i32, %c0_i32_0 : i32, i32
  }
  func.func @transform_10(%arg0: i32) -> (i32, i32) {
    %c0_i32 = arith.constant 0 : i32
    %c0_i32_0 = arith.constant 0 : i32
    %c0_i32_1 = arith.constant 0 : i32
    return %c0_i32, %c0_i32_0 : i32, i32
  }
  func.func @transform_11(%arg0: i32) -> (i32, i32) {
    %c0_i32 = arith.constant 0 : i32
    %c0_i32_0 = arith.constant 0 : i32
    %c0_i32_1 = arith.constant 0 : i32
    return %c0_i32, %c0_i32_0 : i32, i32
  }
  func.func @transform_12(%arg0: i32) -> (i32, i32) {
    %c0_i32 = arith.constant 0 : i32
    %c0_i32_0 = arith.constant 0 : i32
    %c0_i32_1 = arith.constant 0 : i32
    return %c0_i32, %c0_i32_0 : i32, i32
  }
  func.func @transform_13(%arg0: i32) -> (i32, i32) {
    %c0_i32 = arith.constant 0 : i32
    %c0_i32_0 = arith.constant 0 : i32
    %c0_i32_1 = arith.constant 0 : i32
    return %c0_i32, %c0_i32_0 : i32, i32
  }
  func.func @transform_14(%arg0: i32) -> (i32, i32) {
    %c0_i32 = arith.constant 0 : i32
    %c0_i32_0 = arith.constant 0 : i32
    %c0_i32_1 = arith.constant 0 : i32
    return %c0_i32, %c0_i32_0 : i32, i32
  }
  func.func @transform_15(%arg0: i32) -> (i32, i32) {
    %c0_i32 = arith.constant 0 : i32
    %c0_i32_0 = arith.constant 0 : i32
    %c0_i32_1 = arith.constant 0 : i32
    return %c0_i32, %c0_i32_0 : i32, i32
  }
  func.func @transform_16(%arg0: i32) -> (i32, i32) {
    %c0_i32 = arith.constant 0 : i32
    %c0_i32_0 = arith.constant 0 : i32
    %c0_i32_1 = arith.constant 0 : i32
    return %c0_i32, %c0_i32_0 : i32, i32
  }
  func.func @transform_17(%arg0: i32) -> (i32, i32, i32) {
    %c0_i32 = arith.constant 0 : i32
    %c0_i32_0 = arith.constant 0 : i32
    %c0_i32_1 = arith.constant 0 : i32
    return %arg0, %c0_i32, %c0_i32_0 : i32, i32, i32
  }
}

</mosaic_0001>

<bundles_post_ra>
// kernel: tpu_custom_call.1
= control target key start
LH: loop header
LB: loop body
LE: loop exit
PB: predicated region body
PF: predicated region fallthrough
CT: control target
= control target key end

     0   :  { %s9644_s0 = inlined_call_operand.vmem [shape: bf16[512,32], index: 0, kind: input, shape index: {}]   ;;  %s9645_s1 = inlined_call_operand.vmem [shape: bf16[32,32], index: 1, kind: input, shape index: {}]   ;;  %s9646_s2 = inlined_call_operand.vmem [shape: f32[1,32], index: 2, kind: input, shape index: {}]   ;;  %s9647_s3 = inlined_call_operand.vmem [shape: f32[1,32], index: 3, kind: input, shape index: {}]   ;;  %s9648_s4 = inlined_call_operand.hbm [shape: bf16[9,32,64], index: 4, kind: input, shape index: {}]   ;;  %s9649_s5 = inlined_call_operand.vmem [shape: f32[1,64], index: 5, kind: input, shape index: {}]   ;;  %s9650_s6 = inlined_call_operand.vmem [shape: f32[1,64], index: 6, kind: input, shape index: {}]   ;;  %s9651_s7 = inlined_call_operand.vmem [shape: bf16[9,64,128], index: 7, kind: input, shape index: {}]   ;;  %s9652_s8 = inlined_call_operand.vmem [shape: f32[1,128], index: 8, kind: input, shape index: {}]   ;;  %s9653_s9 = inlined_call_operand.vmem [shape: f32[1,128], index: 9, kind: input, shape index: {}]   ;;  %s9654_s10 = inlined_call_operand.hbm [shape: bf16[1152,256], index: 10, kind: input, shape index: {}]   ;;  %s9655_s11 = inlined_call_operand.vmem [shape: f32[1,256], index: 11, kind: input, shape index: {}]   ;;  %s9656_s12 = inlined_call_operand.vmem [shape: f32[1,256], index: 12, kind: input, shape index: {}]   ;;  %s9657_s13 = inlined_call_operand.hbm [shape: bf16[256,256], index: 13, kind: input, shape index: {}]   ;;  %s9658_s14 = inlined_call_operand.vmem [shape: f32[1,256], index: 14, kind: input, shape index: {}]   ;;  %s9659_s15 = inlined_call_operand.hbm [shape: bf16[256,128], index: 15, kind: input, shape index: {}]   ;;  %s9660_s16 = inlined_call_operand.vmem [shape: f32[1,128], index: 16, kind: input, shape index: {}]   ;;  %s9661_s17 = inlined_call_operand.hbm [shape: f32[1,2,128], index: 17, kind: output, shape index: {}]  }
   0x1   :  { %9666 = sst [smem:[#allocation22_spill]] %s9644_s0 }
   0x2   :  { %9667 = sst [smem:[#allocation23_spill]] %s9645_s1 }
   0x3   :  { %22 = vsyncpa [#allocation10], 0 }
   0x4   :  { %23 = vsyncpa [#allocation13], 0 }
   0x5   :  { %24 = vsyncpa [#allocation16], 0 }
   0x6   :  { %25 = vsyncpa [#allocation11], 0  ;;  %s8600_s24 = smov [#allocation12]   ;;  %s8482_s28 = scalar_lea.hbm %s9654_s10, 18432 }
   0x7   :  { %s61_s25 = sshll.u32 %s8600_s24, 4  ;;  %p8483_p0 = scmp.ne.s32.totalorder %s9654_s10, %s8482_s28  ;;  %s62_s25 = int_to_ptr.vmem [resolvable:$true] %s61_s25 }
   0x8   :  { %p8486_p1 = scmp.lt.u32.totalorder %s8482_s28, %s9654_s10 }
   0xa   :  { %p8488_p2 = pnand %p8486_p1, %p8483_p0 }
   0xc   :  { %8491 = shalt.err (!%p8488_p2)
}
   0xd   :  { %s8492_s19 = scalar_lea.vmem %s62_s25, 18432  ;;  %p8497_p4 = scmp.lt.s32.totalorder %s62_s25, %s62_s25 }
   0xe   :  { %p8493_p3 = scmp.ne.s32.totalorder %s62_s25, %s8492_s19  ;;  %p8498_p5 = scmp.lt.s32.totalorder %s8492_s19, %s8492_s19 }
  0x10   :  { %p8499_p6 = por %p8498_p5, %p8497_p4 }
  0x12   :  { %p8500_p7 = pnand %p8499_p6, %p8493_p3 }
  0x14   :  { %8503 = shalt.err (!%p8500_p7)
}
  0x15   :  { %s9664_s1 = smov 128   ;;  %s9665_s20 = smov 8  }
  0x16   :  { %67 = dma.hbm_to_vmem [thread:$0]  %s9654_s10, 18432, %s62_s25, [#allocation13], %s9664_s1, %s9664_s1, %s9665_s20  }
  0x17   :  { %s8603_s23 = smov [#allocation9]   ;;  %s8504_s28 = scalar_lea.hbm %s9648_s4, 2304 }
  0x18   :  { %s39_s24 = sshll.u32 %s8603_s23, 4  ;;  %p8505_p8 = scmp.ne.s32.totalorder %s9648_s4, %s8504_s28  ;;  %s40_s24 = int_to_ptr.vmem [resolvable:$true] %s39_s24 }
  0x19   :  { %p8508_p9 = scmp.lt.u32.totalorder %s8504_s28, %s9648_s4 }
  0x1b   :  { %p8510_p10 = pnand %p8508_p9, %p8505_p8 }
  0x1d   :  { %8513 = shalt.err (!%p8510_p10)
}
  0x1e   :  { %s8514_s19 = scalar_lea.vmem %s40_s24, 2304  ;;  %p8519_p12 = scmp.lt.s32.totalorder %s40_s24, %s40_s24 }
  0x1f   :  { %p8515_p11 = scmp.ne.s32.totalorder %s40_s24, %s8514_s19  ;;  %p8520_p13 = scmp.lt.s32.totalorder %s8514_s19, %s8514_s19 }
  0x21   :  { %p8521_p0 = por %p8520_p13, %p8519_p12 }
  0x23   :  { %p8522_p1 = pnand %p8521_p0, %p8515_p11 }
  0x25   :  { %8525 = shalt.err (!%p8522_p1)
}
  0x26   :  { %s8604_s10 = smov 64   ;;  %s8605_s25 = smov 4  }
  0x27   :  { %45 = dma.hbm_to_vmem [thread:$0]  %s9648_s4, 2304, %s40_s24, [#allocation10], %s8604_s10, %s8604_s10, %s8605_s25  }
  0x28   :  { %s8606_s23 = smov [#allocation14]   ;;  %s8607_s27 = smov [#allocation15]  }
  0x29   :  { %s77_s26 = sshll.u32 %s8606_s23, 4  ;;  %s91_s28 = sshll.u32 %s8607_s27, 4  ;;  %s78_s26 = int_to_ptr.vmem [resolvable:$true] %s77_s26  ;;  %s8731_s28 = int_to_ptr.vmem [resolvable:$true] %s91_s28 }
  0x2a   :  { %s8526_s30 = scalar_lea.hbm %s9657_s13, 4096 }
  0x2b   :  { %p8527_p2 = scmp.ne.s32.totalorder %s9657_s13, %s8526_s30  ;;  %p8530_p3 = scmp.lt.u32.totalorder %s8526_s30, %s9657_s13 }
  0x2d   :  { %p8532_p4 = pnand %p8530_p3, %p8527_p2 }
  0x2f   :  { %8535 = shalt.err (!%p8532_p4)
}
  0x30   :  { %s8536_s4 = scalar_lea.vmem %s78_s26, 4096  ;;  %p8541_p6 = scmp.lt.s32.totalorder %s78_s26, %s78_s26 }
  0x31   :  { %p8537_p5 = scmp.ne.s32.totalorder %s78_s26, %s8536_s4  ;;  %p8542_p7 = scmp.lt.s32.totalorder %s8536_s4, %s8536_s4 }
  0x33   :  { %p8543_p8 = por %p8542_p7, %p8541_p6 }
  0x35   :  { %p8544_p9 = pnand %p8543_p8, %p8537_p5 }
  0x37   :  { %8547 = shalt.err (!%p8544_p9)
}
  0x38   :  { %s9668_s24 = smov 8   ;;  %s9669_s21 = smov 128  }
  0x39   :  { %83 = dma.hbm_to_vmem [thread:$0]  %s9657_s13, 4096, %s78_s26, [#allocation13], %s9669_s21, %s9669_s21, %s9668_s24  }
  0x3a   :  { %s8548_s1 = scalar_lea.hbm %s9659_s15, 2048 }
  0x3b   :  { %p8549_p10 = scmp.ne.s32.totalorder %s9659_s15, %s8548_s1  ;;  %p8552_p11 = scmp.lt.u32.totalorder %s8548_s1, %s9659_s15 }
  0x3d   :  { %p8554_p12 = pnand %p8552_p11, %p8549_p10 }
  0x3f   :  { %8557 = shalt.err (!%p8554_p12)
}
  0x40   :  { %s8558_s19 = scalar_lea.vmem %s8731_s28, 2048  ;;  %p8563_p0 = scmp.lt.s32.totalorder %s8731_s28, %s8731_s28 }
  0x41   :  { %p8559_p13 = scmp.ne.s32.totalorder %s8731_s28, %s8558_s19  ;;  %p8564_p1 = scmp.lt.s32.totalorder %s8558_s19, %s8558_s19 }
  0x43   :  { %p8565_p2 = por %p8564_p1, %p8563_p0 }
  0x45   :  { %p8566_p3 = pnand %p8565_p2, %p8559_p13 }
  0x47   :  { %8569 = shalt.err (!%p8566_p3)
}
  0x48   :  { %97 = dma.hbm_to_vmem [thread:$0]  %s9659_s15, 2048, %s8731_s28, [#allocation16], %s8604_s10, %s8604_s10, %s8605_s25  }
  0x49   :  { %8592 = dma.done.wait [#allocation10], 2304  }
  0x4a   :  { %8593 = vsyncadd [#allocation10], 4294964992 }
  0x4b   :  { %8594 = dma.done.wait [#allocation13], 22528  }
  0x4c   :  { %8595 = vsyncadd [#allocation13], 4294944768 }
  0x4d   :  { %8596 = dma.done.wait [#allocation16], 2048  }
  0x4e   :  { %8597 = vsyncadd [#allocation16], 4294965248  ;;  %s9670_s21 = sld [smem:[#allocation23_spill]]  ;;  %vm113_vm0 = vcmask 261120   ;;  %s9671_s1 = sld [smem:[#allocation22_spill]]  ;;  %v8147_v36 = vld [vmem:[#allocation9 + $0x10] sm:$0xff]  }
  0x4f   :  { %v8608_v37 = vmov 0.0   ;;  %v8148_v38 = vld [vmem:[#allocation9 + $0x18] sm:$0xff]   ;;  %v8934_v39 = vld [vmem:[#allocation9] sm:$0xff]   ;;  %v8940_v40 = vld [vmem:[%s9646_s2] ss:$0 sm:$0xff]  ;;  %vm140_vm1 = vcmask 523264  }
  0x50   :  { %114 = vst.msk [vmem:[#allocation3] sm:$0xff] %vm113_vm0, %v8608_v37  ;;  %115 = vst.msk [vmem:[#allocation3 + $0x8] sm:$0xff] %vm113_vm0, %v8608_v37  ;;  %v8945_v42 = vld [vmem:[%s9647_s3] ss:$0 sm:$0xff]  ;;  %vm3514_vm2 = vcmask 519168   ;;  %vm6110_vm3 = vcmask 1040384  }
  0x51   :  { %116 = vst.msk [vmem:[#allocation3 + $0x10] sm:$0xff] %vm113_vm0, %v8608_v37  ;;  %117 = vst.msk [vmem:[#allocation3 + $0x18] sm:$0xff] %vm113_vm0, %v8608_v37 }
  0x52   :  { %118 = vst.msk [vmem:[#allocation3 + $0x20] sm:$0xff] %vm113_vm0, %v8608_v37  ;;  %119 = vst.msk [vmem:[#allocation3 + $0x28] sm:$0xff] %vm113_vm0, %v8608_v37 }
  0x53   :  { %120 = vst.msk [vmem:[#allocation3 + $0x30] sm:$0xff] %vm113_vm0, %v8608_v37  ;;  %121 = vst.msk [vmem:[#allocation3 + $0x38] sm:$0xff] %vm113_vm0, %v8608_v37 }
  0x54   :  { %v8111_v0 = vld [vmem:[%s9670_s21] sm:$0xff]   ;;  %v8112_v1 = vld [vmem:[%s9670_s21 + $0x8] sm:$0xff]   ;;  %v8116_v5 = vld [vmem:[%s9671_s1 + $0x10] sm:$0xff]   ;;  %122 = vst.msk [vmem:[#allocation3 + $0x40] sm:$0xff] %vm113_vm0, %v8608_v37 }
  0x55   :  { %7344 = vmatprep.subr.bf16.mxu0 %v8111_v0  ;;  %v8113_v2 = vld [vmem:[%s9671_s1] sm:$0xff]   ;;  %v8114_v4 = vld [vmem:[%s9671_s1 + $0x8] sm:$0xff]   ;;  %v8123_v9 = vld [vmem:[%s9671_s1 + $0x90] sm:$0xff]   ;;  %123 = vst.msk [vmem:[#allocation3 + $0x48] sm:$0xff] %vm113_vm0, %v8608_v37 }
  0x56   :  { %7345 = vmatpush3.bf16.msra.mxu0 %v8111_v0  ;;  %7348 = vmatprep.mubr.msk.bf16.mxu0 %vm113_vm0, %v8113_v2  ;;  %v8115_v3 = vld [vmem:[%s9670_s21] sm:$0xff]   ;;  %v8118_v6 = vld [vmem:[%s9670_s21 + $0x8] sm:$0xff]   ;;  %v8117_v10 = vld [vmem:[%s9671_s1 + $0x18] sm:$0xff]   ;;  %124 = vst.msk [vmem:[#allocation3 + $0x50] sm:$0xff] %vm113_vm0, %v8608_v37 }
  0x57   :  { %7346 = vmatprep.subr.bf16.mxu0 %v8112_v1  ;;  %7380 = vmatprep.subr.bf16.mxu1 %v8115_v3  ;;  %v8119_v7 = vld [vmem:[%s9671_s1 + $0x80] sm:$0xff]   ;;  %v8120_v8 = vld [vmem:[%s9671_s1 + $0x88] sm:$0xff]   ;;  %v8124_v12 = vld [vmem:[%s9671_s1 + $0x98] sm:$0xff]   ;;  %125 = vst.msk [vmem:[#allocation3 + $0x58] sm:$0xff] %vm113_vm0, %v8608_v37 }
  0x58   :  { %7381 = vmatpush3.bf16.msra.mxu1 %v8115_v3  ;;  %7384 = vmatprep.mubr.msk.bf16.mxu1 %vm113_vm0, %v8119_v7  ;;  %v8121_v11 = vld [vmem:[%s9671_s1 + $0x20] sm:$0xff]   ;;  %v8122_v14 = vld [vmem:[%s9671_s1 + $0x28] sm:$0xff]   ;;  %v8125_v15 = vld [vmem:[%s9671_s1 + $0x30] sm:$0xff]   ;;  %126 = vst.msk [vmem:[#allocation3 + $0x60] sm:$0xff] %vm113_vm0, %v8608_v37 }
  0x59   :  { %7382 = vmatprep.subr.bf16.mxu1 %v8118_v6  ;;  %v8127_v13 = vld [vmem:[%s9671_s1 + $0xa0] sm:$0xff]   ;;  %v8128_v16 = vld [vmem:[%s9671_s1 + $0xa8] sm:$0xff]   ;;  %v8131_v17 = vld [vmem:[%s9671_s1 + $0xb0] sm:$0xff]   ;;  %127 = vst.msk [vmem:[#allocation3 + $0x68] sm:$0xff] %vm113_vm0, %v8608_v37 }
  0x5a   :  { %7347 = vmatpush3.bf16.msra.mxu0 %v8112_v1  ;;  %v8126_v18 = vld [vmem:[%s9671_s1 + $0x38] sm:$0xff]   ;;  %v8129_v19 = vld [vmem:[%s9671_s1 + $0x40] sm:$0xff]   ;;  %v8130_v22 = vld [vmem:[%s9671_s1 + $0x48] sm:$0xff]   ;;  %128 = vst.msk [vmem:[#allocation3 + $0x70] sm:$0xff] %vm113_vm0, %v8608_v37 }
  0x5b   :  { %v8132_v20 = vld [vmem:[%s9671_s1 + $0xb8] sm:$0xff]   ;;  %v8135_v21 = vld [vmem:[%s9671_s1 + $0xc0] sm:$0xff]   ;;  %v8133_v23 = vld [vmem:[%s9671_s1 + $0x50] sm:$0xff]   ;;  %129 = vst.msk [vmem:[#allocation3 + $0x78] sm:$0xff] %vm113_vm0, %v8608_v37  ;;  %7416 = vmatprep.subr.bf16.mxu0 %v8147_v36 }
  0x5c   :  { %7383 = vmatpush3.bf16.msra.mxu1 %v8118_v6  ;;  %v8136_v24 = vld [vmem:[%s9671_s1 + $0xc8] sm:$0xff]   ;;  %v8139_v25 = vld [vmem:[%s9671_s1 + $0xd0] sm:$0xff]   ;;  %v8134_v26 = vld [vmem:[%s9671_s1 + $0x58] sm:$0xff]   ;;  %130 = vst.msk [vmem:[#allocation3 + $0x80] sm:$0xff] %vm113_vm0, %v8608_v37 }
  0x5d   :  { %7349 = vmatmul.mubr.msk.bf16.vlgmr.msra.gmra.mrb[0].mxu0 %vm113_vm0, %v8114_v4  ;;  %v8137_v27 = vld [vmem:[%s9671_s1 + $0x60] sm:$0xff]   ;;  %v8140_v28 = vld [vmem:[%s9671_s1 + $0xd8] sm:$0xff]   ;;  %v8138_v30 = vld [vmem:[%s9671_s1 + $0x68] sm:$0xff]   ;;  %131 = vst.msk [vmem:[#allocation3 + $0x88] sm:$0xff] %vm113_vm0, %v8608_v37 }
  0x5e   :  { %7352 = vmatprep.mubr.msk.bf16.mxu0 %vm113_vm0, %v8116_v5  ;;  %v8143_v29 = vld [vmem:[%s9671_s1 + $0xe0] sm:$0xff]   ;;  %v8141_v31 = vld [vmem:[%s9671_s1 + $0x70] sm:$0xff]   ;;  %v8144_v32 = vld [vmem:[%s9671_s1 + $0xe8] sm:$0xff]   ;;  %132 = vst.msk [vmem:[#allocation3 + $0x90] sm:$0xff] %vm113_vm0, %v8608_v37  ;;  %7417 = vmatpush3.bf16.msra.mxu0 %v8147_v36 }
  0x5f   :  { %7385 = vmatmul.mubr.msk.bf16.vlgmr.msra.gmra.mrb[0].mxu1 %vm113_vm0, %v8120_v8  ;;  %v8145_v33 = vld [vmem:[%s9671_s1 + $0xf0] sm:$0xff]   ;;  %v8142_v34 = vld [vmem:[%s9671_s1 + $0x78] sm:$0xff]   ;;  %133 = vst.msk [vmem:[#allocation3 + $0x98] sm:$0xff] %vm113_vm0, %v8608_v37  ;;  %134 = vst.msk [vmem:[#allocation3 + $0xa0] sm:$0xff] %vm113_vm0, %v8608_v37  ;;  %7418 = vmatprep.subr.bf16.mxu0 %v8148_v38 }
  0x60   :  { %7388 = vmatprep.mubr.msk.bf16.mxu1 %vm113_vm0, %v8123_v9  ;;  %v8146_v35 = vld [vmem:[%s9671_s1 + $0xf8] sm:$0xff]   ;;  %135 = vst.msk [vmem:[#allocation3 + $0xa8] sm:$0xff] %vm113_vm0, %v8608_v37  ;;  %136 = vst.msk [vmem:[#allocation3 + $0xb0] sm:$0xff] %vm113_vm0, %v8608_v37 }
  0x61   :  { %137 = vst.msk [vmem:[#allocation3 + $0xb8] sm:$0xff] %vm113_vm0, %v8608_v37  ;;  %138 = vst.msk [vmem:[#allocation3 + $0xc0] sm:$0xff] %vm113_vm0, %v8608_v37 }
  0x62   :  { %139 = vst.msk [vmem:[#allocation3 + $0xc8] sm:$0xff] %vm113_vm0, %v8608_v37  ;;  %151 = vst [vmem:[#allocation7] sm:$0xff] %v8608_v37  ;;  %7419 = vmatpush3.bf16.msra.mxu0 %v8148_v38 }
  0x63   :  { %152 = vst [vmem:[#allocation7 + $0x8] sm:$0xff] %v8608_v37  ;;  %153 = vst [vmem:[#allocation7 + $0x10] sm:$0xff] %v8608_v37  ;;  %7444 = vmatprep.subr.bf16.mxu0 %v8934_v39 }
  0x64   :  { %154 = vst [vmem:[#allocation7 + $0x18] sm:$0xff] %v8608_v37  ;;  %155 = vst [vmem:[#allocation7 + $0x20] sm:$0xff] %v8608_v37 }
  0x65   :  { %7353 = vmatmul.mubr.msk.bf16.gmra.mrb[4].mxu0 %vm113_vm0, %v8117_v10 }
  0x66   :  { %7356 = vmatprep.mubr.msk.bf16.mxu0 %vm113_vm0, %v8121_v11 }
  0x67   :  { %7389 = vmatmul.mubr.msk.bf16.gmra.mrb[4].mxu1 %vm113_vm0, %v8124_v12 }
  0x68   :  { %7392 = vmatprep.mubr.msk.bf16.mxu1 %vm113_vm0, %v8127_v13 }
  0x6d   :  { %7357 = vmatmul.mubr.msk.bf16.gmra.mrb[8].mxu0 %vm113_vm0, %v8122_v14 }
  0x6e   :  { %7360 = vmatprep.mubr.msk.bf16.mxu0 %vm113_vm0, %v8125_v15 }
  0x6f   :  { %7393 = vmatmul.mubr.msk.bf16.gmra.mrb[8].mxu1 %vm113_vm0, %v8128_v16 }
  0x70   :  { %7396 = vmatprep.mubr.msk.bf16.mxu1 %vm113_vm0, %v8131_v17 }
  0x75   :  { %7361 = vmatmul.mubr.msk.bf16.gmra.mrb[12].mxu0 %vm113_vm0, %v8126_v18 }
  0x76   :  { %7364 = vmatprep.mubr.msk.bf16.mxu0 %vm113_vm0, %v8129_v19 }
  0x77   :  { %7397 = vmatmul.mubr.msk.bf16.gmra.mrb[12].mxu1 %vm113_vm0, %v8132_v20 }
  0x78   :  { %7400 = vmatprep.mubr.msk.bf16.mxu1 %vm113_vm0, %v8135_v21 }
  0x7d   :  { %7365 = vmatmul.mubr.msk.bf16.gmra.mrb[16].mxu0 %vm113_vm0, %v8130_v22 }
  0x7e   :  { %7368 = vmatprep.mubr.msk.bf16.mxu0 %vm113_vm0, %v8133_v23 }
  0x7f   :  { %7401 = vmatmul.mubr.msk.bf16.gmra.mrb[16].mxu1 %vm113_vm0, %v8136_v24 }
  0x80   :  { %7404 = vmatprep.mubr.msk.bf16.mxu1 %vm113_vm0, %v8139_v25 }
  0x85   :  { %7369 = vmatmul.mubr.msk.bf16.gmra.mrb[20].mxu0 %vm113_vm0, %v8134_v26 }
  0x86   :  { %7372 = vmatprep.mubr.msk.bf16.mxu0 %vm113_vm0, %v8137_v27 }
  0x87   :  { %7405 = vmatmul.mubr.msk.bf16.gmra.mrb[20].mxu1 %vm113_vm0, %v8140_v28 }
  0x88   :  { %7408 = vmatprep.mubr.msk.bf16.mxu1 %vm113_vm0, %v8143_v29 }
  0x8d   :  { %7373 = vmatmul.mubr.msk.bf16.gmra.mrb[24].mxu0 %vm113_vm0, %v8138_v30 }
  0x8e   :  { %7376 = vmatprep.mubr.msk.bf16.mxu0 %vm113_vm0, %v8141_v31 }
  0x8f   :  { %7409 = vmatmul.mubr.msk.bf16.gmra.mrb[24].mxu1 %vm113_vm0, %v8144_v32 }
  0x90   :  { %7412 = vmatprep.mubr.msk.bf16.mxu1 %vm113_vm0, %v8145_v33 }
  0x95   :  { %7377 = vmatmul.mubr.msk.bf16.gmra.mrb[28].mxu0 %vm113_vm0, %v8142_v34 }
  0x97   :  { %7413 = vmatmul.mubr.msk.bf16.gmra.mrb[28].mxu1 %vm113_vm0, %v8146_v35 }
 0x130   :  { %v7350_v41 = vpop.f32.mrb[0].mxu0 }
 0x131   :  { %v502_v43 = vmul.f32 %v7350_v41, %v8940_v40  ;;  %v366_v44 = vpop.f32.mrb[1].mxu0 }
 0x132   :  { %v500_v45 = vmul.f32 %v8940_v40, %v366_v44  ;;  %v7351_v46 = vpop.f32.mrb[2].mxu0  ;;  %v7386_v52 = vpop.f32.mrb[0].mxu1 }
 0x133   :  { %v541_v47 = vadd.f32 %v8945_v42, %v502_v43  ;;  %v503_v48 = vmul.f32 %v7351_v46, %v8940_v40  ;;  %v369_v49 = vpop.f32.mrb[3].mxu0  ;;  %v981_v55 = vmul.f32 %v7386_v52, %v8940_v40  ;;  %v845_v56 = vpop.f32.mrb[1].mxu1 }
 0x134   :  { %v539_v50 = vadd.f32 %v8945_v42, %v500_v45  ;;  %v501_v51 = vmul.f32 %v8940_v40, %v369_v49  ;;  %v979_v59 = vmul.f32 %v8940_v40, %v845_v56  ;;  %v7387_v60 = vpop.f32.mrb[2].mxu1 }
 0x135   :  { %v573_v53 = vmax.f32 %v541_v47, 0.0  ;;  %v542_v54 = vadd.f32 %v8945_v42, %v503_v48  ;;  %v1020_v62 = vadd.f32 %v8945_v42, %v981_v55  ;;  %v982_v63 = vmul.f32 %v7387_v60, %v8940_v40  ;;  %v848_v0 = vpop.f32.mrb[3].mxu1 }
 0x136   :  { %v571_v57 = vmax.f32 %v539_v50, 0.0  ;;  %v540_v58 = vadd.f32 %v8945_v42, %v501_v51  ;;  %v1018_v3 = vadd.f32 %v8945_v42, %v979_v59  ;;  %v980_v4 = vmul.f32 %v8940_v40, %v848_v0 }
 0x137   :  { %605 = vst.msk [vmem:[#allocation2 + $0x10] sm:$0xff] %vm113_vm0, %v573_v53  ;;  %v574_v61 = vmax.f32 %v542_v54, 0.0  ;;  %v1052_v7 = vmax.f32 %v1020_v62, 0.0  ;;  %v1021_v8 = vadd.f32 %v8945_v42, %v982_v63 }
 0x138   :  { %603 = vst.msk [vmem:[#allocation2] sm:$0xff] %vm113_vm0, %v571_v57  ;;  %v572_v1 = vmax.f32 %v540_v58, 0.0  ;;  %v7354_v2 = vpop.f32.mrb[4].mxu0  ;;  %v1050_v11 = vmax.f32 %v1018_v3, 0.0  ;;  %v1019_v12 = vadd.f32 %v8945_v42, %v980_v4 }
 0x139   :  { %606 = vst.msk [vmem:[#allocation2 + $0x18] sm:$0xff] %vm113_vm0, %v574_v61  ;;  %v506_v5 = vmul.f32 %v7354_v2, %v8940_v40  ;;  %v382_v6 = vpop.f32.mrb[5].mxu0  ;;  %1084 = vst.msk [vmem:[#allocation2 + $0x110] sm:$0xff] %vm113_vm0, %v1052_v7  ;;  %v1053_v16 = vmax.f32 %v1021_v8, 0.0 }
 0x13a   :  { %604 = vst.msk [vmem:[#allocation2 + $0x8] sm:$0xff] %vm113_vm0, %v572_v1  ;;  %v504_v9 = vmul.f32 %v8940_v40, %v382_v6  ;;  %v7355_v10 = vpop.f32.mrb[6].mxu0  ;;  %1082 = vst.msk [vmem:[#allocation2 + $0x100] sm:$0xff] %vm113_vm0, %v1050_v11  ;;  %v1051_v19 = vmax.f32 %v1019_v12, 0.0  ;;  %v7390_v20 = vpop.f32.mrb[4].mxu1 }
 0x13b   :  { %v545_v13 = vadd.f32 %v8945_v42, %v506_v5  ;;  %v507_v14 = vmul.f32 %v7355_v10, %v8940_v40  ;;  %v385_v15 = vpop.f32.mrb[7].mxu0  ;;  %1085 = vst.msk [vmem:[#allocation2 + $0x118] sm:$0xff] %vm113_vm0, %v1053_v16  ;;  %v985_v23 = vmul.f32 %v7390_v20, %v8940_v40  ;;  %v861_v24 = vpop.f32.mrb[5].mxu1 }
 0x13c   :  { %v543_v17 = vadd.f32 %v8945_v42, %v504_v9  ;;  %v505_v18 = vmul.f32 %v8940_v40, %v385_v15  ;;  %1083 = vst.msk [vmem:[#allocation2 + $0x108] sm:$0xff] %vm113_vm0, %v1051_v19  ;;  %v983_v27 = vmul.f32 %v8940_v40, %v861_v24  ;;  %v7391_v28 = vpop.f32.mrb[6].mxu1 }
 0x13d   :  { %v577_v21 = vmax.f32 %v545_v13, 0.0  ;;  %v546_v22 = vadd.f32 %v8945_v42, %v507_v14  ;;  %v1024_v30 = vadd.f32 %v8945_v42, %v985_v23  ;;  %v986_v31 = vmul.f32 %v7391_v28, %v8940_v40  ;;  %v864_v32 = vpop.f32.mrb[7].mxu1 }
 0x13e   :  { %v575_v25 = vmax.f32 %v543_v17, 0.0  ;;  %v544_v26 = vadd.f32 %v8945_v42, %v505_v18  ;;  %v1022_v37 = vadd.f32 %v8945_v42, %v983_v27  ;;  %v984_v38 = vmul.f32 %v8940_v40, %v864_v32 }
 0x13f   :  { %609 = vst.msk [vmem:[#allocation2 + $0x30] sm:$0xff] %vm113_vm0, %v577_v21  ;;  %v578_v29 = vmax.f32 %v546_v22, 0.0  ;;  %v1056_v47 = vmax.f32 %v1024_v30, 0.0  ;;  %v1025_v48 = vadd.f32 %v8945_v42, %v986_v31 }
 0x140   :  { %v1119_v33 = vld [vmem:[#allocation2 + $0x10] ss:$2 sm:$0xff]  ;;  %v1121_v34 = vld [vmem:[#allocation2 + $0x11] ss:$2 sm:$0xff]  ;;  %607 = vst.msk [vmem:[#allocation2 + $0x20] sm:$0xff] %vm113_vm0, %v575_v25  ;;  %v576_v35 = vmax.f32 %v544_v26, 0.0  ;;  %v1023_v53 = vadd.f32 %v8945_v42, %v984_v38 }
 0x141   :  { %v7358_v36 = vpop.f32.mrb[8].mxu0  ;;  %v1122_v41 = vmax.f32 %v1119_v33, %v1121_v34  ;;  %v1114_v43 = vld [vmem:[#allocation2] ss:$2 sm:$0xff]  ;;  %v1116_v44 = vld [vmem:[#allocation2 + $0x1] ss:$2 sm:$0xff]  ;;  %610 = vst.msk [vmem:[#allocation2 + $0x38] sm:$0xff] %vm113_vm0, %v578_v29 }
 0x142   :  { %v510_v45 = vmul.f32 %v7358_v36, %v8940_v40  ;;  %v398_v46 = vpop.f32.mrb[9].mxu0  ;;  %v1117_v49 = vmax.f32 %v1114_v43, %v1116_v44  ;;  %608 = vst.msk [vmem:[#allocation2 + $0x28] sm:$0xff] %vm113_vm0, %v576_v35  ;;  %v1054_v52 = vmax.f32 %v1022_v37, 0.0  ;;  %1088 = vst.msk [vmem:[#allocation2 + $0x130] sm:$0xff] %vm113_vm0, %v1056_v47  ;;  %v1057_v57 = vmax.f32 %v1025_v48, 0.0  ;;  %v7394_v0 = vpop.f32.mrb[8].mxu1 }
 0x143   :  { %v508_v50 = vmul.f32 %v8940_v40, %v398_v46  ;;  %v7359_v51 = vpop.f32.mrb[10].mxu0  ;;  %v1215_v61 = vld [vmem:[#allocation2 + $0x110] ss:$2 sm:$0xff]  ;;  %v1217_v62 = vld [vmem:[#allocation2 + $0x111] ss:$2 sm:$0xff]  ;;  %v1055_v63 = vmax.f32 %v1023_v53, 0.0  ;;  %v989_v6 = vmul.f32 %v7394_v0, %v8940_v40 }
 0x144   :  { %v549_v54 = vadd.f32 %v8945_v42, %v510_v45  ;;  %v511_v55 = vmul.f32 %v7359_v51, %v8940_v40  ;;  %v401_v56 = vpop.f32.mrb[11].mxu0  ;;  %v1123_v58 = vmax.f32 %v1117_v49, %v1122_v41  ;;  %1086 = vst.msk [vmem:[#allocation2 + $0x120] sm:$0xff] %vm113_vm0, %v1054_v52  ;;  %v1218_v3 = vmax.f32 %v1215_v61, %v1217_v62  ;;  %v1210_v4 = vld [vmem:[#allocation2 + $0x100] ss:$2 sm:$0xff]  ;;  %v1212_v5 = vld [vmem:[#allocation2 + $0x101] ss:$2 sm:$0xff] }
 0x145   :  { %v547_v59 = vadd.f32 %v8945_v42, %v508_v50  ;;  %v509_v60 = vmul.f32 %v8940_v40, %v401_v56  ;;  %1089 = vst.msk [vmem:[#allocation2 + $0x138] sm:$0xff] %vm113_vm0, %v1057_v57  ;;  %v877_v7 = vpop.f32.mrb[9].mxu1  ;;  %v1213_v10 = vmax.f32 %v1210_v4, %v1212_v5  ;;  %1087 = vst.msk [vmem:[#allocation2 + $0x128] sm:$0xff] %vm113_vm0, %v1055_v63  ;;  %v1344_v43 = vld [vmem:[#allocation3 + $0x1] sm:$0xff] }
 0x146   :  { %v581_v1 = vmax.f32 %v549_v54, 0.0  ;;  %v550_v2 = vadd.f32 %v8945_v42, %v511_v55  ;;  %v987_v11 = vmul.f32 %v8940_v40, %v877_v7  ;;  %v7395_v12 = vpop.f32.mrb[10].mxu1  ;;  %1124 = vst.msk [vmem:[#allocation3 + $0xb] sm:$0xff] %vm113_vm0, %v1123_v58  ;;  %v1028_v14 = vadd.f32 %v8945_v42, %v989_v6 }
 0x147   :  { %v579_v8 = vmax.f32 %v547_v59, 0.0  ;;  %v548_v9 = vadd.f32 %v8945_v42, %v509_v60  ;;  %v990_v15 = vmul.f32 %v7395_v12, %v8940_v40  ;;  %v880_v16 = vpop.f32.mrb[11].mxu1  ;;  %v1219_v20 = vmax.f32 %v1213_v10, %v1218_v3 }
 0x148   :  { %613 = vst.msk [vmem:[#allocation2 + $0x50] sm:$0xff] %vm113_vm0, %v581_v1  ;;  %v582_v13 = vmax.f32 %v550_v2, 0.0  ;;  %v1131_v17 = vld [vmem:[#allocation2 + $0x30] ss:$2 sm:$0xff]  ;;  %v1133_v18 = vld [vmem:[#allocation2 + $0x31] ss:$2 sm:$0xff]  ;;  %v1026_v22 = vadd.f32 %v8945_v42, %v987_v11  ;;  %v988_v23 = vmul.f32 %v8940_v40, %v880_v16 }
 0x149   :  { %611 = vst.msk [vmem:[#allocation2 + $0x40] sm:$0xff] %vm113_vm0, %v579_v8  ;;  %v580_v19 = vmax.f32 %v548_v9, 0.0  ;;  %v7362_v21 = vpop.f32.mrb[12].mxu0  ;;  %v1134_v24 = vmax.f32 %v1131_v17, %v1133_v18  ;;  %v1126_v25 = vld [vmem:[#allocation2 + $0x20] ss:$2 sm:$0xff]  ;;  %v1060_v29 = vmax.f32 %v1028_v14, 0.0  ;;  %v1029_v30 = vadd.f32 %v8945_v42, %v990_v15 }
 0x14a   :  { %v1128_v26 = vld [vmem:[#allocation2 + $0x21] ss:$2 sm:$0xff]  ;;  %614 = vst.msk [vmem:[#allocation2 + $0x58] sm:$0xff] %vm113_vm0, %v582_v13  ;;  %v514_v27 = vmul.f32 %v7362_v21, %v8940_v40  ;;  %v414_v28 = vpop.f32.mrb[13].mxu0  ;;  %v1058_v34 = vmax.f32 %v1026_v22, 0.0  ;;  %v1027_v35 = vadd.f32 %v8945_v42, %v988_v23  ;;  %1220 = vst.msk [vmem:[#allocation3 + $0x6f] sm:$0xff] %vm113_vm0, %v1219_v20 }
 0x14b   :  { %v1129_v31 = vmax.f32 %v1126_v25, %v1128_v26  ;;  %612 = vst.msk [vmem:[#allocation2 + $0x48] sm:$0xff] %vm113_vm0, %v580_v19  ;;  %v512_v32 = vmul.f32 %v8940_v40, %v414_v28  ;;  %v7363_v33 = vpop.f32.mrb[14].mxu0  ;;  %1092 = vst.msk [vmem:[#allocation2 + $0x150] sm:$0xff] %vm113_vm0, %v1060_v29  ;;  %v1061_v41 = vmax.f32 %v1029_v30, 0.0  ;;  %v7398_v50 = vpop.f32.mrb[12].mxu1 }
 0x14c   :  { %v553_v36 = vadd.f32 %v8945_v42, %v514_v27  ;;  %v515_v37 = vmul.f32 %v7363_v33, %v8940_v40  ;;  %v417_v38 = vpop.f32.mrb[15].mxu0  ;;  %v1227_v46 = vld [vmem:[#allocation2 + $0x130] ss:$2 sm:$0xff]  ;;  %v1229_v47 = vld [vmem:[#allocation2 + $0x131] ss:$2 sm:$0xff]  ;;  %1090 = vst.msk [vmem:[#allocation2 + $0x140] sm:$0xff] %vm113_vm0, %v1058_v34  ;;  %v993_v57 = vmul.f32 %v7398_v50, %v8940_v40 }
 0x14d   :  { %v1135_v44 = vmax.f32 %v1129_v31, %v1134_v24  ;;  %v551_v45 = vadd.f32 %v8945_v42, %v512_v32  ;;  %v513_v48 = vmul.f32 %v8940_v40, %v417_v38  ;;  %v1059_v49 = vmax.f32 %v1027_v35, 0.0  ;;  %v1222_v54 = vld [vmem:[#allocation2 + $0x120] ss:$2 sm:$0xff]  ;;  %v1224_v55 = vld [vmem:[#allocation2 + $0x121] ss:$2 sm:$0xff]  ;;  %1093 = vst.msk [vmem:[#allocation2 + $0x158] sm:$0xff] %vm113_vm0, %v1061_v41 }
 0x14e   :  { %v585_v51 = vmax.f32 %v553_v36, 0.0  ;;  %v554_v52 = vadd.f32 %v8945_v42, %v515_v37  ;;  %v1230_v53 = vmax.f32 %v1227_v46, %v1229_v47  ;;  %v1345_v56 = vld [vmem:[#allocation3 + $0x9] sm:$0xff]  ;;  %v1225_v60 = vmax.f32 %v1222_v54, %v1224_v55  ;;  %v893_v62 = vpop.f32.mrb[13].mxu1 }
 0x14f   :  { %v583_v58 = vmax.f32 %v551_v45, 0.0  ;;  %v552_v59 = vadd.f32 %v8945_v42, %v513_v48  ;;  %1091 = vst.msk [vmem:[#allocation2 + $0x148] sm:$0xff] %vm113_vm0, %v1059_v49  ;;  %v1367_v61 = vpack.c.bf16 %v1345_v56, %v1344_v43  ;;  %1136 = vst.msk [vmem:[#allocation3 + $0x15] sm:$0xff] %vm113_vm0, %v1135_v44  ;;  %v1032_v0 = vadd.f32 %v8945_v42, %v993_v57  ;;  %v7399_v2 = vpop.f32.mrb[14].mxu1 }
 0x150   :  { %617 = vst.msk [vmem:[#allocation2 + $0x70] sm:$0xff] %vm113_vm0, %v585_v51  ;;  %v586_v63 = vmax.f32 %v554_v52, 0.0  ;;  %v991_v1 = vmul.f32 %v8940_v40, %v893_v62  ;;  %v1231_v6 = vmax.f32 %v1225_v60, %v1230_v53  ;;  %v7366_v7 = vpop.f32.mrb[16].mxu0  ;;  %v994_v8 = vmul.f32 %v7399_v2, %v8940_v40  ;;  %v896_v20 = vpop.f32.mrb[15].mxu1 }
 0x151   :  { %v1143_v3 = vld [vmem:[#allocation2 + $0x50] ss:$2 sm:$0xff]  ;;  %v1145_v4 = vld [vmem:[#allocation2 + $0x51] ss:$2 sm:$0xff]  ;;  %615 = vst.msk [vmem:[#allocation2 + $0x60] sm:$0xff] %vm113_vm0, %v583_v58  ;;  %v584_v5 = vmax.f32 %v552_v59, 0.0  ;;  %7420 = vmatprep.mubr.msk.bf16.mxu0 %vm113_vm0, %v1367_v61  ;;  %v518_v12 = vmul.f32 %v7366_v7, %v8940_v40  ;;  %v992_v25 = vmul.f32 %v8940_v40, %v896_v20 }
 0x152   :  { %v1146_v9 = vmax.f32 %v1143_v3, %v1145_v4  ;;  %v1138_v10 = vld [vmem:[#allocation2 + $0x40] ss:$2 sm:$0xff]  ;;  %v1140_v11 = vld [vmem:[#allocation2 + $0x41] ss:$2 sm:$0xff]  ;;  %618 = vst.msk [vmem:[#allocation2 + $0x78] sm:$0xff] %vm113_vm0, %v586_v63  ;;  %v430_v13 = vpop.f32.mrb[17].mxu0  ;;  %v1030_v15 = vadd.f32 %v8945_v42, %v991_v1  ;;  %v1033_v19 = vadd.f32 %v8945_v42, %v994_v8 }
 0x153   :  { %v1064_v14 = vmax.f32 %v1032_v0, 0.0  ;;  %v1141_v16 = vmax.f32 %v1138_v10, %v1140_v11  ;;  %616 = vst.msk [vmem:[#allocation2 + $0x68] sm:$0xff] %vm113_vm0, %v584_v5  ;;  %v516_v17 = vmul.f32 %v8940_v40, %v430_v13  ;;  %1232 = vst.msk [vmem:[#allocation3 + $0x79] sm:$0xff] %vm113_vm0, %v1231_v6  ;;  %v7367_v18 = vpop.f32.mrb[18].mxu0  ;;  %v557_v21 = vadd.f32 %v8945_v42, %v518_v12  ;;  %v7402_v32 = vpop.f32.mrb[16].mxu1 }
 0x154   :  { %v519_v22 = vmul.f32 %v7367_v18, %v8940_v40  ;;  %v433_v23 = vpop.f32.mrb[19].mxu0  ;;  %v1062_v24 = vmax.f32 %v1030_v15, 0.0  ;;  %v1239_v27 = vld [vmem:[#allocation2 + $0x150] ss:$2 sm:$0xff]  ;;  %v1241_v28 = vld [vmem:[#allocation2 + $0x151] ss:$2 sm:$0xff]  ;;  %v1031_v38 = vadd.f32 %v8945_v42, %v992_v25  ;;  %v997_v46 = vmul.f32 %v7402_v32, %v8940_v40 }
 0x155   :  { %1096 = vst.msk [vmem:[#allocation2 + $0x170] sm:$0xff] %vm113_vm0, %v1064_v14  ;;  %v1147_v26 = vmax.f32 %v1141_v16, %v1146_v9  ;;  %v555_v29 = vadd.f32 %v8945_v42, %v516_v17  ;;  %v517_v30 = vmul.f32 %v8940_v40, %v433_v23  ;;  %v1065_v31 = vmax.f32 %v1033_v19, 0.0  ;;  %v909_v41 = vpop.f32.mrb[17].mxu1 }
 0x156   :  { %v1242_v33 = vmax.f32 %v1239_v27, %v1241_v28  ;;  %v1234_v34 = vld [vmem:[#allocation2 + $0x140] ss:$2 sm:$0xff]  ;;  %v1236_v35 = vld [vmem:[#allocation2 + $0x141] ss:$2 sm:$0xff]  ;;  %v589_v36 = vmax.f32 %v557_v21, 0.0  ;;  %v558_v37 = vadd.f32 %v8945_v42, %v519_v22  ;;  %1094 = vst.msk [vmem:[#allocation2 + $0x160] sm:$0xff] %vm113_vm0, %v1062_v24  ;;  %v995_v50 = vmul.f32 %v8940_v40, %v909_v41 }
 0x157   :  { %v1237_v43 = vmax.f32 %v1234_v34, %v1236_v35  ;;  %v587_v44 = vmax.f32 %v555_v29, 0.0  ;;  %1148 = vst.msk [vmem:[#allocation3 + $0x1f] sm:$0xff] %vm113_vm0, %v1147_v26  ;;  %v556_v45 = vadd.f32 %v8945_v42, %v517_v30  ;;  %1097 = vst.msk [vmem:[#allocation2 + $0x178] sm:$0xff] %vm113_vm0, %v1065_v31  ;;  %v7403_v47 = vpop.f32.mrb[18].mxu1  ;;  %v1063_v49 = vmax.f32 %v1031_v38, 0.0  ;;  %v1346_v17 = vld [vmem:[#allocation3 + $0x11] sm:$0xff] }
 0x158   :  { %621 = vst.msk [vmem:[#allocation2 + $0x90] sm:$0xff] %vm113_vm0, %v589_v36  ;;  %v590_v48 = vmax.f32 %v558_v37, 0.0  ;;  %v998_v51 = vmul.f32 %v7403_v47, %v8940_v40  ;;  %v912_v52 = vpop.f32.mrb[19].mxu1  ;;  %v7370_v57 = vpop.f32.mrb[20].mxu0  ;;  %v1036_v58 = vadd.f32 %v8945_v42, %v997_v46  ;;  %v1034_v1 = vadd.f32 %v8945_v42, %v995_v50  ;;  %v8150_v29 = vld [vmem:[#allocation9 + $0x8] sm:$0xff]  }
 0x159   :  { %v1155_v53 = vld [vmem:[#allocation2 + $0x70] ss:$2 sm:$0xff]  ;;  %v1157_v54 = vld [vmem:[#allocation2 + $0x71] ss:$2 sm:$0xff]  ;;  %v1243_v55 = vmax.f32 %v1237_v43, %v1242_v33  ;;  %619 = vst.msk [vmem:[#allocation2 + $0x80] sm:$0xff] %vm113_vm0, %v587_v44  ;;  %v588_v56 = vmax.f32 %v556_v45, 0.0  ;;  %v996_v59 = vmul.f32 %v8940_v40, %v912_v52  ;;  %v522_v63 = vmul.f32 %v7370_v57, %v8940_v40 }
 0x15a   :  { %v1158_v60 = vmax.f32 %v1155_v53, %v1157_v54  ;;  %v1150_v61 = vld [vmem:[#allocation2 + $0x60] ss:$2 sm:$0xff]  ;;  %v1152_v62 = vld [vmem:[#allocation2 + $0x61] ss:$2 sm:$0xff]  ;;  %622 = vst.msk [vmem:[#allocation2 + $0x98] sm:$0xff] %vm113_vm0, %v590_v48  ;;  %1095 = vst.msk [vmem:[#allocation2 + $0x168] sm:$0xff] %vm113_vm0, %v1063_v49  ;;  %v1037_v2 = vadd.f32 %v8945_v42, %v998_v51 }
 0x15b   :  { %v446_v0 = vpop.f32.mrb[21].mxu0  ;;  %v1153_v3 = vmax.f32 %v1150_v61, %v1152_v62  ;;  %1244 = vst.msk [vmem:[#allocation3 + $0x83] sm:$0xff] %vm113_vm0, %v1243_v55  ;;  %620 = vst.msk [vmem:[#allocation2 + $0x88] sm:$0xff] %vm113_vm0, %v588_v56  ;;  %v1068_v6 = vmax.f32 %v1036_v58, 0.0  ;;  %v1035_v7 = vadd.f32 %v8945_v42, %v996_v59  ;;  %v561_v8 = vadd.f32 %v8945_v42, %v522_v63  ;;  %v7406_v18 = vpop.f32.mrb[20].mxu1  ;;  %v9093_v53 = vld [vmem:[#allocation9 + $0x20] sm:$0xff]  }
 0x15c   :  { %v520_v4 = vmul.f32 %v8940_v40, %v446_v0  ;;  %v7371_v5 = vpop.f32.mrb[22].mxu0  ;;  %v1066_v11 = vmax.f32 %v1034_v1, 0.0  ;;  %v1069_v12 = vmax.f32 %v1037_v2, 0.0  ;;  %v1001_v24 = vmul.f32 %v7406_v18, %v8940_v40  ;;  %v925_v28 = vpop.f32.mrb[21].mxu1 }
 0x15d   :  { %v523_v9 = vmul.f32 %v7371_v5, %v8940_v40  ;;  %v449_v10 = vpop.f32.mrb[23].mxu0  ;;  %v1159_v13 = vmax.f32 %v1153_v3, %v1158_v60  ;;  %1100 = vst.msk [vmem:[#allocation2 + $0x190] sm:$0xff] %vm113_vm0, %v1068_v6  ;;  %v1067_v16 = vmax.f32 %v1035_v7, 0.0  ;;  %v593_v21 = vmax.f32 %v561_v8, 0.0  ;;  %v7407_v33 = vpop.f32.mrb[22].mxu1 }
 0x15e   :  { %v559_v14 = vadd.f32 %v8945_v42, %v520_v4  ;;  %v521_v15 = vmul.f32 %v8940_v40, %v449_v10  ;;  %v1251_v19 = vld [vmem:[#allocation2 + $0x170] ss:$2 sm:$0xff]  ;;  %v1253_v20 = vld [vmem:[#allocation2 + $0x171] ss:$2 sm:$0xff]  ;;  %1098 = vst.msk [vmem:[#allocation2 + $0x180] sm:$0xff] %vm113_vm0, %v1066_v11  ;;  %1101 = vst.msk [vmem:[#allocation2 + $0x198] sm:$0xff] %vm113_vm0, %v1069_v12  ;;  %v1040_v31 = vadd.f32 %v8945_v42, %v1001_v24 }
 0x15f   :  { %v562_v22 = vadd.f32 %v8945_v42, %v523_v9  ;;  %v1347_v23 = vld [vmem:[#allocation3 + $0x19] sm:$0xff]  ;;  %1160 = vst.msk [vmem:[#allocation3 + $0x29] sm:$0xff] %vm113_vm0, %v1159_v13  ;;  %1099 = vst.msk [vmem:[#allocation2 + $0x188] sm:$0xff] %vm113_vm0, %v1067_v16  ;;  %v999_v32 = vmul.f32 %v8940_v40, %v925_v28  ;;  %v1254_v36 = vmax.f32 %v1251_v19, %v1253_v20  ;;  %v928_v52 = vpop.f32.mrb[23].mxu1  ;;  %v1348_v12 = vld [vmem:[#allocation3 + $0x21] sm:$0xff] }
 0x160   :  { %v591_v25 = vmax.f32 %v559_v14, 0.0  ;;  %v560_v26 = vadd.f32 %v8945_v42, %v521_v15  ;;  %v1368_v27 = vpack.c.bf16 %v1347_v23, %v1346_v17  ;;  %625 = vst.msk [vmem:[#allocation2 + $0xb0] sm:$0xff] %vm113_vm0, %v593_v21  ;;  %v1002_v38 = vmul.f32 %v7407_v33, %v8940_v40  ;;  %v7374_v50 = vpop.f32.mrb[24].mxu0 }
 0x161   :  { %v594_v30 = vmax.f32 %v562_v22, 0.0  ;;  %v1167_v34 = vld [vmem:[#allocation2 + $0x90] ss:$2 sm:$0xff]  ;;  %v1169_v35 = vld [vmem:[#allocation2 + $0x91] ss:$2 sm:$0xff]  ;;  %v1038_v46 = vadd.f32 %v8945_v42, %v999_v32  ;;  %v1072_v51 = vmax.f32 %v1040_v31, 0.0  ;;  %v526_v54 = vmul.f32 %v7374_v50, %v8940_v40 }
 0x162   :  { %v1246_v37 = vld [vmem:[#allocation2 + $0x160] ss:$2 sm:$0xff]  ;;  %623 = vst.msk [vmem:[#allocation2 + $0xa0] sm:$0xff] %vm113_vm0, %v591_v25  ;;  %7421 = vmatmul.mubr.msk.bf16.vlgmr.msra.gmra.mrb[32].mxu0 %vm113_vm0, %v1368_v27  ;;  %v1170_v41 = vmax.f32 %v1167_v34, %v1169_v35  ;;  %v1164_v44 = vld [vmem:[#allocation2 + $0x81] ss:$2 sm:$0xff]  ;;  %v592_v49 = vmax.f32 %v560_v26, 0.0  ;;  %v1041_v57 = vadd.f32 %v8945_v42, %v1002_v38  ;;  %v1000_v58 = vmul.f32 %v8940_v40, %v928_v52 }
 0x163   :  { %v1162_v43 = vld [vmem:[#allocation2 + $0x80] ss:$2 sm:$0xff]  ;;  %v1248_v45 = vld [vmem:[#allocation2 + $0x161] ss:$2 sm:$0xff]  ;;  %626 = vst.msk [vmem:[#allocation2 + $0xb8] sm:$0xff] %vm113_vm0, %v594_v30  ;;  %7445 = vmatpush3.bf16.msra.mxu0 %v8934_v39  ;;  %v462_v55 = vpop.f32.mrb[25].mxu0  ;;  %v565_v4 = vadd.f32 %v8945_v42, %v526_v54 }
 0x164   :  { %v1165_v47 = vmax.f32 %v1162_v43, %v1164_v44  ;;  %v1249_v48 = vmax.f32 %v1246_v37, %v1248_v45  ;;  %7446 = vmatprep.subr.bf16.mxu0 %v8150_v29  ;;  %v1070_v56 = vmax.f32 %v1038_v46, 0.0  ;;  %624 = vst.msk [vmem:[#allocation2 + $0xa8] sm:$0xff] %vm113_vm0, %v592_v49  ;;  %v524_v62 = vmul.f32 %v8940_v40, %v462_v55  ;;  %v7375_v63 = vpop.f32.mrb[26].mxu0  ;;  %v7410_v0 = vpop.f32.mrb[24].mxu1 }
 0x165   :  { %v1263_v39 = vld [vmem:[#allocation2 + $0x190] ss:$2 sm:$0xff]  ;;  %v1265_v61 = vld [vmem:[#allocation2 + $0x191] ss:$2 sm:$0xff]  ;;  %1104 = vst.msk [vmem:[#allocation2 + $0x1b0] sm:$0xff] %vm113_vm0, %v1072_v51  ;;  %v527_v5 = vmul.f32 %v7375_v63, %v8940_v40  ;;  %v465_v6 = vpop.f32.mrb[27].mxu0  ;;  %v1039_v11 = vadd.f32 %v8945_v42, %v1000_v58  ;;  %v1005_v18 = vmul.f32 %v7410_v0, %v8940_v40 }
 0x166   :  { %v1171_v59 = vmax.f32 %v1165_v47, %v1170_v41  ;;  %v1255_v60 = vmax.f32 %v1249_v48, %v1254_v36  ;;  %v1266_v1 = vmax.f32 %v1263_v39, %v1265_v61  ;;  %v1258_v2 = vld [vmem:[#allocation2 + $0x180] ss:$2 sm:$0xff]  ;;  %v1260_v3 = vld [vmem:[#allocation2 + $0x181] ss:$2 sm:$0xff]  ;;  %1102 = vst.msk [vmem:[#allocation2 + $0x1a0] sm:$0xff] %vm113_vm0, %v1070_v56  ;;  %v1073_v7 = vmax.f32 %v1041_v57, 0.0 }
 0x167   :  { %7447 = vmatpush3.bf16.msra.mxu0 %v8150_v29  ;;  %v1261_v8 = vmax.f32 %v1258_v2, %v1260_v3  ;;  %v563_v9 = vadd.f32 %v8945_v42, %v524_v62  ;;  %v525_v10 = vmul.f32 %v8940_v40, %v465_v6  ;;  %v1349_v13 = vld [vmem:[#allocation3 + $0x29] sm:$0xff]  ;;  %v941_v14 = vpop.f32.mrb[25].mxu1  ;;  %v597_v15 = vmax.f32 %v565_v4, 0.0 }
 0x168   :  { %1172 = vst.msk [vmem:[#allocation3 + $0x33] sm:$0xff] %vm113_vm0, %v1171_v59  ;;  %1256 = vst.msk [vmem:[#allocation3 + $0x8d] sm:$0xff] %vm113_vm0, %v1255_v60  ;;  %7472 = vmatprep.subr.bf16.mxu0 %v9093_v53  ;;  %v566_v16 = vadd.f32 %v8945_v42, %v527_v5  ;;  %v1369_v17 = vpack.c.bf16 %v1349_v13, %v1348_v12  ;;  %v7411_v19 = vpop.f32.mrb[26].mxu1  ;;  %v1071_v25 = vmax.f32 %v1039_v11, 0.0  ;;  %v7378_v28 = vpop.f32.mrb[28].mxu0 }
 0x169   :  { %1105 = vst.msk [vmem:[#allocation2 + $0x1b8] sm:$0xff] %vm113_vm0, %v1073_v7  ;;  %v1267_v22 = vmax.f32 %v1261_v8, %v1266_v1  ;;  %v595_v23 = vmax.f32 %v563_v9, 0.0  ;;  %v564_v24 = vadd.f32 %v8945_v42, %v525_v10  ;;  %629 = vst.msk [vmem:[#allocation2 + $0xd0] sm:$0xff] %vm113_vm0, %v597_v15  ;;  %v1044_v29 = vadd.f32 %v8945_v42, %v1005_v18  ;;  %v944_v31 = vpop.f32.mrb[27].mxu1  ;;  %v478_v34 = vpop.f32.mrb[29].mxu0 }
 0x16a   :  { %v1179_v20 = vld [vmem:[#allocation2 + $0xb0] ss:$2 sm:$0xff]  ;;  %v1181_v21 = vld [vmem:[#allocation2 + $0xb1] ss:$2 sm:$0xff]  ;;  %v598_v27 = vmax.f32 %v566_v16, 0.0  ;;  %7424 = vmatprep.mubr.msk.bf16.mxu0 %vm113_vm0, %v1369_v17  ;;  %v1003_v30 = vmul.f32 %v8940_v40, %v941_v14  ;;  %1103 = vst.msk [vmem:[#allocation2 + $0x1a8] sm:$0xff] %vm113_vm0, %v1071_v25  ;;  %v530_v33 = vmul.f32 %v7378_v28, %v8940_v40  ;;  %v1006_v35 = vmul.f32 %v7411_v19, %v8940_v40 }
 0x16b   :  { %v1182_v26 = vmax.f32 %v1179_v20, %v1181_v21  ;;  %1268 = vst.msk [vmem:[#allocation3 + $0x97] sm:$0xff] %vm113_vm0, %v1267_v22  ;;  %627 = vst.msk [vmem:[#allocation2 + $0xc0] sm:$0xff] %vm113_vm0, %v595_v23  ;;  %v596_v32 = vmax.f32 %v564_v24, 0.0  ;;  %v1004_v36 = vmul.f32 %v8940_v40, %v944_v31  ;;  %v1174_v37 = vld [vmem:[#allocation2 + $0xa0] ss:$2 sm:$0xff]  ;;  %v528_v41 = vmul.f32 %v8940_v40, %v478_v34  ;;  %v7379_v43 = vpop.f32.mrb[30].mxu0 }
 0x16c   :  { %v1176_v38 = vld [vmem:[#allocation2 + $0xa1] ss:$2 sm:$0xff]  ;;  %630 = vst.msk [vmem:[#allocation2 + $0xd8] sm:$0xff] %vm113_vm0, %v598_v27  ;;  %v1076_v44 = vmax.f32 %v1044_v29, 0.0  ;;  %v1042_v45 = vadd.f32 %v8945_v42, %v1003_v30  ;;  %v569_v47 = vadd.f32 %v8945_v42, %v530_v33  ;;  %v531_v48 = vmul.f32 %v7379_v43, %v8940_v40  ;;  %v481_v49 = vpop.f32.mrb[31].mxu0  ;;  %v7414_v51 = vpop.f32.mrb[28].mxu1 }
 0x16d   :  { %v1177_v46 = vmax.f32 %v1174_v37, %v1176_v38  ;;  %628 = vst.msk [vmem:[#allocation2 + $0xc8] sm:$0xff] %vm113_vm0, %v596_v32  ;;  %v1045_v50 = vadd.f32 %v8945_v42, %v1006_v35  ;;  %v567_v52 = vadd.f32 %v8945_v42, %v528_v41  ;;  %v529_v54 = vmul.f32 %v8940_v40, %v481_v49  ;;  %v957_v57 = vpop.f32.mrb[29].mxu1 }
 0x16e   :  { %1108 = vst.msk [vmem:[#allocation2 + $0x1d0] sm:$0xff] %vm113_vm0, %v1076_v44  ;;  %v1074_v55 = vmax.f32 %v1042_v45, 0.0  ;;  %v1043_v56 = vadd.f32 %v8945_v42, %v1004_v36  ;;  %v601_v39 = vmax.f32 %v569_v47, 0.0  ;;  %v570_v61 = vadd.f32 %v8945_v42, %v531_v48  ;;  %v7415_v3 = vpop.f32.mrb[30].mxu1 }
 0x16f   :  { %v1183_v58 = vmax.f32 %v1177_v46, %v1182_v26  ;;  %v1077_v62 = vmax.f32 %v1045_v50, 0.0  ;;  %v599_v0 = vmax.f32 %v567_v52, 0.0  ;;  %v568_v1 = vadd.f32 %v8945_v42, %v529_v54  ;;  %v960_v8 = vpop.f32.mrb[31].mxu1  ;;  %v1350_v29 = vld [vmem:[#allocation3 + $0x31] sm:$0xff] }
 0x170   :  { %v1275_v59 = vld [vmem:[#allocation2 + $0x1b0] ss:$2 sm:$0xff]  ;;  %v1277_v60 = vld [vmem:[#allocation2 + $0x1b1] ss:$2 sm:$0xff]  ;;  %1106 = vst.msk [vmem:[#allocation2 + $0x1c0] sm:$0xff] %vm113_vm0, %v1074_v55  ;;  %v1075_v2 = vmax.f32 %v1043_v56, 0.0  ;;  %v1009_v5 = vmul.f32 %v7414_v51, %v8940_v40  ;;  %v1007_v6 = vmul.f32 %v8940_v40, %v957_v57  ;;  %v1010_v7 = vmul.f32 %v7415_v3, %v8940_v40 }
 0x171   :  { %v1278_v63 = vmax.f32 %v1275_v59, %v1277_v60  ;;  %1184 = vst.msk [vmem:[#allocation3 + $0x3d] sm:$0xff] %vm113_vm0, %v1183_v58  ;;  %633 = vst.msk [vmem:[#allocation2 + $0xf0] sm:$0xff] %vm113_vm0, %v601_v39  ;;  %v602_v4 = vmax.f32 %v570_v61, 0.0  ;;  %v1270_v9 = vld [vmem:[#allocation2 + $0x1a0] ss:$2 sm:$0xff]  ;;  %v600_v11 = vmax.f32 %v568_v1, 0.0  ;;  %v1008_v12 = vmul.f32 %v8940_v40, %v960_v8 }
 0x172   :  { %1109 = vst.msk [vmem:[#allocation2 + $0x1d8] sm:$0xff] %vm113_vm0, %v1077_v62  ;;  %v1272_v10 = vld [vmem:[#allocation2 + $0x1a1] ss:$2 sm:$0xff]  ;;  %631 = vst.msk [vmem:[#allocation2 + $0xe0] sm:$0xff] %vm113_vm0, %v599_v0  ;;  %v1048_v16 = vadd.f32 %v8945_v42, %v1009_v5  ;;  %v1046_v17 = vadd.f32 %v8945_v42, %v1007_v6  ;;  %v1049_v18 = vadd.f32 %v8945_v42, %v1010_v7  ;;  %v1355_v59 = vld [vmem:[#allocation3 + $0x59] sm:$0xff] }
 0x173   :  { %1107 = vst.msk [vmem:[#allocation2 + $0x1c8] sm:$0xff] %vm113_vm0, %v1075_v2  ;;  %v1191_v13 = vld [vmem:[#allocation2 + $0xd0] ss:$2 sm:$0xff]  ;;  %v1193_v14 = vld [vmem:[#allocation2 + $0xd1] ss:$2 sm:$0xff]  ;;  %v1273_v15 = vmax.f32 %v1270_v9, %v1272_v10  ;;  %634 = vst.msk [vmem:[#allocation2 + $0xf8] sm:$0xff] %vm113_vm0, %v602_v4  ;;  %v1047_v22 = vadd.f32 %v8945_v42, %v1008_v12 }
 0x174   :  { %v1194_v19 = vmax.f32 %v1191_v13, %v1193_v14  ;;  %v1186_v20 = vld [vmem:[#allocation2 + $0xc0] ss:$2 sm:$0xff]  ;;  %v1188_v21 = vld [vmem:[#allocation2 + $0xc1] ss:$2 sm:$0xff]  ;;  %632 = vst.msk [vmem:[#allocation2 + $0xe8] sm:$0xff] %vm113_vm0, %v600_v11  ;;  %v1080_v24 = vmax.f32 %v1048_v16, 0.0 }
 0x175   :  { %v1189_v23 = vmax.f32 %v1186_v20, %v1188_v21  ;;  %v1279_v40 = vmax.f32 %v1273_v15, %v1278_v63  ;;  %v1078_v25 = vmax.f32 %v1046_v17, 0.0  ;;  %v1081_v26 = vmax.f32 %v1049_v18, 0.0  ;;  %v1356_v60 = vld [vmem:[#allocation3 + $0x61] sm:$0xff]  ;;  %v1357_v39 = vld [vmem:[#allocation3 + $0x69] sm:$0xff]  ;;  %v1358_v0 = vld [vmem:[#allocation3 + $0x71] sm:$0xff] }
 0x176   :  { %v1079_v27 = vmax.f32 %v1047_v22, 0.0  ;;  %1112 = vst.msk [vmem:[#allocation2 + $0x1f0] sm:$0xff] %vm113_vm0, %v1080_v24  ;;  %v1373_v63 = vpack.c.bf16 %v1357_v39, %v1356_v60  ;;  %v1359_v1 = vld [vmem:[#allocation3 + $0x79] sm:$0xff]  ;;  %v1360_v2 = vld [vmem:[#allocation3 + $0x81] sm:$0xff]  ;;  %v1361_v3 = vld [vmem:[#allocation3 + $0x89] sm:$0xff] }
 0x177   :  { %v1195_v28 = vmax.f32 %v1189_v23, %v1194_v19  ;;  %1280 = vst.msk [vmem:[#allocation3 + $0xa1] sm:$0xff] %vm113_vm0, %v1279_v40  ;;  %1110 = vst.msk [vmem:[#allocation2 + $0x1e0] sm:$0xff] %vm113_vm0, %v1078_v25  ;;  %v1374_v4 = vpack.c.bf16 %v1359_v1, %v1358_v0  ;;  %v1375_v5 = vpack.c.bf16 %v1361_v3, %v1360_v2  ;;  %v1362_v6 = vld [vmem:[#allocation3 + $0x91] sm:$0xff]  ;;  %v1363_v7 = vld [vmem:[#allocation3 + $0x99] sm:$0xff] }
 0x178   :  { %1113 = vst.msk [vmem:[#allocation2 + $0x1f8] sm:$0xff] %vm113_vm0, %v1081_v26  ;;  %1111 = vst.msk [vmem:[#allocation2 + $0x1e8] sm:$0xff] %vm113_vm0, %v1079_v27  ;;  %v1351_v42 = vld [vmem:[#allocation3 + $0x39] sm:$0xff]  ;;  %v1376_v10 = vpack.c.bf16 %v1363_v7, %v1362_v6  ;;  %v1306_v14 = vld [vmem:[#allocation3 + $0x8] sm:$0xff] }
 0x179   :  { %v1287_v30 = vld [vmem:[#allocation2 + $0x1d0] ss:$2 sm:$0xff]  ;;  %v1289_v31 = vld [vmem:[#allocation2 + $0x1d1] ss:$2 sm:$0xff]  ;;  %1196 = vst.msk [vmem:[#allocation3 + $0x47] sm:$0xff] %vm113_vm0, %v1195_v28  ;;  %v1370_v35 = vpack.c.bf16 %v1351_v42, %v1350_v29  ;;  %v1305_v13 = vld [vmem:[#allocation3] sm:$0xff] }
 0x17a   :  { %v1290_v32 = vmax.f32 %v1287_v30, %v1289_v31  ;;  %v1282_v33 = vld [vmem:[#allocation2 + $0x1c0] ss:$2 sm:$0xff]  ;;  %v1284_v34 = vld [vmem:[#allocation2 + $0x1c1] ss:$2 sm:$0xff]  ;;  %v1203_v36 = vld [vmem:[#allocation2 + $0xf0] ss:$2 sm:$0xff]  ;;  %v1328_v16 = vpack.c.bf16 %v1306_v14, %v1305_v13 }
 0x17b   :  { %v1205_v37 = vld [vmem:[#allocation2 + $0xf1] ss:$2 sm:$0xff]  ;;  %v1285_v38 = vmax.f32 %v1282_v33, %v1284_v34  ;;  %v1198_v43 = vld [vmem:[#allocation2 + $0xe0] ss:$2 sm:$0xff]  ;;  %v1200_v44 = vld [vmem:[#allocation2 + $0xe1] ss:$2 sm:$0xff]  ;;  %7425 = vmatmul.mubr.msk.bf16.gmra.mrb[36].mxu0 %vm113_vm0, %v1370_v35 }
 0x17c   :  { %v1206_v41 = vmax.f32 %v1203_v36, %v1205_v37  ;;  %v1201_v45 = vmax.f32 %v1198_v43, %v1200_v44  ;;  %v1308_v17 = vld [vmem:[#allocation3 + $0x18] sm:$0xff]  ;;  %v1310_v18 = vld [vmem:[#allocation3 + $0x28] sm:$0xff]  ;;  %v1307_v19 = vld [vmem:[#allocation3 + $0x10] sm:$0xff] }
 0x17d   :  { %v1291_v46 = vmax.f32 %v1285_v38, %v1290_v32  ;;  %v1329_v20 = vpack.c.bf16 %v1308_v17, %v1307_v19  ;;  %v1309_v21 = vld [vmem:[#allocation3 + $0x20] sm:$0xff]  ;;  %v8153_v40 = vld [vmem:[#allocation9 + $0x30] sm:$0xff]   ;;  %v1312_v24 = vld [vmem:[#allocation3 + $0x38] sm:$0xff] }
 0x17e   :  { %v1207_v47 = vmax.f32 %v1201_v45, %v1206_v41  ;;  %v1364_v8 = vld [vmem:[#allocation3 + $0xa1] sm:$0xff]  ;;  %v1330_v23 = vpack.c.bf16 %v1310_v18, %v1309_v21  ;;  %v1311_v27 = vld [vmem:[#allocation3 + $0x30] sm:$0xff]  ;;  %v1320_v35 = vld [vmem:[#allocation3 + $0x78] sm:$0xff] }
 0x17f   :  { %1292 = vst.msk [vmem:[#allocation3 + $0xab] sm:$0xff] %vm113_vm0, %v1291_v46  ;;  %v1299_v48 = vld [vmem:[#allocation2 + $0x1f0] ss:$2 sm:$0xff]  ;;  %v1301_v49 = vld [vmem:[#allocation2 + $0x1f1] ss:$2 sm:$0xff]  ;;  %v8152_v22 = vld [vmem:[#allocation9 + $0x28] sm:$0xff]   ;;  %v1331_v28 = vpack.c.bf16 %v1312_v24, %v1311_v27 }
 0x180   :  { %v1294_v50 = vld [vmem:[#allocation2 + $0x1e0] ss:$2 sm:$0xff]  ;;  %1208 = vst.msk [vmem:[#allocation3 + $0x51] sm:$0xff] %vm113_vm0, %v1207_v47  ;;  %v1302_v51 = vmax.f32 %v1299_v48, %v1301_v49  ;;  %v1296_v52 = vld [vmem:[#allocation2 + $0x1e1] ss:$2 sm:$0xff]  ;;  %v1319_v34 = vld [vmem:[#allocation3 + $0x70] sm:$0xff] }
 0x181   :  { %v1352_v54 = vld [vmem:[#allocation3 + $0x41] sm:$0xff]  ;;  %v1353_v55 = vld [vmem:[#allocation3 + $0x49] sm:$0xff]  ;;  %v1297_v56 = vmax.f32 %v1294_v50, %v1296_v52  ;;  %v1335_v38 = vpack.c.bf16 %v1320_v35, %v1319_v34  ;;  %v1324_v44 = vld [vmem:[#allocation3 + $0x98] sm:$0xff] }
 0x182   :  { %v1371_v57 = vpack.c.bf16 %v1353_v55, %v1352_v54  ;;  %v1313_v25 = vld [vmem:[#allocation3 + $0x40] sm:$0xff]  ;;  %v1314_v26 = vld [vmem:[#allocation3 + $0x48] sm:$0xff]  ;;  %v1323_v43 = vld [vmem:[#allocation3 + $0x90] sm:$0xff] }
 0x183   :  { %v1303_v58 = vmax.f32 %v1297_v56, %v1302_v51  ;;  %v1332_v29 = vpack.c.bf16 %v1314_v26, %v1313_v25  ;;  %v1317_v42 = vld [vmem:[#allocation3 + $0x60] sm:$0xff]  ;;  %v1322_v37 = vld [vmem:[#allocation3 + $0x88] sm:$0xff]  ;;  %v1337_v47 = vpack.c.bf16 %v1324_v44, %v1323_v43  ;;  %v8154_v60 = vld [vmem:[#allocation9 + $0x38] sm:$0xff]  }
 0x184   :  { %7428 = vmatprep.mubr.msk.bf16.mxu0 %vm113_vm0, %v1371_v57  ;;  %v1321_v36 = vld [vmem:[#allocation3 + $0x80] sm:$0xff]  ;;  %v1737_v51 = vld [vmem:[#allocation3 + $0xa] sm:$0xff]  ;;  %v1742_v0 = vld [vmem:[#allocation3 + $0x32] sm:$0xff] }
 0x185   :  { %1304 = vst.msk [vmem:[#allocation3 + $0xb5] sm:$0xff] %vm113_vm0, %v1303_v58  ;;  %v1336_v41 = vpack.c.bf16 %v1322_v37, %v1321_v36  ;;  %v1325_v45 = vld [vmem:[#allocation3 + $0xa0] sm:$0xff]  ;;  %v1741_v57 = vld [vmem:[#allocation3 + $0x2a] sm:$0xff]  ;;  %v1738_v58 = vld [vmem:[#allocation3 + $0x12] sm:$0xff] }
 0x186   :  { %v1365_v9 = vld [vmem:[#allocation3 + $0xa9] sm:$0xff]  ;;  %v1366_v12 = vld [vmem:[#allocation3 + $0xb1] sm:$0xf]  ;;  %v1739_v55 = vld [vmem:[#allocation3 + $0x1a] sm:$0xff]  ;;  %v2000_v26 = vpack.c.bf16 %v1742_v0, %v1741_v57 }
 0x187   :  { %v1354_v61 = vld [vmem:[#allocation3 + $0x51] sm:$0xff]  ;;  %v1377_v11 = vpack.c.bf16 %v1365_v9, %v1364_v8  ;;  %v1378_v15 = vpack.c.bf16 %v1366_v12, %v1366_v12  ;;  %v1326_v46 = vld [vmem:[#allocation3 + $0xa8] sm:$0xff]  ;;  %v8156_v25 = vld [vmem:[#allocation9 + $0x48] sm:$0xff]  }
 0x188   :  { %v1372_v62 = vpack.c.bf16 %v1355_v59, %v1354_v61  ;;  %v1315_v30 = vld [vmem:[#allocation3 + $0x50] sm:$0xff]  ;;  %v1316_v31 = vld [vmem:[#allocation3 + $0x58] sm:$0xff]  ;;  %v1338_v48 = vpack.c.bf16 %v1326_v46, %v1325_v45  ;;  %v1736_v50 = vld [vmem:[#allocation3 + $0x2] sm:$0xff]  ;;  %v1760_v59 = vpack.c.bf16 %v1739_v55, %v1738_v58 }
 0x189   :  { %v1333_v32 = vpack.c.bf16 %v1316_v31, %v1315_v30  ;;  %v1327_v49 = vld [vmem:[#allocation3 + $0xb0] sm:$0xf]  ;;  %v1759_v54 = vpack.c.bf16 %v1737_v51, %v1736_v50  ;;  %v1740_v56 = vld [vmem:[#allocation3 + $0x22] sm:$0xff]  ;;  %v8155_v61 = vld [vmem:[#allocation9 + $0x40] sm:$0xff]  }
 0x18a   :  { %7429 = vmatmul.mubr.msk.bf16.gmra.mrb[40].mxu0 %vm113_vm0, %v1372_v62  ;;  %v1339_v52 = vpack.c.bf16 %v1327_v49, %v1327_v49  ;;  %v1761_v39 = vpack.c.bf16 %v1741_v57, %v1740_v56  ;;  %v1743_v62 = vld [vmem:[#allocation3 + $0x3a] sm:$0xff]  ;;  %v1744_v2 = vld [vmem:[#allocation3 + $0x42] sm:$0xff]  ;;  %v1749_v7 = vld [vmem:[#allocation3 + $0x6a] sm:$0xff]  ;;  %v1999_v24 = vpack.c.bf16 %v1740_v56, %v1739_v55 }
 0x18b   :  { %7432 = vmatprep.mubr.msk.bf16.mxu0 %vm113_vm0, %v1373_v63  ;;  %v1745_v63 = vld [vmem:[#allocation3 + $0x4a] sm:$0xff]  ;;  %v1762_v1 = vpack.c.bf16 %v1743_v62, %v1742_v0  ;;  %v1748_v6 = vld [vmem:[#allocation3 + $0x62] sm:$0xff]  ;;  %v1754_v18 = vld [vmem:[#allocation3 + $0x92] sm:$0xff] }
 0x18c   :  { %v1763_v3 = vpack.c.bf16 %v1745_v63, %v1744_v2  ;;  %v1765_v9 = vpack.c.bf16 %v1749_v7, %v1748_v6  ;;  %v1753_v12 = vld [vmem:[#allocation3 + $0x8a] sm:$0xff]  ;;  %v1752_v14 = vld [vmem:[#allocation3 + $0x82] sm:$0xff]  ;;  %v1997_v35 = vld [vmem:[#allocation3 + $0xba] sm:$0xf] }
 0x18d   :  { %v1757_v17 = vld [vmem:[#allocation3 + $0xaa] sm:$0xff]  ;;  %v2215_v36 = vld [vmem:[#allocation3 + $0x13] sm:$0xff]  ;;  %v2009_v37 = vpack.c.bf16 %v1997_v35, %v1997_v35  ;;  %v2216_v45 = vld [vmem:[#allocation3 + $0x1b] sm:$0xff] }
 0x18e   :  { %v8157_v27 = vld [vmem:[#allocation9 + $0x50] sm:$0xff]   ;;  %v2219_v44 = vld [vmem:[#allocation3 + $0x33] sm:$0xff]  ;;  %v2220_v55 = vld [vmem:[#allocation3 + $0x3b] sm:$0xff] }
 0x18f   :  { %v2217_v43 = vld [vmem:[#allocation3 + $0x23] sm:$0xff]  ;;  %v8159_v50 = vld [vmem:[#allocation9 + $0x60] sm:$0xff]  }
 0x190   :  { %v2238_v46 = vpack.c.bf16 %v2217_v43, %v2216_v45  ;;  %v2229_v0 = vld [vmem:[#allocation3 + $0x83] sm:$0xff]  ;;  %v2474_v43 = vld [vmem:[#allocation3 + $0xb4] sm:$0xff] }
 0x191   :  { %v2467_v35 = vld [vmem:[#allocation3 + $0x7c] sm:$0xff] }
 0x192   :  { %7433 = vmatmul.mubr.msk.bf16.gmra.mrb[44].mxu0 %vm113_vm0, %v1374_v4  ;;  %v1746_v4 = vld [vmem:[#allocation3 + $0x52] sm:$0xff] }
 0x193   :  { %7436 = vmatprep.mubr.msk.bf16.mxu0 %vm113_vm0, %v1375_v5  ;;  %v1747_v5 = vld [vmem:[#allocation3 + $0x5a] sm:$0xff] }
 0x194   :  { %v1764_v8 = vpack.c.bf16 %v1747_v5, %v1746_v4  ;;  %v2003_v30 = vpack.c.bf16 %v1748_v6, %v1747_v5  ;;  %v2232_v5 = vld [vmem:[#allocation3 + $0x9b] sm:$0xff]  ;;  %v2233_v6 = vld [vmem:[#allocation3 + $0xa3] sm:$0xff] }
 0x19a   :  { %7437 = vmatmul.mubr.msk.bf16.gmra.mrb[48].mxu0 %vm113_vm0, %v1376_v10  ;;  %v1750_v10 = vld [vmem:[#allocation3 + $0x72] sm:$0xff] }
 0x19b   :  { %7440 = vmatprep.mubr.msk.bf16.mxu0 %vm113_vm0, %v1377_v11  ;;  %v1751_v11 = vld [vmem:[#allocation3 + $0x7a] sm:$0xff]  ;;  %v2004_v31 = vpack.c.bf16 %v1750_v10, %v1749_v7  ;;  %v2234_v7 = vld [vmem:[#allocation3 + $0xab] sm:$0xff] }
 0x19c   :  { %v1766_v13 = vpack.c.bf16 %v1751_v11, %v1750_v10 }
 0x1a2   :  { %7441 = vmatmul.mubr.msk.bf16.gmra.mrb[52].mxu0 %vm113_vm0, %v1378_v15  ;;  %v1767_v15 = vpack.c.bf16 %v1753_v12, %v1752_v14 }
 0x1a3   :  { %7448 = vmatprep.mubr.msk.bf16.mxu0 %vm113_vm0, %v1328_v16  ;;  %v1755_v16 = vld [vmem:[#allocation3 + $0x9a] sm:$0xff] }
 0x1a4   :  { %v1768_v19 = vpack.c.bf16 %v1755_v16, %v1754_v18 }
 0x1aa   :  { %7449 = vmatmul.mubr.msk.bf16.vlgmr.msra.gmra.mrb[32].mxu0 %vm113_vm0, %v1329_v20  ;;  %v1756_v20 = vld [vmem:[#allocation3 + $0xa2] sm:$0xff] }
 0x1ab   :  { %7473 = vmatpush3.bf16.msra.mxu0 %v9093_v53  ;;  %7452 = vmatprep.mubr.msk.bf16.mxu0 %vm113_vm0, %v1330_v23  ;;  %v1318_v53 = vld [vmem:[#allocation3 + $0x68] sm:$0xff]  ;;  %v1769_v21 = vpack.c.bf16 %v1757_v17, %v1756_v20 }
 0x1ac   :  { %7474 = vmatprep.subr.bf16.mxu0 %v8152_v22  ;;  %v1334_v33 = vpack.c.bf16 %v1318_v53, %v1317_v42  ;;  %v2005_v42 = vpack.c.bf16 %v1752_v14, %v1751_v11  ;;  %v2006_v53 = vpack.c.bf16 %v1754_v18, %v1753_v12  ;;  %v2236_v11 = vld [vmem:[#allocation3 + $0xbb] sm:$0xf]  ;;  %v2453_v14 = vld [vmem:[#allocation3 + $0xc] sm:$0xff] }
 0x1ad   :  { %v2454_v12 = vld [vmem:[#allocation3 + $0x14] sm:$0xff] }
 0x1ae   :  { %v2458_v18 = vld [vmem:[#allocation3 + $0x34] sm:$0xff] }
 0x1af   :  { %7475 = vmatpush3.bf16.msra.mxu0 %v8152_v22  ;;  %v1758_v22 = vld [vmem:[#allocation3 + $0xb2] sm:$0xf] }
 0x1b0   :  { %7500 = vmatprep.subr.bf16.mxu0 %v8153_v40  ;;  %v1770_v23 = vpack.c.bf16 %v1758_v22, %v1758_v22 }
 0x1b2   :  { %7453 = vmatmul.mubr.msk.bf16.gmra.mrb[36].mxu0 %vm113_vm0, %v1331_v28  ;;  %v2001_v28 = vpack.c.bf16 %v1744_v2, %v1743_v62  ;;  %v2231_v2 = vld [vmem:[#allocation3 + $0x93] sm:$0xff] }
 0x1b3   :  { %7456 = vmatprep.mubr.msk.bf16.mxu0 %vm113_vm0, %v1332_v29  ;;  %v2002_v29 = vpack.c.bf16 %v1746_v4, %v1745_v63  ;;  %v2228_v63 = vld [vmem:[#allocation3 + $0x7b] sm:$0xff] }
 0x1ba   :  { %7457 = vmatmul.mubr.msk.bf16.gmra.mrb[40].mxu0 %vm113_vm0, %v1333_v32  ;;  %v1996_v32 = vld [vmem:[#allocation3 + $0xb2] sm:$0xff] }
 0x1bb   :  { %7460 = vmatprep.mubr.msk.bf16.mxu0 %vm113_vm0, %v1334_v33  ;;  %v2007_v33 = vpack.c.bf16 %v1756_v20, %v1755_v16  ;;  %v2008_v34 = vpack.c.bf16 %v1996_v32, %v1757_v17  ;;  %v2456_v16 = vld [vmem:[#allocation3 + $0x24] sm:$0xff]  ;;  %v2457_v17 = vld [vmem:[#allocation3 + $0x2c] sm:$0xff] }
 0x1bc   :  { %v2478_v22 = vpack.c.bf16 %v2458_v18, %v2457_v17 }
 0x1c2   :  { %7461 = vmatmul.mubr.msk.bf16.gmra.mrb[44].mxu0 %vm113_vm0, %v1335_v38  ;;  %v2214_v38 = vld [vmem:[#allocation3 + $0xb] sm:$0xff] }
 0x1c3   :  { %7464 = vmatprep.mubr.msk.bf16.mxu0 %vm113_vm0, %v1336_v41  ;;  %v2237_v41 = vpack.c.bf16 %v2215_v36, %v2214_v38 }
 0x1ca   :  { %7465 = vmatmul.mubr.msk.bf16.gmra.mrb[48].mxu0 %vm113_vm0, %v1337_v47  ;;  %v2218_v47 = vld [vmem:[#allocation3 + $0x2b] sm:$0xff] }
 0x1cb   :  { %7468 = vmatprep.mubr.msk.bf16.mxu0 %vm113_vm0, %v1338_v48  ;;  %v8158_v48 = vld [vmem:[#allocation9 + $0x58] sm:$0xff]   ;;  %v2239_v49 = vpack.c.bf16 %v2219_v44, %v2218_v47  ;;  %v2471_v44 = vld [vmem:[#allocation3 + $0x9c] sm:$0xff] }
 0x1d2   :  { %7469 = vmatmul.mubr.msk.bf16.gmra.mrb[52].mxu0 %vm113_vm0, %v1339_v52  ;;  %v2222_v52 = vld [vmem:[#allocation3 + $0x4b] sm:$0xff] }
 0x1d3   :  { %7476 = vmatprep.mubr.msk.bf16.mxu0 %vm113_vm0, %v1759_v54  ;;  %v2223_v54 = vld [vmem:[#allocation3 + $0x53] sm:$0xff] }
 0x1d4   :  { %v2241_v57 = vpack.c.bf16 %v2223_v54, %v2222_v52  ;;  %v8162_v52 = vld [vmem:[#allocation9 + $0x78] sm:$0xff]  }
 0x1da   :  { %7477 = vmatmul.mubr.msk.bf16.vlgmr.msra.gmra.mrb[32].mxu0 %vm113_vm0, %v1760_v59  ;;  %v2225_v59 = vld [vmem:[#allocation3 + $0x63] sm:$0xff] }
 0x1db   :  { %7501 = vmatpush3.bf16.msra.mxu0 %v8153_v40  ;;  %7480 = vmatprep.mubr.msk.bf16.mxu0 %vm113_vm0, %v1761_v39  ;;  %v1998_v40 = vpack.c.bf16 %v1738_v58, %v1737_v51  ;;  %v2221_v51 = vld [vmem:[#allocation3 + $0x43] sm:$0xff]  ;;  %v2224_v58 = vld [vmem:[#allocation3 + $0x5b] sm:$0xff]  ;;  %v2226_v39 = vld [vmem:[#allocation3 + $0x6b] sm:$0xff] }
 0x1dc   :  { %7502 = vmatprep.subr.bf16.mxu0 %v8154_v60  ;;  %v2240_v56 = vpack.c.bf16 %v2221_v51, %v2220_v55  ;;  %v2716_v51 = vpack.c.bf16 %v2457_v17, %v2456_v16  ;;  %v8163_v55 = vld [vmem:[#allocation9 + $0x80] sm:$0xff]   ;;  %v2937_v17 = vld [vmem:[#allocation3 + $0x45] sm:$0xff] }
 0x1df   :  { %7503 = vmatpush3.bf16.msra.mxu0 %v8154_v60  ;;  %v2242_v60 = vpack.c.bf16 %v2225_v59, %v2224_v58  ;;  %v8165_v58 = vld [vmem:[%s9651_s7 + $0x20] sm:$0xff]   ;;  %v8481_v59 = vld [vmem:[#allocation7] sm:$0xff] }
 0x1e0   :  { %7528 = vmatprep.subr.bf16.mxu0 %v8155_v61  ;;  %141 = vst.msk [vmem:[#allocation5] sm:$0xff] %vm140_vm1, %v8481_v59  ;;  %142 = vst.msk [vmem:[#allocation5 + $0x8] sm:$0xff] %vm140_vm1, %v8481_v59  ;;  %7668 = vmatprep.subr.bf16.mxu1 %v8165_v58 }
 0x1e1   :  { %143 = vst.msk [vmem:[#allocation5 + $0x10] sm:$0xff] %vm140_vm1, %v8481_v59  ;;  %144 = vst.msk [vmem:[#allocation5 + $0x18] sm:$0xff] %vm140_vm1, %v8481_v59  ;;  %7669 = vmatpush3.bf16.msra.mxu1 %v8165_v58  ;;  %v3182_v58 = vld [vmem:[#allocation3 + $0x76] sm:$0xff] }
 0x1e2   :  { %7481 = vmatmul.mubr.msk.bf16.gmra.mrb[36].mxu0 %vm113_vm0, %v1762_v1  ;;  %v2230_v1 = vld [vmem:[#allocation3 + $0x8b] sm:$0xff]  ;;  %145 = vst.msk [vmem:[#allocation5 + $0x20] sm:$0xff] %vm140_vm1, %v8481_v59  ;;  %146 = vst.msk [vmem:[#allocation5 + $0x28] sm:$0xff] %vm140_vm1, %v8481_v59 }
 0x1e3   :  { %7484 = vmatprep.mubr.msk.bf16.mxu0 %vm113_vm0, %v1763_v3  ;;  %v2244_v3 = vpack.c.bf16 %v2229_v0, %v2228_v63  ;;  %v2245_v4 = vpack.c.bf16 %v2231_v2, %v2230_v1  ;;  %147 = vst.msk [vmem:[#allocation5 + $0x30] sm:$0xff] %vm140_vm1, %v8481_v59  ;;  %148 = vst.msk [vmem:[#allocation5 + $0x38] sm:$0xff] %vm140_vm1, %v8481_v59  ;;  %v2713_v63 = vld [vmem:[#allocation3 + $0xbc] sm:$0xff]  ;;  %v2714_v2 = vld [vmem:[#allocation3 + $0xc4] sm:$0xf] }
 0x1e4   :  { %149 = vst.msk [vmem:[#allocation5 + $0x40] sm:$0xff] %vm140_vm1, %v8481_v59  ;;  %150 = vst.msk [vmem:[#allocation5 + $0x48] sm:$0xff] %vm140_vm1, %v8481_v59  ;;  %v2725_v1 = vpack.c.bf16 %v2713_v63, %v2474_v43  ;;  %v3183_v59 = vld [vmem:[#allocation3 + $0x7e] sm:$0xff]  ;;  %v3186_v63 = vld [vmem:[#allocation3 + $0x96] sm:$0xff] }
 0x1ea   :  { %7485 = vmatmul.mubr.msk.bf16.gmra.mrb[40].mxu0 %vm113_vm0, %v1764_v8  ;;  %v2235_v8 = vld [vmem:[#allocation3 + $0xb3] sm:$0xff] }
 0x1eb   :  { %7488 = vmatprep.mubr.msk.bf16.mxu0 %vm113_vm0, %v1765_v9  ;;  %v2246_v9 = vpack.c.bf16 %v2233_v6, %v2232_v5  ;;  %v2247_v10 = vpack.c.bf16 %v2235_v8, %v2234_v7  ;;  %v2931_v5 = vld [vmem:[#allocation3 + $0x15] sm:$0xff]  ;;  %v2934_v7 = vld [vmem:[#allocation3 + $0x2d] sm:$0xff]  ;;  %v2936_v8 = vld [vmem:[#allocation3 + $0x3d] sm:$0xff] }
 0x1f2   :  { %7489 = vmatmul.mubr.msk.bf16.gmra.mrb[44].mxu0 %vm113_vm0, %v1766_v13  ;;  %v2248_v13 = vpack.c.bf16 %v2236_v11, %v2236_v11  ;;  %v2935_v11 = vld [vmem:[#allocation3 + $0x35] sm:$0xff] }
 0x1f3   :  { %7492 = vmatprep.mubr.msk.bf16.mxu0 %vm113_vm0, %v1767_v15  ;;  %v2476_v15 = vpack.c.bf16 %v2454_v12, %v2453_v14  ;;  %v2938_v14 = vld [vmem:[#allocation3 + $0x4d] sm:$0xff] }
 0x1fa   :  { %7493 = vmatmul.mubr.msk.bf16.gmra.mrb[48].mxu0 %vm113_vm0, %v1768_v19  ;;  %v2455_v19 = vld [vmem:[#allocation3 + $0x1c] sm:$0xff] }
 0x1fb   :  { %7496 = vmatprep.mubr.msk.bf16.mxu0 %vm113_vm0, %v1769_v21  ;;  %v2477_v20 = vpack.c.bf16 %v2456_v16, %v2455_v19  ;;  %v8160_v21 = vld [vmem:[#allocation9 + $0x68] sm:$0xff]  }
 0x1fc   :  { %v2940_v16 = vld [vmem:[#allocation3 + $0x5d] sm:$0xff] }
 0x202   :  { %7497 = vmatmul.mubr.msk.bf16.gmra.mrb[52].mxu0 %vm113_vm0, %v1770_v23  ;;  %v8161_v23 = vld [vmem:[#allocation9 + $0x70] sm:$0xff]  }
 0x203   :  { %7504 = vmatprep.mubr.msk.bf16.mxu0 %vm113_vm0, %v1998_v40  ;;  %v2460_v40 = vld [vmem:[#allocation3 + $0x44] sm:$0xff] }
 0x20a   :  { %7505 = vmatmul.mubr.msk.bf16.vlgmr.msra.gmra.mrb[32].mxu0 %vm113_vm0, %v1999_v24  ;;  %v2461_v24 = vld [vmem:[#allocation3 + $0x4c] sm:$0xff] }
 0x20b   :  { %7529 = vmatpush3.bf16.msra.mxu0 %v8155_v61  ;;  %7508 = vmatprep.mubr.msk.bf16.mxu0 %vm113_vm0, %v2000_v26  ;;  %v2227_v61 = vld [vmem:[#allocation3 + $0x73] sm:$0xff]  ;;  %v2459_v26 = vld [vmem:[#allocation3 + $0x3c] sm:$0xff] }
 0x20c   :  { %7530 = vmatprep.subr.bf16.mxu0 %v8156_v25  ;;  %v2243_v62 = vpack.c.bf16 %v2227_v61, %v2226_v39  ;;  %v2717_v54 = vpack.c.bf16 %v2459_v26, %v2458_v18  ;;  %v2957_v18 = vpack.c.bf16 %v2938_v14, %v2937_v17  ;;  %v9293_v14 = vld [vmem:[%s9651_s7] sm:$0xff]  }
 0x20d   :  { %v9304_v17 = vld [vmem:[%s9650_s6] ss:$0 sm:$0xff] }
 0x20f   :  { %7531 = vmatpush3.bf16.msra.mxu0 %v8156_v25  ;;  %v2462_v25 = vld [vmem:[#allocation3 + $0x54] sm:$0xff] }
 0x210   :  { %7556 = vmatprep.subr.bf16.mxu0 %v8157_v27 }
 0x212   :  { %7509 = vmatmul.mubr.msk.bf16.gmra.mrb[36].mxu0 %vm113_vm0, %v2001_v28  ;;  %v2480_v28 = vpack.c.bf16 %v2462_v25, %v2461_v24 }
 0x213   :  { %7512 = vmatprep.mubr.msk.bf16.mxu0 %vm113_vm0, %v2002_v29  ;;  %v2463_v29 = vld [vmem:[#allocation3 + $0x5c] sm:$0xff] }
 0x21a   :  { %7513 = vmatmul.mubr.msk.bf16.gmra.mrb[40].mxu0 %vm113_vm0, %v2003_v30  ;;  %v2464_v30 = vld [vmem:[#allocation3 + $0x64] sm:$0xff] }
 0x21b   :  { %7516 = vmatprep.mubr.msk.bf16.mxu0 %vm113_vm0, %v2004_v31  ;;  %v2481_v31 = vpack.c.bf16 %v2464_v30, %v2463_v29 }
 0x222   :  { %7517 = vmatmul.mubr.msk.bf16.gmra.mrb[44].mxu0 %vm113_vm0, %v2005_v42  ;;  %v2465_v42 = vld [vmem:[#allocation3 + $0x6c] sm:$0xff] }
 0x223   :  { %7520 = vmatprep.mubr.msk.bf16.mxu0 %vm113_vm0, %v2006_v53  ;;  %v2466_v53 = vld [vmem:[#allocation3 + $0x74] sm:$0xff] }
 0x224   :  { %v2482_v32 = vpack.c.bf16 %v2466_v53, %v2465_v42  ;;  %v2721_v39 = vpack.c.bf16 %v2467_v35, %v2466_v53  ;;  %v2951_v53 = vld [vmem:[#allocation3 + $0xb5] sm:$0xff] }
 0x22a   :  { %7521 = vmatmul.mubr.msk.bf16.gmra.mrb[48].mxu0 %vm113_vm0, %v2007_v33  ;;  %v2468_v33 = vld [vmem:[#allocation3 + $0x84] sm:$0xff] }
 0x22b   :  { %7524 = vmatprep.mubr.msk.bf16.mxu0 %vm113_vm0, %v2008_v34  ;;  %v2470_v34 = vld [vmem:[#allocation3 + $0x94] sm:$0xff]  ;;  %v2483_v36 = vpack.c.bf16 %v2468_v33, %v2467_v35  ;;  %v2953_v35 = vld [vmem:[#allocation3 + $0xc5] sm:$0xf] }
 0x232   :  { %7525 = vmatmul.mubr.msk.bf16.gmra.mrb[52].mxu0 %vm113_vm0, %v2009_v37  ;;  %v2469_v37 = vld [vmem:[#allocation3 + $0x8c] sm:$0xff] }
 0x233   :  { %7532 = vmatprep.mubr.msk.bf16.mxu0 %vm113_vm0, %v2237_v41  ;;  %v2484_v38 = vpack.c.bf16 %v2470_v34, %v2469_v37  ;;  %v2472_v41 = vld [vmem:[#allocation3 + $0xa4] sm:$0xff]  ;;  %v2722_v61 = vpack.c.bf16 %v2469_v37, %v2468_v33 }
 0x234   :  { %v2485_v45 = vpack.c.bf16 %v2472_v41, %v2471_v44  ;;  %v3171_v37 = vld [vmem:[#allocation3 + $0x1e] sm:$0xff] }
 0x23a   :  { %7533 = vmatmul.mubr.msk.bf16.vlgmr.msra.gmra.mrb[32].mxu0 %vm113_vm0, %v2238_v46  ;;  %v2473_v46 = vld [vmem:[#allocation3 + $0xac] sm:$0xff] }
 0x23b   :  { %7557 = vmatpush3.bf16.msra.mxu0 %v8157_v27  ;;  %7536 = vmatprep.mubr.msk.bf16.mxu0 %vm113_vm0, %v2239_v49  ;;  %v2479_v27 = vpack.c.bf16 %v2460_v40, %v2459_v26  ;;  %v2486_v47 = vpack.c.bf16 %v2474_v43, %v2473_v46  ;;  %v2724_v0 = vpack.c.bf16 %v2473_v46, %v2472_v41  ;;  %v2946_v26 = vld [vmem:[#allocation3 + $0x8d] sm:$0xff] }
 0x23c   :  { %7558 = vmatprep.subr.bf16.mxu0 %v8158_v48  ;;  %v3173_v43 = vld [vmem:[#allocation3 + $0x2e] sm:$0xff]  ;;  %v3172_v46 = vld [vmem:[#allocation3 + $0x26] sm:$0xff] }
 0x23f   :  { %7559 = vmatpush3.bf16.msra.mxu0 %v8158_v48  ;;  %v2475_v48 = vld [vmem:[#allocation3 + $0xbc] sm:$0xf] }
 0x240   :  { %7584 = vmatprep.subr.bf16.mxu0 %v8159_v50  ;;  %v2487_v49 = vpack.c.bf16 %v2475_v48, %v2475_v48 }
 0x242   :  { %7537 = vmatmul.mubr.msk.bf16.gmra.mrb[36].mxu0 %vm113_vm0, %v2240_v56  ;;  %v2718_v56 = vpack.c.bf16 %v2461_v24, %v2460_v40 }
 0x243   :  { %7540 = vmatprep.mubr.msk.bf16.mxu0 %vm113_vm0, %v2241_v57  ;;  %v2719_v57 = vpack.c.bf16 %v2463_v29, %v2462_v25  ;;  %v2945_v25 = vld [vmem:[#allocation3 + $0x85] sm:$0xff] }
 0x244   :  { %v2961_v29 = vpack.c.bf16 %v2946_v26, %v2945_v25 }
 0x24a   :  { %7541 = vmatmul.mubr.msk.bf16.gmra.mrb[40].mxu0 %vm113_vm0, %v2242_v60  ;;  %v2720_v60 = vpack.c.bf16 %v2465_v42, %v2464_v30  ;;  %v2950_v42 = vld [vmem:[#allocation3 + $0xad] sm:$0xff] }
 0x24b   :  { %7544 = vmatprep.mubr.msk.bf16.mxu0 %vm113_vm0, %v2243_v62  ;;  %v2723_v62 = vpack.c.bf16 %v2471_v44, %v2470_v34  ;;  %v3174_v44 = vld [vmem:[#allocation3 + $0x36] sm:$0xff] }
 0x252   :  { %7545 = vmatmul.mubr.msk.bf16.gmra.mrb[44].mxu0 %vm113_vm0, %v2244_v3  ;;  %v2726_v3 = vpack.c.bf16 %v2714_v2, %v2714_v2 }
 0x253   :  { %7548 = vmatprep.mubr.msk.bf16.mxu0 %vm113_vm0, %v2245_v4  ;;  %v2932_v4 = vld [vmem:[#allocation3 + $0x1d] sm:$0xff] }
 0x254   :  { %v2954_v6 = vpack.c.bf16 %v2932_v4, %v2931_v5  ;;  %v3189_v4 = vld [vmem:[#allocation3 + $0xae] sm:$0xff]  ;;  %v3190_v5 = vld [vmem:[#allocation3 + $0xb6] sm:$0xff] }
 0x25a   :  { %7549 = vmatmul.mubr.msk.bf16.gmra.mrb[48].mxu0 %vm113_vm0, %v2246_v9  ;;  %v2933_v9 = vld [vmem:[#allocation3 + $0x25] sm:$0xff] }
 0x25b   :  { %7552 = vmatprep.mubr.msk.bf16.mxu0 %vm113_vm0, %v2247_v10  ;;  %v2955_v10 = vpack.c.bf16 %v2934_v7, %v2933_v9  ;;  %v3192_v9 = vld [vmem:[#allocation3 + $0xc6] sm:$0xf] }
 0x262   :  { %7553 = vmatmul.mubr.msk.bf16.gmra.mrb[52].mxu0 %vm113_vm0, %v2248_v13  ;;  %v2956_v13 = vpack.c.bf16 %v2936_v8, %v2935_v11  ;;  %v8166_v11 = vld [vmem:[%s9651_s7 + $0x28] sm:$0xff]  }
 0x263   :  { %7560 = vmatprep.mubr.msk.bf16.mxu0 %vm113_vm0, %v2476_v15  ;;  %v2939_v15 = vld [vmem:[#allocation3 + $0x55] sm:$0xff]  ;;  %7670 = vmatprep.subr.bf16.mxu1 %v8166_v11 }
 0x264   :  { %7671 = vmatpush3.bf16.msra.mxu1 %v8166_v11 }
 0x26a   :  { %7561 = vmatmul.mubr.msk.bf16.vlgmr.msra.gmra.mrb[32].mxu0 %vm113_vm0, %v2477_v20  ;;  %v2941_v20 = vld [vmem:[#allocation3 + $0x65] sm:$0xff] }
 0x26b   :  { %7585 = vmatpush3.bf16.msra.mxu0 %v8159_v50  ;;  %7564 = vmatprep.mubr.msk.bf16.mxu0 %vm113_vm0, %v2478_v22  ;;  %v2715_v50 = vpack.c.bf16 %v2455_v19, %v2454_v12  ;;  %v8164_v12 = vld [vmem:[#allocation9 + $0x88] sm:$0xff]   ;;  %v2958_v19 = vpack.c.bf16 %v2940_v16, %v2939_v15  ;;  %v2943_v22 = vld [vmem:[#allocation3 + $0x75] sm:$0xff] }
 0x26c   :  { %7586 = vmatprep.subr.bf16.mxu0 %v8160_v21  ;;  %v9299_v15 = vld [vmem:[%s9649_s5] ss:$0 sm:$0xff] }
 0x26f   :  { %7587 = vmatpush3.bf16.msra.mxu0 %v8160_v21  ;;  %v2942_v21 = vld [vmem:[#allocation3 + $0x6d] sm:$0xff] }
 0x270   :  { %7612 = vmatprep.subr.bf16.mxu0 %v8161_v23  ;;  %v2959_v40 = vpack.c.bf16 %v2942_v21, %v2941_v20 }
 0x272   :  { %7565 = vmatmul.mubr.msk.bf16.gmra.mrb[36].mxu0 %vm113_vm0, %v2479_v27  ;;  %v2947_v27 = vld [vmem:[#allocation3 + $0x95] sm:$0xff] }
 0x273   :  { %7568 = vmatprep.mubr.msk.bf16.mxu0 %vm113_vm0, %v2480_v28  ;;  %v2948_v28 = vld [vmem:[#allocation3 + $0x9d] sm:$0xff] }
 0x274   :  { %v2962_v30 = vpack.c.bf16 %v2948_v28, %v2947_v27 }
 0x27a   :  { %7569 = vmatmul.mubr.msk.bf16.gmra.mrb[40].mxu0 %vm113_vm0, %v2481_v31  ;;  %v2949_v31 = vld [vmem:[#allocation3 + $0xa5] sm:$0xff] }
 0x27b   :  { %7572 = vmatprep.mubr.msk.bf16.mxu0 %vm113_vm0, %v2482_v32  ;;  %v2952_v32 = vld [vmem:[#allocation3 + $0xbd] sm:$0xff]  ;;  %v2963_v33 = vpack.c.bf16 %v2950_v42, %v2949_v31 }
 0x27c   :  { %v2964_v34 = vpack.c.bf16 %v2952_v32, %v2951_v53 }
 0x282   :  { %7573 = vmatmul.mubr.msk.bf16.gmra.mrb[44].mxu0 %vm113_vm0, %v2483_v36  ;;  %v2965_v36 = vpack.c.bf16 %v2953_v35, %v2953_v35 }
 0x283   :  { %7576 = vmatprep.mubr.msk.bf16.mxu0 %vm113_vm0, %v2484_v38  ;;  %v3170_v38 = vld [vmem:[#allocation3 + $0x16] sm:$0xff] }
 0x284   :  { %v3193_v41 = vpack.c.bf16 %v3171_v37, %v3170_v38 }
 0x28a   :  { %7577 = vmatmul.mubr.msk.bf16.gmra.mrb[48].mxu0 %vm113_vm0, %v2485_v45  ;;  %v3175_v45 = vld [vmem:[#allocation3 + $0x3e] sm:$0xff] }
 0x28b   :  { %7580 = vmatprep.mubr.msk.bf16.mxu0 %vm113_vm0, %v2486_v47  ;;  %v3194_v47 = vpack.c.bf16 %v3173_v43, %v3172_v46  ;;  %v3195_v48 = vpack.c.bf16 %v3175_v45, %v3174_v44 }
 0x292   :  { %7581 = vmatmul.mubr.msk.bf16.gmra.mrb[52].mxu0 %vm113_vm0, %v2487_v49  ;;  %v3177_v49 = vld [vmem:[#allocation3 + $0x4e] sm:$0xff] }
 0x293   :  { %7588 = vmatprep.mubr.msk.bf16.mxu0 %vm113_vm0, %v2715_v50  ;;  %v3178_v50 = vld [vmem:[#allocation3 + $0x56] sm:$0xff] }
 0x29a   :  { %7589 = vmatmul.mubr.msk.bf16.vlgmr.msra.gmra.mrb[32].mxu0 %vm113_vm0, %v2716_v51  ;;  %v3179_v51 = vld [vmem:[#allocation3 + $0x5e] sm:$0xff] }
 0x29b   :  { %7613 = vmatpush3.bf16.msra.mxu0 %v8161_v23  ;;  %7592 = vmatprep.mubr.msk.bf16.mxu0 %vm113_vm0, %v2717_v54  ;;  %v2944_v23 = vld [vmem:[#allocation3 + $0x7d] sm:$0xff] }
 0x29c   :  { %7614 = vmatprep.subr.bf16.mxu0 %v8162_v52  ;;  %v2960_v24 = vpack.c.bf16 %v2944_v23, %v2943_v22 }
 0x29f   :  { %7615 = vmatpush3.bf16.msra.mxu0 %v8162_v52  ;;  %v3176_v52 = vld [vmem:[#allocation3 + $0x46] sm:$0xff] }
 0x2a0   :  { %7640 = vmatprep.subr.bf16.mxu0 %v8163_v55  ;;  %v3196_v54 = vpack.c.bf16 %v3177_v49, %v3176_v52 }
 0x2a2   :  { %7593 = vmatmul.mubr.msk.bf16.gmra.mrb[36].mxu0 %vm113_vm0, %v2718_v56  ;;  %v3180_v56 = vld [vmem:[#allocation3 + $0x66] sm:$0xff] }
 0x2a3   :  { %7596 = vmatprep.mubr.msk.bf16.mxu0 %vm113_vm0, %v2719_v57  ;;  %v3181_v57 = vld [vmem:[#allocation3 + $0x6e] sm:$0xff] }
 0x2aa   :  { %7597 = vmatmul.mubr.msk.bf16.gmra.mrb[40].mxu0 %vm113_vm0, %v2720_v60  ;;  %v3198_v60 = vpack.c.bf16 %v3181_v57, %v3180_v56 }
 0x2ab   :  { %7600 = vmatprep.mubr.msk.bf16.mxu0 %vm113_vm0, %v2721_v39  ;;  %v3199_v39 = vpack.c.bf16 %v3183_v59, %v3182_v58 }
 0x2b2   :  { %7601 = vmatmul.mubr.msk.bf16.gmra.mrb[44].mxu0 %vm113_vm0, %v2722_v61  ;;  %v3184_v61 = vld [vmem:[#allocation3 + $0x86] sm:$0xff] }
 0x2b3   :  { %7604 = vmatprep.mubr.msk.bf16.mxu0 %vm113_vm0, %v2723_v62  ;;  %v3185_v62 = vld [vmem:[#allocation3 + $0x8e] sm:$0xff] }
 0x2ba   :  { %7605 = vmatmul.mubr.msk.bf16.gmra.mrb[48].mxu0 %vm113_vm0, %v2724_v0  ;;  %v3187_v0 = vld [vmem:[#allocation3 + $0x9e] sm:$0xff] }
 0x2bb   :  { %7608 = vmatprep.mubr.msk.bf16.mxu0 %vm113_vm0, %v2725_v1  ;;  %v3200_v1 = vpack.c.bf16 %v3185_v62, %v3184_v61  ;;  %v3201_v2 = vpack.c.bf16 %v3187_v0, %v3186_v63 }
 0x2c2   :  { %7609 = vmatmul.mubr.msk.bf16.gmra.mrb[52].mxu0 %vm113_vm0, %v2726_v3  ;;  %v3188_v3 = vld [vmem:[#allocation3 + $0xa6] sm:$0xff] }
 0x2c3   :  { %7616 = vmatprep.mubr.msk.bf16.mxu0 %vm113_vm0, %v2954_v6  ;;  %v3191_v6 = vld [vmem:[#allocation3 + $0xbe] sm:$0xff]  ;;  %v3202_v7 = vpack.c.bf16 %v3189_v4, %v3188_v3 }
 0x2c4   :  { %v3203_v8 = vpack.c.bf16 %v3191_v6, %v3190_v5 }
 0x2ca   :  { %7617 = vmatmul.mubr.msk.bf16.vlgmr.msra.gmra.mrb[32].mxu0 %vm113_vm0, %v2955_v10  ;;  %v3204_v10 = vpack.c.bf16 %v3192_v9, %v3192_v9 }
 0x2cb   :  { %7641 = vmatpush3.bf16.msra.mxu0 %v8163_v55  ;;  %7620 = vmatprep.mubr.msk.bf16.mxu0 %vm113_vm0, %v2956_v13  ;;  %v3197_v55 = vpack.c.bf16 %v3179_v51, %v3178_v50  ;;  %v8168_v13 = vld [vmem:[%s9651_s7 + $0x38] sm:$0xff]  }
 0x2cc   :  { %7642 = vmatprep.subr.bf16.mxu0 %v8164_v12 }
 0x2cf   :  { %7643 = vmatpush3.bf16.msra.mxu0 %v8164_v12  ;;  %v8167_v12 = vld [vmem:[%s9651_s7 + $0x30] sm:$0xff]  }
 0x2d0   :  { %7672 = vmatprep.subr.bf16.mxu1 %v8167_v12 }
 0x2d1   :  { %7673 = vmatpush3.bf16.msra.mxu1 %v8167_v12 }
 0x2d2   :  { %7621 = vmatmul.mubr.msk.bf16.gmra.mrb[36].mxu0 %vm113_vm0, %v2957_v18  ;;  %7674 = vmatprep.subr.bf16.mxu1 %v8168_v13 }
 0x2d3   :  { %7624 = vmatprep.mubr.msk.bf16.mxu0 %vm113_vm0, %v2958_v19 }
 0x2d5   :  { %7675 = vmatpush3.bf16.msra.mxu1 %v8168_v13 }
 0x2d6   :  { %7684 = vmatprep.subr.bf16.mxu1 %v9293_v14 }
 0x2da   :  { %7625 = vmatmul.mubr.msk.bf16.gmra.mrb[40].mxu0 %vm113_vm0, %v2959_v40 }
 0x2db   :  { %7628 = vmatprep.mubr.msk.bf16.mxu0 %vm113_vm0, %v2960_v24 }
 0x2e2   :  { %7629 = vmatmul.mubr.msk.bf16.gmra.mrb[44].mxu0 %vm113_vm0, %v2961_v29 }
 0x2e3   :  { %7632 = vmatprep.mubr.msk.bf16.mxu0 %vm113_vm0, %v2962_v30 }
 0x2ea   :  { %7633 = vmatmul.mubr.msk.bf16.gmra.mrb[48].mxu0 %vm113_vm0, %v2963_v33 }
 0x2eb   :  { %7636 = vmatprep.mubr.msk.bf16.mxu0 %vm113_vm0, %v2964_v34 }
 0x2f2   :  { %7637 = vmatmul.mubr.msk.bf16.gmra.mrb[52].mxu0 %vm113_vm0, %v2965_v36 }
 0x2f3   :  { %7644 = vmatprep.mubr.msk.bf16.mxu0 %vm113_vm0, %v3193_v41 }
 0x2fa   :  { %7645 = vmatmul.mubr.msk.bf16.vlgmr.msra.gmra.mrb[32].mxu0 %vm113_vm0, %v3194_v47 }
 0x2fb   :  { %7648 = vmatprep.mubr.msk.bf16.mxu0 %vm113_vm0, %v3195_v48 }
 0x302   :  { %7649 = vmatmul.mubr.msk.bf16.gmra.mrb[36].mxu0 %vm113_vm0, %v3196_v54 }
 0x303   :  { %7652 = vmatprep.mubr.msk.bf16.mxu0 %vm113_vm0, %v3197_v55 }
 0x30a   :  { %7653 = vmatmul.mubr.msk.bf16.gmra.mrb[40].mxu0 %vm113_vm0, %v3198_v60 }
 0x30b   :  { %7656 = vmatprep.mubr.msk.bf16.mxu0 %vm113_vm0, %v3199_v39 }
 0x312   :  { %7657 = vmatmul.mubr.msk.bf16.gmra.mrb[44].mxu0 %vm113_vm0, %v3200_v1 }
 0x313   :  { %7660 = vmatprep.mubr.msk.bf16.mxu0 %vm113_vm0, %v3201_v2 }
 0x31a   :  { %7661 = vmatmul.mubr.msk.bf16.gmra.mrb[48].mxu0 %vm113_vm0, %v3202_v7 }
 0x31b   :  { %7664 = vmatprep.mubr.msk.bf16.mxu0 %vm113_vm0, %v3203_v8 }
 0x322   :  { %7665 = vmatmul.mubr.msk.bf16.gmra.mrb[52].mxu0 %vm113_vm0, %v3204_v10 }
 0x3cd   :  { %v7646_v16 = vpop.f32.mrb[32].mxu0 }
 0x3ce   :  { %v3418_v18 = vmul.f32 %v7646_v16, %v9299_v15  ;;  %v3292_v19 = vpop.f32.mrb[33].mxu0 }
 0x3cf   :  { %v3416_v20 = vmul.f32 %v9299_v15, %v3292_v19  ;;  %v7647_v21 = vpop.f32.mrb[34].mxu0 }
 0x3d0   :  { %v3448_v22 = vadd.f32 %v9304_v17, %v3418_v18  ;;  %v3419_v23 = vmul.f32 %v7647_v21, %v9299_v15  ;;  %v3295_v40 = vpop.f32.mrb[35].mxu0 }
 0x3d1   :  { %v3446_v24 = vadd.f32 %v9304_v17, %v3416_v20  ;;  %v3417_v25 = vmul.f32 %v9299_v15, %v3295_v40 }
 0x3d2   :  { %v3471_v26 = vmax.f32 %v3448_v22, 0.0  ;;  %v3449_v27 = vadd.f32 %v9304_v17, %v3419_v23 }
 0x3d3   :  { %v3469_v28 = vmax.f32 %v3446_v24, 0.0  ;;  %v3447_v29 = vadd.f32 %v9304_v17, %v3417_v25 }
 0x3d4   :  { %3494 = vst.msk [vmem:[#allocation4 + $0x10] sm:$0xff] %vm140_vm1, %v3471_v26  ;;  %v3472_v30 = vmax.f32 %v3449_v27, 0.0 }
 0x3d5   :  { %3492 = vst.msk [vmem:[#allocation4] sm:$0xff] %vm140_vm1, %v3469_v28  ;;  %v3470_v31 = vmax.f32 %v3447_v29, 0.0  ;;  %v7650_v42 = vpop.f32.mrb[36].mxu0 }
 0x3d6   :  { %3495 = vst.msk [vmem:[#allocation4 + $0x18] sm:$0xff] %vm140_vm1, %v3472_v30  ;;  %v3422_v53 = vmul.f32 %v7650_v42, %v9299_v15  ;;  %v3308_v32 = vpop.f32.mrb[37].mxu0 }
 0x3d7   :  { %3493 = vst.msk [vmem:[#allocation4 + $0x8] sm:$0xff] %vm140_vm1, %v3470_v31  ;;  %v3420_v33 = vmul.f32 %v9299_v15, %v3308_v32  ;;  %v7651_v34 = vpop.f32.mrb[38].mxu0 }
 0x3d8   :  { %v3452_v35 = vadd.f32 %v9304_v17, %v3422_v53  ;;  %v3423_v36 = vmul.f32 %v7651_v34, %v9299_v15  ;;  %v3311_v37 = vpop.f32.mrb[39].mxu0 }
 0x3d9   :  { %v3450_v38 = vadd.f32 %v9304_v17, %v3420_v33  ;;  %v3421_v41 = vmul.f32 %v9299_v15, %v3311_v37 }
 0x3da   :  { %v3475_v43 = vmax.f32 %v3452_v35, 0.0  ;;  %v3453_v45 = vadd.f32 %v9304_v17, %v3423_v36 }
 0x3db   :  { %v3473_v44 = vmax.f32 %v3450_v38, 0.0  ;;  %v3451_v46 = vadd.f32 %v9304_v17, %v3421_v41 }
 0x3dc   :  { %v3516_v47 = vld [vmem:[#allocation4] ss:$2 sm:$0xf]  ;;  %v3518_v48 = vld [vmem:[#allocation4 + $0x1] ss:$2 sm:$0xf] }
 0x3dd   :  { %3498 = vst.msk [vmem:[#allocation4 + $0x30] sm:$0xff] %vm140_vm1, %v3475_v43  ;;  %3496 = vst.msk [vmem:[#allocation4 + $0x20] sm:$0xff] %vm140_vm1, %v3473_v44  ;;  %v3519_v51 = vmax.f32 %v3516_v47, %v3518_v48  ;;  %v3476_v54 = vmax.f32 %v3453_v45, 0.0  ;;  %v3474_v55 = vmax.f32 %v3451_v46, 0.0  ;;  %v7654_v56 = vpop.f32.mrb[40].mxu0 }
 0x3de   :  { %v3521_v49 = vld [vmem:[#allocation4 + $0xa] ss:$2 sm:$0xf]  ;;  %v3523_v50 = vld [vmem:[#allocation4 + $0xb] ss:$2 sm:$0xf] }
 0x3df   :  { %v3524_v52 = vmax.f32 %v3521_v49, %v3523_v50  ;;  %v3528_v57 = vld [vmem:[#allocation4 + $0x14] ss:$2 sm:$0xf]  ;;  %v3324_v58 = vpop.f32.mrb[41].mxu0  ;;  %3499 = vst.msk [vmem:[#allocation4 + $0x38] sm:$0xff] %vm140_vm1, %v3476_v54  ;;  %3497 = vst.msk [vmem:[#allocation4 + $0x28] sm:$0xff] %vm140_vm1, %v3474_v55 }
 0x3e0   :  { %v3530_v59 = vld [vmem:[#allocation4 + $0x15] ss:$2 sm:$0xf]  ;;  %v3424_v39 = vmul.f32 %v9299_v15, %v3324_v58  ;;  %v7655_v61 = vpop.f32.mrb[42].mxu0 }
 0x3e1   :  { %v3525_v60 = vmax.f32 %v3519_v51, %v3524_v52  ;;  %v3327_v62 = vpop.f32.mrb[43].mxu0  ;;  %v3531_v1 = vmax.f32 %v3528_v57, %v3530_v59 }
 0x3e2   :  { %v3454_v63 = vadd.f32 %v9304_v17, %v3424_v39  ;;  %v3425_v0 = vmul.f32 %v9299_v15, %v3327_v62 }
 0x3e3   :  { %3526 = vst.msk [vmem:[#allocation5 + $0x7] sm:$0xf] %vm3514_vm2, %v3525_v60 }
 0x3e4   :  { %v3533_v2 = vld [vmem:[#allocation4 + $0x1e] ss:$2 sm:$0xf]  ;;  %v3535_v3 = vld [vmem:[#allocation4 + $0x1f] ss:$2 sm:$0xf]  ;;  %v3455_v6 = vadd.f32 %v9304_v17, %v3425_v0 }
 0x3e5   :  { %v3536_v4 = vmax.f32 %v3533_v2, %v3535_v3  ;;  %v3477_v5 = vmax.f32 %v3454_v63, 0.0  ;;  %v7658_v7 = vpop.f32.mrb[44].mxu0 }
 0x3e6   :  { %v3430_v8 = vmul.f32 %v7658_v7, %v9299_v15  ;;  %v3340_v9 = vpop.f32.mrb[45].mxu0  ;;  %v3478_v11 = vmax.f32 %v3455_v6, 0.0  ;;  %v3545_v16 = vld [vmem:[#allocation4 + $0x32] ss:$2 sm:$0xf] }
 0x3e7   :  { %v3537_v10 = vmax.f32 %v3531_v1, %v3536_v4  ;;  %3500 = vst.msk [vmem:[#allocation4 + $0x40] sm:$0xff] %vm140_vm1, %v3477_v5  ;;  %v3428_v12 = vmul.f32 %v9299_v15, %v3340_v9  ;;  %v7659_v13 = vpop.f32.mrb[46].mxu0  ;;  %v3547_v18 = vld [vmem:[#allocation4 + $0x33] ss:$2 sm:$0xf] }
 0x3e8   :  { %v3460_v19 = vadd.f32 %v9304_v17, %v3430_v8  ;;  %v3431_v20 = vmul.f32 %v7659_v13, %v9299_v15  ;;  %v3548_v21 = vmax.f32 %v3545_v16, %v3547_v18  ;;  %v3540_v22 = vld [vmem:[#allocation4 + $0x28] ss:$2 sm:$0xf]  ;;  %v3542_v23 = vld [vmem:[#allocation4 + $0x29] ss:$2 sm:$0xf] }
 0x3e9   :  { %3501 = vst.msk [vmem:[#allocation4 + $0x48] sm:$0xff] %vm140_vm1, %v3478_v11  ;;  %v3458_v40 = vadd.f32 %v9304_v17, %v3428_v12  ;;  %v3543_v24 = vmax.f32 %v3540_v22, %v3542_v23  ;;  %v3343_v27 = vpop.f32.mrb[47].mxu0  ;;  %v8170_v22 = vld [vmem:[%s9651_s7 + $0x8] sm:$0xff]  }
 0x3ea   :  { %3538 = vst.msk [vmem:[#allocation5 + $0xd] sm:$0xf] %vm3514_vm2, %v3537_v10  ;;  %v3483_v25 = vmax.f32 %v3460_v19, 0.0  ;;  %v3461_v26 = vadd.f32 %v9304_v17, %v3431_v20  ;;  %v3429_v29 = vmul.f32 %v9299_v15, %v3343_v27  ;;  %v3631_v47 = vld [vmem:[#allocation5 + $0x1] sm:$0xff]  ;;  %v8171_v27 = vld [vmem:[%s9651_s7 + $0x10] sm:$0xff]  }
 0x3eb   :  { %v3481_v28 = vmax.f32 %v3458_v40, 0.0  ;;  %v3549_v30 = vmax.f32 %v3543_v24, %v3548_v21 }
 0x3ec   :  { %3506 = vst.msk [vmem:[#allocation4 + $0x70] sm:$0xff] %vm140_vm1, %v3483_v25  ;;  %v3484_v31 = vmax.f32 %v3461_v26, 0.0  ;;  %v3459_v42 = vadd.f32 %v9304_v17, %v3429_v29 }
 0x3ed   :  { %3504 = vst.msk [vmem:[#allocation4 + $0x60] sm:$0xff] %vm140_vm1, %v3481_v28  ;;  %v7662_v53 = vpop.f32.mrb[48].mxu0 }
 0x3ee   :  { %v3552_v32 = vld [vmem:[#allocation4 + $0x3c] ss:$2 sm:$0xf]  ;;  %v3554_v33 = vld [vmem:[#allocation4 + $0x3d] ss:$2 sm:$0xf]  ;;  %v3434_v34 = vmul.f32 %v7662_v53, %v9299_v15 }
 0x3ef   :  { %3507 = vst.msk [vmem:[#allocation4 + $0x78] sm:$0xff] %vm140_vm1, %v3484_v31  ;;  %v3482_v35 = vmax.f32 %v3459_v42, 0.0  ;;  %v3356_v36 = vpop.f32.mrb[49].mxu0  ;;  %v3555_v44 = vmax.f32 %v3552_v32, %v3554_v33 }
 0x3f0   :  { %3550 = vst.msk [vmem:[#allocation5 + $0x13] sm:$0xf] %vm3514_vm2, %v3549_v30  ;;  %v3557_v37 = vld [vmem:[#allocation4 + $0x46] ss:$2 sm:$0xf]  ;;  %v3464_v41 = vadd.f32 %v9304_v17, %v3434_v34  ;;  %v3432_v43 = vmul.f32 %v9299_v15, %v3356_v36  ;;  %v7663_v46 = vpop.f32.mrb[50].mxu0 }
 0x3f1   :  { %v3559_v38 = vld [vmem:[#allocation4 + $0x47] ss:$2 sm:$0xf]  ;;  %3505 = vst.msk [vmem:[#allocation4 + $0x68] sm:$0xff] %vm140_vm1, %v3482_v35  ;;  %v3632_v48 = vld [vmem:[#allocation5 + $0x9] sm:$0xff]  ;;  %v3435_v51 = vmul.f32 %v7663_v46, %v9299_v15  ;;  %v3359_v52 = vpop.f32.mrb[51].mxu0 }
 0x3f2   :  { %v3560_v45 = vmax.f32 %v3557_v37, %v3559_v38  ;;  %v3487_v49 = vmax.f32 %v3464_v41, 0.0  ;;  %v3462_v50 = vadd.f32 %v9304_v17, %v3432_v43  ;;  %v3639_v54 = vpack.c.bf16 %v3632_v48, %v3631_v47  ;;  %v3635_v37 = vld [vmem:[#allocation5 + $0x21] sm:$0xff] }
 0x3f3   :  { %v3433_v56 = vmul.f32 %v9299_v15, %v3359_v52  ;;  %v3465_v58 = vadd.f32 %v9304_v17, %v3435_v51  ;;  %v9394_v41 = vld [vmem:[#allocation5 + $0x1e] sm:$0xff]  ;;  %v8173_v46 = vld [vmem:[%s9651_s7 + $0x40] sm:$0xff]  }
 0x3f4   :  { %v3561_v55 = vmax.f32 %v3555_v44, %v3560_v45  ;;  %3510 = vst.msk [vmem:[#allocation4 + $0x90] sm:$0xff] %vm140_vm1, %v3487_v49  ;;  %v3485_v57 = vmax.f32 %v3462_v50, 0.0  ;;  %7676 = vmatprep.mubr.msk.bf16.mxu1 %vm140_vm1, %v3639_v54  ;;  %v9404_v54 = vld [vmem:[#allocation5 + $0x8] sm:$0xff] }
 0x3f5   :  { %v3463_v59 = vadd.f32 %v9304_v17, %v3433_v56  ;;  %v3488_v60 = vmax.f32 %v3465_v58, 0.0  ;;  %v7666_v39 = vpop.f32.mrb[52].mxu0 }
 0x3f6   :  { %3562 = vst.msk [vmem:[#allocation5 + $0x19] sm:$0xf] %vm3514_vm2, %v3561_v55  ;;  %v3438_v62 = vmul.f32 %v7666_v39, %v9299_v15  ;;  %v3372_v63 = vpop.f32.mrb[53].mxu0  ;;  %v3576_v20 = vld [vmem:[#allocation4 + $0x78] ss:$2 sm:$0xf] }
 0x3f7   :  { %3508 = vst.msk [vmem:[#allocation4 + $0x80] sm:$0xff] %vm140_vm1, %v3485_v57  ;;  %v3486_v61 = vmax.f32 %v3463_v59, 0.0  ;;  %3511 = vst.msk [vmem:[#allocation4 + $0x98] sm:$0xff] %vm140_vm1, %v3488_v60  ;;  %v3436_v2 = vmul.f32 %v9299_v15, %v3372_v63  ;;  %v7667_v9 = vpop.f32.mrb[54].mxu0  ;;  %v3633_v18 = vld [vmem:[#allocation5 + $0x11] sm:$0xff]  ;;  %v3611_v59 = vld [vmem:[#allocation5] sm:$0xff] }
 0x3f8   :  { %v3564_v0 = vld [vmem:[#allocation4 + $0x64] ss:$2 sm:$0xf]  ;;  %v3566_v1 = vld [vmem:[#allocation4 + $0x65] ss:$2 sm:$0xf]  ;;  %v3468_v6 = vadd.f32 %v9304_v17, %v3438_v62  ;;  %v3619_v60 = vpack.c.bf16 %v9404_v54, %v3611_v59 }
 0x3f9   :  { %v3567_v3 = vmax.f32 %v3564_v0, %v3566_v1  ;;  %v3569_v4 = vld [vmem:[#allocation4 + $0x6e] ss:$2 sm:$0xf]  ;;  %v3571_v5 = vld [vmem:[#allocation4 + $0x6f] ss:$2 sm:$0xf]  ;;  %v3466_v8 = vadd.f32 %v9304_v17, %v3436_v2 }
 0x3fa   :  { %3509 = vst.msk [vmem:[#allocation4 + $0x88] sm:$0xff] %vm140_vm1, %v3486_v61  ;;  %v3572_v7 = vmax.f32 %v3569_v4, %v3571_v5  ;;  %v3491_v10 = vmax.f32 %v3468_v6, 0.0  ;;  %v3375_v11 = vpop.f32.mrb[55].mxu0  ;;  %v3578_v40 = vld [vmem:[#allocation4 + $0x79] ss:$2 sm:$0xf] }
 0x3fb   :  { %v3489_v13 = vmax.f32 %v3466_v8, 0.0  ;;  %v3437_v16 = vmul.f32 %v9299_v15, %v3375_v11  ;;  %v9379_v15 = vld [vmem:[#allocation5 + $0xe] sm:$0xff]  ;;  %v3579_v42 = vmax.f32 %v3576_v20, %v3578_v40  ;;  %v9418_v0 = vld [vmem:[#allocation5 + $0x20] sm:$0xff]  ;;  %v8175_v6 = vld [vmem:[%s9651_s7 + $0x50] sm:$0xff]  }
 0x3fc   :  { %v3573_v12 = vmax.f32 %v3567_v3, %v3572_v7  ;;  %3515 = vst.msk [vmem:[#allocation4 + $0xb0] sm:$0xf] %vm3514_vm2, %v3491_v10  ;;  %v9414_v62 = vld [vmem:[#allocation5 + $0x10] sm:$0xff]  ;;  %v3854_v11 = vld [vmem:[#allocation5 + $0x2] sm:$0xff] }
 0x3fd   :  { %v3634_v19 = vld [vmem:[#allocation5 + $0x19] sm:$0xff]  ;;  %3512 = vst.msk [vmem:[#allocation4 + $0xa0] sm:$0xff] %vm140_vm1, %v3489_v13  ;;  %v3467_v24 = vadd.f32 %v9304_v17, %v3437_v16  ;;  %v8174_v1 = vld [vmem:[%s9651_s7 + $0x48] sm:$0xff]   ;;  %v8177_v16 = vld [vmem:[%s9651_s7 + $0x60] sm:$0xff]  }
 0x3fe   :  { %v3640_v21 = vpack.c.bf16 %v3634_v19, %v3633_v18  ;;  %v9374_v23 = vld [vmem:[#allocation5 + $0x16] sm:$0xff]  ;;  %3574 = vst.msk [vmem:[#allocation5 + $0x2b] sm:$0xf] %vm3514_vm2, %v3573_v12  ;;  %v3593_v25 = vld [vmem:[#allocation4 + $0x96] ss:$2 sm:$0xf] }
 0x3ff   :  { %v3595_v26 = vld [vmem:[#allocation4 + $0x97] ss:$2 sm:$0xf]  ;;  %v4642_v28 = vpack.c.bf16 %v9374_v23, %v9379_v15  ;;  %v3490_v34 = vmax.f32 %v3467_v24, 0.0  ;;  %v9410_v39 = vld [vmem:[#allocation5 + $0x18] sm:$0xff]  ;;  %v8176_v12 = vld [vmem:[%s9651_s7 + $0x58] sm:$0xff]  }
 0x400   :  { %7677 = vmatmul.mubr.msk.bf16.vlgmr.msra.gmra.mrb[32].mxu1 %vm140_vm1, %v3640_v21  ;;  %v3596_v29 = vmax.f32 %v3593_v25, %v3595_v26  ;;  %v3620_v63 = vpack.c.bf16 %v9410_v39, %v9414_v62  ;;  %v3855_v9 = vld [vmem:[#allocation5 + $0xa] sm:$0xff]  ;;  %v3856_v18 = vld [vmem:[#allocation5 + $0x12] sm:$0xff]  ;;  %v3857_v19 = vld [vmem:[#allocation5 + $0x1a] sm:$0xff] }
 0x401   :  { %v3581_v30 = vld [vmem:[#allocation4 + $0x82] ss:$2 sm:$0xf]  ;;  %v3583_v31 = vld [vmem:[#allocation4 + $0x83] ss:$2 sm:$0xf]  ;;  %7685 = vmatpush3.bf16.msra.mxu1 %v9293_v14  ;;  %v3862_v13 = vpack.c.bf16 %v3855_v9, %v3854_v11 }
 0x402   :  { %v3584_v17 = vmax.f32 %v3581_v30, %v3583_v31  ;;  %v3588_v53 = vld [vmem:[#allocation4 + $0x8c] ss:$2 sm:$0xf]  ;;  %v3590_v32 = vld [vmem:[#allocation4 + $0x8d] ss:$2 sm:$0xf]  ;;  %7686 = vmatprep.subr.bf16.mxu1 %v8170_v22 }
 0x403   :  { %v3591_v33 = vmax.f32 %v3588_v53, %v3590_v32  ;;  %3513 = vst.msk [vmem:[#allocation4 + $0xa8] sm:$0xff] %vm140_vm1, %v3490_v34  ;;  %v8172_v14 = vld [vmem:[%s9651_s7 + $0x18] sm:$0xff]   ;;  %v8178_v40 = vld [vmem:[%s9651_s7 + $0x68] sm:$0xff]   ;;  %v8179_v25 = vld [vmem:[%s9651_s7 + $0x70] sm:$0xff]   ;;  %v3993_v53 = vpack.c.bf16 %v9394_v41, %v9374_v23 }
 0x404   :  { %v3585_v35 = vmax.f32 %v3579_v42, %v3584_v17  ;;  %v3600_v47 = vld [vmem:[#allocation4 + $0xa0] ss:$2 sm:$0xf]  ;;  %v3602_v48 = vld [vmem:[#allocation4 + $0xa1] ss:$2 sm:$0xf] }
 0x405   :  { %v3597_v36 = vmax.f32 %v3591_v33, %v3596_v29  ;;  %7687 = vmatpush3.bf16.msra.mxu1 %v8170_v22  ;;  %v3636_v38 = vld [vmem:[#allocation5 + $0x29] sm:$0xff]  ;;  %v3603_v51 = vmax.f32 %v3600_v47, %v3602_v48  ;;  %v3863_v22 = vpack.c.bf16 %v3857_v19, %v3856_v18  ;;  %v8180_v31 = vld [vmem:[%s9651_s7 + $0x78] sm:$0xff]   ;;  %v8183_v34 = vld [vmem:[%s9651_s7 + $0x90] sm:$0xff]  }
 0x406   :  { %3586 = vst.msk [vmem:[#allocation5 + $0x31] sm:$0xf] %vm3514_vm2, %v3585_v35  ;;  %7688 = vmatprep.subr.bf16.mxu1 %v8171_v27  ;;  %v9396_v43 = vld [vmem:[#allocation5 + $0x26] sm:$0xff]  ;;  %v3641_v44 = vpack.c.bf16 %v3636_v38, %v3635_v37  ;;  %v8182_v32 = vld [vmem:[%s9651_s7 + $0x88] sm:$0xff]   ;;  %v4376_v18 = vld [vmem:[#allocation5 + $0x1c] sm:$0xff] }
 0x407   :  { %3598 = vst.msk [vmem:[#allocation5 + $0x37] sm:$0xf] %vm3514_vm2, %v3597_v36  ;;  %v4643_v45 = vpack.c.bf16 %v9396_v43, %v9394_v41  ;;  %v9412_v61 = vld [vmem:[#allocation5 + $0x28] sm:$0xff]  ;;  %v8184_v38 = vld [vmem:[%s9651_s7 + $0x98] sm:$0xff]   ;;  %v4116_v47 = vld [vmem:[#allocation5 + $0x17] sm:$0xff] }
 0x408   :  { %7680 = vmatprep.mubr.msk.bf16.mxu1 %vm140_vm1, %v3641_v44  ;;  %v3621_v2 = vpack.c.bf16 %v9412_v61, %v9418_v0  ;;  %v3858_v20 = vld [vmem:[#allocation5 + $0x22] sm:$0xff]  ;;  %v4115_v36 = vld [vmem:[#allocation5 + $0xf] sm:$0xff] }
 0x409   :  { %7689 = vmatpush3.bf16.msra.mxu1 %v8171_v27  ;;  %v3984_v30 = vld [vmem:[#allocation5 + $0x6] sm:$0xff] }
 0x40a   :  { %7690 = vmatprep.subr.bf16.mxu1 %v8172_v14  ;;  %v3605_v49 = vld [vmem:[#allocation4 + $0xaa] ss:$2 sm:$0xf]  ;;  %v3607_v50 = vld [vmem:[#allocation4 + $0xab] ss:$2 sm:$0xf]  ;;  %v3992_v42 = vpack.c.bf16 %v9379_v15, %v3984_v30 }
 0x40b   :  { %v3608_v52 = vmax.f32 %v3605_v49, %v3607_v50  ;;  %v8181_v17 = vld [vmem:[%s9651_s7 + $0x80] sm:$0xff]   ;;  %v4117_v48 = vld [vmem:[#allocation5 + $0x1f] sm:$0xff] }
 0x40c   :  { %v4123_v50 = vpack.c.bf16 %v4117_v48, %v4116_v47  ;;  %v8193_v11 = vld [vmem:[%s9651_s7 + $0xe0] sm:$0xff]   ;;  %v8201_v47 = vld [vmem:[#allocation12] ss:$8 sps:$4 sm:$0xff]   ;;  %v8209_v15 = vld [vmem:[#allocation12 + $0x24] ss:$8 sps:$4 sm:$0xff]  }
 0x40d   :  { %7691 = vmatpush3.bf16.msra.mxu1 %v8172_v14  ;;  %v3609_v57 = vmax.f32 %v3603_v51, %v3608_v52  ;;  %v9425_v3 = vld [vmem:[#allocation5 + $0x2e] sm:$0xff]  ;;  %v8204_v23 = vld [vmem:[#allocation12 + $0x10] ss:$8 sps:$4 sm:$0xff]  }
 0x40e   :  { %v3637_v55 = vld [vmem:[#allocation5 + $0x31] sm:$0xff]  ;;  %v3638_v56 = vld [vmem:[#allocation5 + $0x39] sm:$0xf]  ;;  %7700 = vmatprep.subr.bf16.mxu1 %v8173_v46  ;;  %v3994_v33 = vpack.c.bf16 %v9425_v3, %v9396_v43  ;;  %v4114_v14 = vld [vmem:[#allocation5 + $0x7] sm:$0xff] }
 0x40f   :  { %v3642_v58 = vpack.c.bf16 %v3638_v56, %v3637_v55  ;;  %3610 = vst.msk [vmem:[#allocation5 + $0x3d] sm:$0xf] %vm3514_vm2, %v3609_v57  ;;  %v9436_v7 = vld [vmem:[#allocation5 + $0x30] sm:$0xff]  ;;  %v3618_v8 = vld [vmem:[#allocation5 + $0x38] sm:$0xf]  ;;  %v4122_v44 = vpack.c.bf16 %v4115_v36, %v4114_v14  ;;  %v4118_v51 = vld [vmem:[#allocation5 + $0x27] sm:$0xff] }
 0x410   :  { %v3622_v10 = vpack.c.bf16 %v3618_v8, %v9436_v7  ;;  %v3859_v21 = vld [vmem:[#allocation5 + $0x2a] sm:$0xff]  ;;  %v3860_v27 = vld [vmem:[#allocation5 + $0x32] sm:$0xff]  ;;  %v4511_v14 = vld [vmem:[#allocation5 + $0x45] sm:$0xf] }
 0x411   :  { %7681 = vmatmul.mubr.msk.bf16.gmra.mrb[36].mxu1 %vm140_vm1, %v3642_v58  ;;  %v3864_v24 = vpack.c.bf16 %v3859_v21, %v3858_v20  ;;  %v4119_v49 = vld [vmem:[#allocation5 + $0x2f] sm:$0xff]  ;;  %v8187_v56 = vld [vmem:[%s9651_s7 + $0xb0] sm:$0xff]   ;;  %v8210_v41 = vld [vmem:[#allocation12 + $0x30] ss:$8 sps:$4 sm:$0xff]  }
 0x412   :  { %7692 = vmatprep.mubr.msk.bf16.mxu1 %vm140_vm1, %v3619_v60  ;;  %v8186_v52 = vld [vmem:[%s9651_s7 + $0xa8] sm:$0xff]   ;;  %v4124_v55 = vpack.c.bf16 %v4119_v49, %v4118_v51  ;;  %v8188_v60 = vld [vmem:[%s9651_s7 + $0xb8] sm:$0xff]   ;;  %v8199_v36 = vld [vmem:[%s9651_s7 + $0x110] sm:$0xff]  }
 0x413   :  { %v8194_v20 = vld [vmem:[%s9651_s7 + $0xe8] sm:$0xff]   ;;  %v8206_v48 = vld [vmem:[#allocation12 + $0x14] ss:$8 sps:$4 sm:$0xff]  }
 0x414   :  { %v4641_v49 = vld [vmem:[#allocation5 + $0x46] sm:$0xf]  ;;  %v8215_v43 = vld [vmem:[#allocation12 + $0x44] ss:$8 sps:$4 sm:$0xff]  }
 0x416   :  { %v9427_v4 = vld [vmem:[#allocation5 + $0x36] sm:$0xff]  ;;  %v3991_v35 = vld [vmem:[#allocation5 + $0x3e] sm:$0xf] }
 0x417   :  { %v4644_v5 = vpack.c.bf16 %v9427_v4, %v9425_v3  ;;  %v3861_v26 = vld [vmem:[#allocation5 + $0x3a] sm:$0xf]  ;;  %v3995_v37 = vpack.c.bf16 %v3991_v35, %v9427_v4  ;;  %v4121_v58 = vld [vmem:[#allocation5 + $0x3f] sm:$0xf]  ;;  %v8218_v3 = vld [vmem:[#allocation12 + $0x54] ss:$8 sps:$4 sm:$0xff]  }
 0x418   :  { %v3865_v29 = vpack.c.bf16 %v3861_v26, %v3860_v27  ;;  %v4120_v57 = vld [vmem:[#allocation5 + $0x37] sm:$0xff]  ;;  %v4251_v9 = vld [vmem:[#allocation5 + $0x40] sm:$0xf]  ;;  %v4504_v27 = vld [vmem:[#allocation5 + $0xd] sm:$0xff] }
 0x419   :  { %7693 = vmatmul.mubr.msk.bf16.vlgmr.msra.gmra.mrb[32].mxu1 %vm140_vm1, %v3620_v63  ;;  %v4125_v59 = vpack.c.bf16 %v4121_v58, %v4120_v57  ;;  %v4252_v63 = vpack.c.bf16 %v9414_v62, %v9404_v54  ;;  %v4254_v54 = vpack.c.bf16 %v9436_v7, %v9412_v61  ;;  %v8191_v62 = vld [vmem:[%s9651_s7 + $0xd0] sm:$0xff]   ;;  %v8192_v61 = vld [vmem:[%s9651_s7 + $0xd8] sm:$0xff]  }
 0x41a   :  { %7701 = vmatpush3.bf16.msra.mxu1 %v8173_v46  ;;  %7696 = vmatprep.mubr.msk.bf16.mxu1 %vm140_vm1, %v3621_v2  ;;  %v8185_v46 = vld [vmem:[%s9651_s7 + $0xa0] sm:$0xff]   ;;  %v4253_v2 = vpack.c.bf16 %v9418_v0, %v9410_v39  ;;  %v4250_v8 = vld [vmem:[#allocation5 + $0x38] sm:$0xff] }
 0x41b   :  { %7702 = vmatprep.subr.bf16.mxu1 %v8174_v1  ;;  %v4375_v39 = vld [vmem:[#allocation5 + $0x14] sm:$0xff]  ;;  %v4255_v0 = vpack.c.bf16 %v4251_v9, %v4250_v8  ;;  %v8216_v4 = vld [vmem:[#allocation12 + $0x50] ss:$8 sps:$4 sm:$0xff]   ;;  %v8242_v9 = vld [vmem:[#allocation12 + $0xd4] ss:$8 sps:$4 sm:$0xff]  }
 0x41c   :  { %v8222_v57 = vld [vmem:[#allocation12 + $0x70] ss:$8 sps:$4 sm:$0xff]   ;;  %v8225_v58 = vld [vmem:[#allocation12 + $0x80] ss:$8 sps:$4 sm:$0xff]  }
 0x41d   :  { %v8237_v8 = vld [vmem:[#allocation12 + $0xc0] ss:$8 sps:$4 sm:$0xff]  }
 0x41e   :  { %7703 = vmatpush3.bf16.msra.mxu1 %v8174_v1  ;;  %v8189_v1 = vld [vmem:[%s9651_s7 + $0xc0] sm:$0xff]  }
 0x41f   :  { %7704 = vmatprep.subr.bf16.mxu1 %v8175_v6 }
 0x421   :  { %7697 = vmatmul.mubr.msk.bf16.gmra.mrb[36].mxu1 %vm140_vm1, %v3622_v10  ;;  %v4374_v10 = vld [vmem:[#allocation5 + $0xc] sm:$0xff] }
 0x422   :  { %7705 = vmatpush3.bf16.msra.mxu1 %v8175_v6  ;;  %7708 = vmatprep.mubr.msk.bf16.mxu1 %vm140_vm1, %v3862_v13  ;;  %v8190_v6 = vld [vmem:[%s9651_s7 + $0xc8] sm:$0xff]   ;;  %v4382_v7 = vpack.c.bf16 %v4375_v39, %v4374_v10  ;;  %v8240_v39 = vld [vmem:[#allocation12 + $0xd0] ss:$8 sps:$4 sm:$0xff]  }
 0x423   :  { %7706 = vmatprep.subr.bf16.mxu1 %v8176_v12  ;;  %v4378_v13 = vld [vmem:[#allocation5 + $0x2c] sm:$0xff] }
 0x424   :  { %v8243_v10 = vld [vmem:[#allocation12 + $0xe0] ss:$8 sps:$4 sm:$0xff]  }
 0x426   :  { %7707 = vmatpush3.bf16.msra.mxu1 %v8176_v12  ;;  %v4377_v12 = vld [vmem:[#allocation5 + $0x24] sm:$0xff] }
 0x427   :  { %7716 = vmatprep.subr.bf16.mxu1 %v8177_v16  ;;  %v4383_v19 = vpack.c.bf16 %v4377_v12, %v4376_v18  ;;  %v6893_v12 = vld [vmem:[%s9652_s8] ss:$0 sm:$0xff] }
 0x429   :  { %7709 = vmatmul.mubr.msk.bf16.vlgmr.msra.gmra.mrb[32].mxu1 %vm140_vm1, %v3863_v22  ;;  %v8195_v22 = vld [vmem:[%s9651_s7 + $0xf0] sm:$0xff]  }
 0x42a   :  { %7717 = vmatpush3.bf16.msra.mxu1 %v8177_v16  ;;  %7712 = vmatprep.mubr.msk.bf16.mxu1 %vm140_vm1, %v3864_v24  ;;  %v4379_v16 = vld [vmem:[#allocation5 + $0x34] sm:$0xff]  ;;  %v4381_v24 = vld [vmem:[#allocation5 + $0x44] sm:$0xf] }
 0x42b   :  { %7718 = vmatprep.subr.bf16.mxu1 %v8178_v40  ;;  %v4384_v21 = vpack.c.bf16 %v4379_v16, %v4378_v13  ;;  %v6894_v16 = vld [vmem:[%s9653_s9] ss:$0 sm:$0xff] }
 0x42e   :  { %7719 = vmatpush3.bf16.msra.mxu1 %v8178_v40  ;;  %v4380_v40 = vld [vmem:[#allocation5 + $0x3c] sm:$0xff] }
 0x42f   :  { %7720 = vmatprep.subr.bf16.mxu1 %v8179_v25  ;;  %v4385_v26 = vpack.c.bf16 %v4381_v24, %v4380_v40 }
 0x431   :  { %7713 = vmatmul.mubr.msk.bf16.gmra.mrb[36].mxu1 %vm140_vm1, %v3865_v29  ;;  %v8196_v29 = vld [vmem:[%s9651_s7 + $0xf8] sm:$0xff]  }
 0x432   :  { %7721 = vmatpush3.bf16.msra.mxu1 %v8179_v25  ;;  %7724 = vmatprep.mubr.msk.bf16.mxu1 %vm140_vm1, %v3992_v42  ;;  %v4505_v25 = vld [vmem:[#allocation5 + $0x15] sm:$0xff]  ;;  %v4506_v42 = vld [vmem:[#allocation5 + $0x1d] sm:$0xff] }
 0x433   :  { %7722 = vmatprep.subr.bf16.mxu1 %v8180_v31  ;;  %v4512_v30 = vpack.c.bf16 %v4505_v25, %v4504_v27 }
 0x436   :  { %7723 = vmatpush3.bf16.msra.mxu1 %v8180_v31  ;;  %v8197_v31 = vld [vmem:[%s9651_s7 + $0x100] sm:$0xff]  }
 0x437   :  { %7732 = vmatprep.subr.bf16.mxu1 %v8181_v17 }
 0x439   :  { %7725 = vmatmul.mubr.msk.bf16.vlgmr.msra.gmra.mrb[32].mxu1 %vm140_vm1, %v3993_v53  ;;  %v4508_v53 = vld [vmem:[#allocation5 + $0x2d] sm:$0xff] }
 0x43a   :  { %7733 = vmatpush3.bf16.msra.mxu1 %v8181_v17  ;;  %7728 = vmatprep.mubr.msk.bf16.mxu1 %vm140_vm1, %v3994_v33  ;;  %v4507_v17 = vld [vmem:[#allocation5 + $0x25] sm:$0xff] }
 0x43b   :  { %7734 = vmatprep.subr.bf16.mxu1 %v8182_v32  ;;  %v4513_v33 = vpack.c.bf16 %v4507_v17, %v4506_v42 }
 0x43e   :  { %7735 = vmatpush3.bf16.msra.mxu1 %v8182_v32  ;;  %v4509_v32 = vld [vmem:[#allocation5 + $0x35] sm:$0xff] }
 0x43f   :  { %7736 = vmatprep.subr.bf16.mxu1 %v8183_v34  ;;  %v4514_v35 = vpack.c.bf16 %v4509_v32, %v4508_v53 }
 0x441   :  { %7729 = vmatmul.mubr.msk.bf16.gmra.mrb[36].mxu1 %vm140_vm1, %v3995_v37  ;;  %v4510_v37 = vld [vmem:[#allocation5 + $0x3d] sm:$0xff] }
 0x442   :  { %7737 = vmatpush3.bf16.msra.mxu1 %v8183_v34  ;;  %7740 = vmatprep.mubr.msk.bf16.mxu1 %vm140_vm1, %v4122_v44  ;;  %v8198_v34 = vld [vmem:[%s9651_s7 + $0x108] sm:$0xff]   ;;  %v8200_v44 = vld [vmem:[%s9651_s7 + $0x118] sm:$0xff]  }
 0x443   :  { %7738 = vmatprep.subr.bf16.mxu1 %v8184_v38 }
 0x446   :  { %7739 = vmatpush3.bf16.msra.mxu1 %v8184_v38  ;;  %v4515_v38 = vpack.c.bf16 %v4511_v14, %v4510_v37 }
 0x447   :  { %7748 = vmatprep.subr.bf16.mxu1 %v8185_v46 }
 0x449   :  { %7741 = vmatmul.mubr.msk.bf16.vlgmr.msra.gmra.mrb[32].mxu1 %vm140_vm1, %v4123_v50  ;;  %v8207_v50 = vld [vmem:[#allocation12 + $0x20] ss:$8 sps:$4 sm:$0xff]  }
 0x44a   :  { %7749 = vmatpush3.bf16.msra.mxu1 %v8185_v46  ;;  %7744 = vmatprep.mubr.msk.bf16.mxu1 %vm140_vm1, %v4124_v55  ;;  %v8203_v46 = vld [vmem:[#allocation12 + $0x4] ss:$8 sps:$4 sm:$0xff]   ;;  %v8219_v55 = vld [vmem:[#allocation12 + $0x60] ss:$8 sps:$4 sm:$0xff]  }
 0x44b   :  { %7750 = vmatprep.subr.bf16.mxu1 %v8186_v52 }
 0x44e   :  { %7751 = vmatpush3.bf16.msra.mxu1 %v8186_v52  ;;  %v8212_v52 = vld [vmem:[#allocation12 + $0x34] ss:$8 sps:$4 sm:$0xff]  }
 0x44f   :  { %7752 = vmatprep.subr.bf16.mxu1 %v8187_v56 }
 0x451   :  { %7745 = vmatmul.mubr.msk.bf16.gmra.mrb[36].mxu1 %vm140_vm1, %v4125_v59  ;;  %v8227_v59 = vld [vmem:[#allocation12 + $0x84] ss:$8 sps:$4 sm:$0xff]  }
 0x452   :  { %7753 = vmatpush3.bf16.msra.mxu1 %v8187_v56  ;;  %7756 = vmatprep.mubr.msk.bf16.mxu1 %vm140_vm1, %v4252_v63  ;;  %v8224_v56 = vld [vmem:[#allocation12 + $0x74] ss:$8 sps:$4 sm:$0xff]  }
 0x453   :  { %7754 = vmatprep.subr.bf16.mxu1 %v8188_v60  ;;  %v8230_v63 = vld [vmem:[#allocation12 + $0x94] ss:$8 sps:$4 sm:$0xff]  }
 0x456   :  { %7755 = vmatpush3.bf16.msra.mxu1 %v8188_v60  ;;  %v8228_v60 = vld [vmem:[#allocation12 + $0x90] ss:$8 sps:$4 sm:$0xff]  }
 0x457   :  { %7764 = vmatprep.subr.bf16.mxu1 %v8189_v1 }
 0x459   :  { %7757 = vmatmul.mubr.msk.bf16.vlgmr.msra.gmra.mrb[32].mxu1 %vm140_vm1, %v4253_v2  ;;  %v8231_v2 = vld [vmem:[#allocation12 + $0xa0] ss:$8 sps:$4 sm:$0xff]  }
 0x45a   :  { %7765 = vmatpush3.bf16.msra.mxu1 %v8189_v1  ;;  %7760 = vmatprep.mubr.msk.bf16.mxu1 %vm140_vm1, %v4254_v54  ;;  %v8233_v1 = vld [vmem:[#allocation12 + $0xa4] ss:$8 sps:$4 sm:$0xff]   ;;  %v8236_v54 = vld [vmem:[#allocation12 + $0xb4] ss:$8 sps:$4 sm:$0xff]  }
 0x45b   :  { %7766 = vmatprep.subr.bf16.mxu1 %v8190_v6 }
 0x45e   :  { %7767 = vmatpush3.bf16.msra.mxu1 %v8190_v6  ;;  %v8234_v6 = vld [vmem:[#allocation12 + $0xb0] ss:$8 sps:$4 sm:$0xff]  }
 0x45f   :  { %7768 = vmatprep.subr.bf16.mxu1 %v8191_v62 }
 0x461   :  { %7761 = vmatmul.mubr.msk.bf16.gmra.mrb[36].mxu1 %vm140_vm1, %v4255_v0  ;;  %v8245_v0 = vld [vmem:[#allocation12 + $0xe4] ss:$8 sps:$4 sm:$0xff]  }
 0x462   :  { %7769 = vmatpush3.bf16.msra.mxu1 %v8191_v62  ;;  %7772 = vmatprep.mubr.msk.bf16.mxu1 %vm140_vm1, %v4382_v7  ;;  %v8239_v62 = vld [vmem:[#allocation12 + $0xc4] ss:$8 sps:$4 sm:$0xff]   ;;  %v8246_v7 = vld [vmem:[#allocation12 + $0xf0] ss:$8 sps:$4 sm:$0xff]  }
 0x463   :  { %7770 = vmatprep.subr.bf16.mxu1 %v8192_v61 }
 0x466   :  { %7771 = vmatpush3.bf16.msra.mxu1 %v8192_v61  ;;  %v8248_v61 = vld [vmem:[#allocation12 + $0xf4] ss:$8 sps:$4 sm:$0xff]  }
 0x467   :  { %7780 = vmatprep.subr.bf16.mxu1 %v8193_v11 }
 0x469   :  { %7773 = vmatmul.mubr.msk.bf16.vlgmr.msra.gmra.mrb[32].mxu1 %vm140_vm1, %v4383_v19 }
 0x46a   :  { %7781 = vmatpush3.bf16.msra.mxu1 %v8193_v11  ;;  %7776 = vmatprep.mubr.msk.bf16.mxu1 %vm140_vm1, %v4384_v21  ;;  %v8251_v11 = vld [vmem:[#allocation12 + $0x104] ss:$8 sps:$4 sm:$0xff]  }
 0x46b   :  { %7782 = vmatprep.subr.bf16.mxu1 %v8194_v20 }
 0x46e   :  { %7783 = vmatpush3.bf16.msra.mxu1 %v8194_v20 }
 0x46f   :  { %7784 = vmatprep.subr.bf16.mxu1 %v8195_v22 }
 0x471   :  { %7777 = vmatmul.mubr.msk.bf16.gmra.mrb[36].mxu1 %vm140_vm1, %v4385_v26 }
 0x472   :  { %7785 = vmatpush3.bf16.msra.mxu1 %v8195_v22  ;;  %7788 = vmatprep.mubr.msk.bf16.mxu1 %vm140_vm1, %v4512_v30 }
 0x473   :  { %7786 = vmatprep.subr.bf16.mxu1 %v8196_v29 }
 0x476   :  { %7787 = vmatpush3.bf16.msra.mxu1 %v8196_v29 }
 0x477   :  { %7796 = vmatprep.subr.bf16.mxu1 %v8197_v31 }
 0x479   :  { %7789 = vmatmul.mubr.msk.bf16.vlgmr.msra.gmra.mrb[32].mxu1 %vm140_vm1, %v4513_v33 }
 0x47a   :  { %7797 = vmatpush3.bf16.msra.mxu1 %v8197_v31  ;;  %7792 = vmatprep.mubr.msk.bf16.mxu1 %vm140_vm1, %v4514_v35 }
 0x47b   :  { %7798 = vmatprep.subr.bf16.mxu1 %v8198_v34 }
 0x47e   :  { %7799 = vmatpush3.bf16.msra.mxu1 %v8198_v34 }
 0x47f   :  { %7800 = vmatprep.subr.bf16.mxu1 %v8199_v36 }
 0x481   :  { %7793 = vmatmul.mubr.msk.bf16.gmra.mrb[36].mxu1 %vm140_vm1, %v4515_v38 }
 0x482   :  { %7801 = vmatpush3.bf16.msra.mxu1 %v8199_v36  ;;  %7804 = vmatprep.mubr.msk.bf16.mxu1 %vm140_vm1, %v4642_v28  ;;  %v4640_v28 = vld [vmem:[#allocation5 + $0x3e] sm:$0xff] }
 0x483   :  { %7802 = vmatprep.subr.bf16.mxu1 %v8200_v44  ;;  %v4645_v51 = vpack.c.bf16 %v4641_v49, %v4640_v28 }
 0x486   :  { %7803 = vmatpush3.bf16.msra.mxu1 %v8200_v44 }
 0x487   :  { %5760 = vmatprep.subr.bf16.mxu1 %v8203_v46 }
 0x489   :  { %7805 = vmatmul.mubr.msk.bf16.vlgmr.msra.gmra.mrb[32].mxu1 %vm140_vm1, %v4643_v45  ;;  %v8213_v45 = vld [vmem:[#allocation12 + $0x40] ss:$8 sps:$4 sm:$0xff]  }
 0x48a   :  { %7808 = vmatprep.mubr.msk.bf16.mxu1 %vm140_vm1, %v4644_v5  ;;  %5761 = vmatpush1.bf16.msra.mxu1 %v8201_v47  ;;  %v8221_v5 = vld [vmem:[#allocation12 + $0x64] ss:$8 sps:$4 sm:$0xff]  }
 0x48b   :  { %5762 = vmatprep.subr.bf16.mxu1 %v8206_v48 }
 0x48e   :  { %5763 = vmatpush1.bf16.msra.mxu1 %v8204_v23 }
 0x48f   :  { %5764 = vmatprep.subr.bf16.mxu1 %v8209_v15 }
 0x491   :  { %7809 = vmatmul.mubr.msk.bf16.gmra.mrb[36].mxu1 %vm140_vm1, %v4645_v51 }
 0x492   :  { %5765 = vmatpush1.bf16.msra.mxu1 %v8207_v50 }
 0x493   :  { %5766 = vmatprep.subr.bf16.mxu1 %v8212_v52 }
 0x496   :  { %5767 = vmatpush1.bf16.msra.mxu1 %v8210_v41 }
 0x497   :  { %5768 = vmatprep.subr.bf16.mxu1 %v8215_v43 }
 0x49a   :  { %5769 = vmatpush1.bf16.msra.mxu1 %v8213_v45 }
 0x49b   :  { %5770 = vmatprep.subr.bf16.mxu1 %v8218_v3 }
 0x49e   :  { %5771 = vmatpush1.bf16.msra.mxu1 %v8216_v4 }
 0x49f   :  { %5772 = vmatprep.subr.bf16.mxu1 %v8221_v5 }
 0x4a2   :  { %5773 = vmatpush1.bf16.msra.mxu1 %v8219_v55 }
 0x4a3   :  { %5774 = vmatprep.subr.bf16.mxu1 %v8224_v56 }
 0x4a6   :  { %5775 = vmatpush1.bf16.msra.mxu1 %v8222_v57 }
 0x4a7   :  { %5776 = vmatprep.subr.bf16.mxu1 %v8227_v59 }
 0x4aa   :  { %5777 = vmatpush1.bf16.msra.mxu1 %v8225_v58 }
 0x4ab   :  { %5778 = vmatprep.subr.bf16.mxu1 %v8230_v63 }
 0x4ae   :  { %5779 = vmatpush1.bf16.msra.mxu1 %v8228_v60 }
 0x4af   :  { %5780 = vmatprep.subr.bf16.mxu1 %v8233_v1 }
 0x4b2   :  { %5781 = vmatpush1.bf16.msra.mxu1 %v8231_v2 }
 0x4b3   :  { %5782 = vmatprep.subr.bf16.mxu1 %v8236_v54 }
 0x4b6   :  { %5783 = vmatpush1.bf16.msra.mxu1 %v8234_v6 }
 0x4b7   :  { %5784 = vmatprep.subr.bf16.mxu1 %v8239_v62 }
 0x4ba   :  { %5785 = vmatpush1.bf16.msra.mxu1 %v8237_v8 }
 0x4bb   :  { %5786 = vmatprep.subr.bf16.mxu1 %v8242_v9 }
 0x4be   :  { %5787 = vmatpush1.bf16.msra.mxu1 %v8240_v39 }
 0x4bf   :  { %5788 = vmatprep.subr.bf16.mxu1 %v8245_v0 }
 0x4c2   :  { %5789 = vmatpush1.bf16.msra.mxu1 %v8243_v10 }
 0x4c3   :  { %5790 = vmatprep.subr.bf16.mxu1 %v8248_v61 }
 0x4c6   :  { %5791 = vmatpush1.bf16.msra.mxu1 %v8246_v7 }
 0x4c7   :  { %5811 = vmatprep.subr.bf16.mxu1 %v8251_v11 }
 0x55c   :  { %v7806_v13 = vpop.f32.mrb[32].mxu1 }
 0x55d   :  { %v4773_v18 = vmul.f32 %v7806_v13, %v6893_v12  ;;  %v4725_v19 = vpop.f32.mrb[33].mxu1 }
 0x55e   :  { %v4771_v20 = vmul.f32 %v6893_v12, %v4725_v19  ;;  %v7807_v21 = vpop.f32.mrb[34].mxu1  ;;  %v8257_v19 = vld [vmem:[#allocation12 + $0x124] ss:$8 sps:$4 sm:$0xff]  }
 0x55f   :  { %v4788_v22 = vadd.f32 %v6894_v16, %v4773_v18  ;;  %v4728_v40 = vpop.f32.mrb[35].mxu1  ;;  %v8252_v18 = vld [vmem:[#allocation12 + $0x110] ss:$8 sps:$4 sm:$0xff]  }
 0x560   :  { %v4786_v24 = vadd.f32 %v6894_v16, %v4771_v20  ;;  %v4772_v25 = vmul.f32 %v6893_v12, %v4728_v40  ;;  %v4867_v20 = vld [vmem:[#allocation7 + $0xc] sm:$0xff] }
 0x561   :  { %v4796_v26 = vmax.f32 %v4788_v22, 0.0 }
 0x562   :  { %v4794_v27 = vmax.f32 %v4786_v24, 0.0  ;;  %v4787_v29 = vadd.f32 %v6894_v16, %v4772_v25  ;;  %v8255_v25 = vld [vmem:[#allocation12 + $0x120] ss:$8 sps:$4 sm:$0xff]  }
 0x563   :  { %4804 = vst [vmem:[#allocation6 + $0x10] sm:$0xff] %v4796_v26 }
 0x564   :  { %4802 = vst [vmem:[#allocation6] sm:$0xff] %v4794_v27  ;;  %v4795_v30 = vmax.f32 %v4787_v29, 0.0  ;;  %v7810_v31 = vpop.f32.mrb[36].mxu1 }
 0x565   :  { %v4777_v42 = vmul.f32 %v7810_v31, %v6893_v12  ;;  %v4741_v17 = vpop.f32.mrb[37].mxu1  ;;  %v8260_v31 = vld [vmem:[#allocation12 + $0x134] ss:$8 sps:$4 sm:$0xff]  }
 0x566   :  { %4803 = vst [vmem:[#allocation6 + $0x8] sm:$0xff] %v4795_v30  ;;  %v4775_v53 = vmul.f32 %v6893_v12, %v4741_v17  ;;  %v7811_v32 = vpop.f32.mrb[38].mxu1 }
 0x567   :  { %v4792_v33 = vadd.f32 %v6894_v16, %v4777_v42  ;;  %v4778_v34 = vmul.f32 %v7811_v32, %v6893_v12  ;;  %v4744_v35 = vpop.f32.mrb[39].mxu1  ;;  %v8258_v32 = vld [vmem:[#allocation12 + $0x130] ss:$8 sps:$4 sm:$0xff]  }
 0x568   :  { %v4790_v36 = vadd.f32 %v6894_v16, %v4775_v53  ;;  %v4776_v37 = vmul.f32 %v6893_v12, %v4744_v35  ;;  %v8249_v12 = vld [vmem:[#allocation12 + $0x100] ss:$8 sps:$4 sm:$0xff]   ;;  %v8266_v35 = vld [vmem:[#allocation12 + $0x154] ss:$8 sps:$4 sm:$0xff]  }
 0x569   :  { %v4800_v14 = vmax.f32 %v4792_v33, 0.0  ;;  %v4793_v38 = vadd.f32 %v6894_v16, %v4778_v34  ;;  %v8263_v33 = vld [vmem:[#allocation12 + $0x144] ss:$8 sps:$4 sm:$0xff]   ;;  %v8261_v34 = vld [vmem:[#allocation12 + $0x140] ss:$8 sps:$4 sm:$0xff]  }
 0x56a   :  { %v4827_v44 = vld [vmem:[#allocation6 + $0x12] ss:$2 sm:$0x3]  ;;  %v4791_v46 = vadd.f32 %v6894_v16, %v4776_v37  ;;  %v4829_v23 = vld [vmem:[#allocation6 + $0x13] ss:$2 sm:$0x3] }
 0x56b   :  { %v4810_v47 = vld [vmem:[#allocation6] ss:$2 sm:$0x3]  ;;  %v4812_v48 = vld [vmem:[#allocation6 + $0x1] ss:$2 sm:$0x3]  ;;  %v4830_v3 = vmax.f32 %v4827_v44, %v4829_v23 }
 0x56c   :  { %4808 = vst [vmem:[#allocation6 + $0x30] sm:$0xff] %v4800_v14  ;;  %v4798_v15 = vmax.f32 %v4790_v36, 0.0  ;;  %v4801_v28 = vmax.f32 %v4793_v38, 0.0  ;;  %v4799_v49 = vmax.f32 %v4791_v46, 0.0  ;;  %v4813_v52 = vmax.f32 %v4810_v47, %v4812_v48  ;;  %v8254_v16 = vld [vmem:[#allocation12 + $0x114] ss:$8 sps:$4 sm:$0xff]  }
 0x56d   :  { %v4815_v50 = vld [vmem:[#allocation6 + $0x6] ss:$2 sm:$0x3]  ;;  %v4817_v51 = vld [vmem:[#allocation6 + $0x7] ss:$2 sm:$0x3] }
 0x56e   :  { %v4818_v41 = vmax.f32 %v4815_v50, %v4817_v51  ;;  %v4822_v43 = vld [vmem:[#allocation6 + $0xc] ss:$2 sm:$0x3]  ;;  %v4824_v45 = vld [vmem:[#allocation6 + $0xd] ss:$2 sm:$0x3] }
 0x56f   :  { %4806 = vst [vmem:[#allocation6 + $0x20] sm:$0xff] %v4798_v15  ;;  %4809 = vst [vmem:[#allocation6 + $0x38] sm:$0xf] %v4801_v28  ;;  %v4825_v4 = vmax.f32 %v4822_v43, %v4824_v45  ;;  %v8264_v36 = vld [vmem:[#allocation12 + $0x150] ss:$8 sps:$4 sm:$0xff]  }
 0x570   :  { %4807 = vst [vmem:[#allocation6 + $0x28] sm:$0xff] %v4799_v49  ;;  %v4819_v5 = vmax.f32 %v4813_v52, %v4818_v41  ;;  %v8269_v37 = vld [vmem:[#allocation12 + $0x164] ss:$8 sps:$4 sm:$0xff]   ;;  %v8267_v14 = vld [vmem:[#allocation12 + $0x160] ss:$8 sps:$4 sm:$0xff]  }
 0x571   :  { %v4831_v55 = vmax.f32 %v4825_v4, %v4830_v3  ;;  %v8272_v38 = vld [vmem:[#allocation12 + $0x174] ss:$8 sps:$4 sm:$0xff]   ;;  %v8270_v44 = vld [vmem:[#allocation12 + $0x170] ss:$8 sps:$4 sm:$0xff]   ;;  %v8275_v46 = vld [vmem:[#allocation12 + $0x184] ss:$8 sps:$4 sm:$0xff]  }
 0x572   :  { %4820 = vst [vmem:[#allocation7 + $0x5] sm:$0x3] %v4819_v5  ;;  %v8273_v47 = vld [vmem:[#allocation12 + $0x180] ss:$8 sps:$4 sm:$0xff]   ;;  %v8278_v48 = vld [vmem:[#allocation12 + $0x194] ss:$8 sps:$4 sm:$0xff]  }
 0x573   :  { %4832 = vst [vmem:[#allocation7 + $0x9] sm:$0x3] %v4831_v55  ;;  %v4846_v56 = vld [vmem:[#allocation6 + $0x30] ss:$2 sm:$0x3] }
 0x574   :  { %v4848_v57 = vld [vmem:[#allocation6 + $0x31] ss:$2 sm:$0x3]  ;;  %v8281_v15 = vld [vmem:[#allocation12 + $0x1a4] ss:$8 sps:$4 sm:$0xff]  }
 0x575   :  { %v4849_v1 = vmax.f32 %v4846_v56, %v4848_v57  ;;  %v8276_v23 = vld [vmem:[#allocation12 + $0x190] ss:$8 sps:$4 sm:$0xff]   ;;  %v8279_v28 = vld [vmem:[#allocation12 + $0x1a0] ss:$8 sps:$4 sm:$0xff]   ;;  %v8284_v49 = vld [vmem:[#allocation12 + $0x1b4] ss:$8 sps:$4 sm:$0xff]  }
 0x576   :  { %v4834_v58 = vld [vmem:[#allocation6 + $0x24] ss:$2 sm:$0x3]  ;;  %v4836_v59 = vld [vmem:[#allocation6 + $0x25] ss:$2 sm:$0x3] }
 0x577   :  { %v4851_v60 = vld [vmem:[#allocation6 + $0x36] ss:$2 sm:$0x3]  ;;  %v4853_v63 = vld [vmem:[#allocation6 + $0x37] ss:$2 sm:$0x3]  ;;  %v4837_v62 = vmax.f32 %v4834_v58, %v4836_v59 }
 0x578   :  { %v4854_v2 = vmax.f32 %v4851_v60, %v4853_v63  ;;  %v4839_v6 = vld [vmem:[#allocation6 + $0x2a] ss:$2 sm:$0x3]  ;;  %v4841_v54 = vld [vmem:[#allocation6 + $0x2b] ss:$2 sm:$0x3] }
 0x579   :  { %v4842_v8 = vmax.f32 %v4839_v6, %v4841_v54  ;;  %v4860_v39 = vld [vmem:[#allocation7 + $0x1] sm:$0xff]  ;;  %v8290_v41 = vld [vmem:[#allocation12 + $0x1d4] ss:$8 sps:$4 sm:$0xff]  }
 0x57a   :  { %v4855_v9 = vmax.f32 %v4849_v1, %v4854_v2  ;;  %v4857_v0 = vld [vmem:[#allocation7] sm:$0xff]  ;;  %v9570_v61 = vld [vmem:[#allocation7 + $0x9] sm:$0xff] }
 0x57b   :  { %v4843_v10 = vmax.f32 %v4837_v62, %v4842_v8  ;;  %v9572_v7 = vld [vmem:[#allocation7 + $0x8] sm:$0xff]  ;;  %v4879_v11 = vpack.c.bf16 %v9570_v61, %v4860_v39  ;;  %v8287_v51 = vld [vmem:[#allocation12 + $0x1c4] ss:$8 sps:$4 sm:$0xff]   ;;  %v8285_v52 = vld [vmem:[#allocation12 + $0x1c0] ss:$8 sps:$4 sm:$0xff]  }
 0x57c   :  { %4856 = vst [vmem:[#allocation7 + $0x19] sm:$0x3] %v4855_v9  ;;  %v4878_v13 = vpack.c.bf16 %v9572_v7, %v4857_v0  ;;  %v4866_v40 = vld [vmem:[#allocation7 + $0x4] sm:$0xff]  ;;  %v8291_v3 = vld [vmem:[#allocation12 + $0x1e0] ss:$8 sps:$4 sm:$0xff]  }
 0x57d   :  { %4844 = vst [vmem:[#allocation7 + $0x15] sm:$0x3] %v4843_v10  ;;  %5792 = vmatprep.mubr.bf16.mxu1 %v4879_v11  ;;  %v9586_v29 = vld [vmem:[#allocation7 + $0xa] sm:$0xff]  ;;  %v4881_v17 = vpack.c.bf16 %v4867_v20, %v4866_v40  ;;  %v8293_v45 = vld [vmem:[#allocation12 + $0x1e4] ss:$8 sps:$4 sm:$0xff]  }
 0x57e   :  { %5793 = vmatmul.mubr.bf16.vlgmr.msra.gmra.mrb[40].mxu1 %v4878_v13  ;;  %v8282_v50 = vld [vmem:[#allocation12 + $0x1b0] ss:$8 sps:$4 sm:$0xff]   ;;  %v8296_v4 = vld [vmem:[#allocation12 + $0x1f4] ss:$8 sps:$4 sm:$0xff]   ;;  %v8299_v55 = vld [vmem:[#allocation12 + $0x204] ss:$8 sps:$4 sm:$0xff]  }
 0x57f   :  { %5812 = vmatpush1.bf16.msra.mxu1 %v8249_v12  ;;  %v8288_v43 = vld [vmem:[#allocation12 + $0x1d0] ss:$8 sps:$4 sm:$0xff]   ;;  %v8297_v58 = vld [vmem:[#allocation12 + $0x200] ss:$8 sps:$4 sm:$0xff]   ;;  %v8302_v60 = vld [vmem:[#allocation12 + $0x214] ss:$8 sps:$4 sm:$0xff]  }
 0x580   :  { %5813 = vmatprep.subr.bf16.mxu1 %v8254_v16  ;;  %v8294_v5 = vld [vmem:[#allocation12 + $0x1f0] ss:$8 sps:$4 sm:$0xff]   ;;  %v8305_v2 = vld [vmem:[#allocation12 + $0x224] ss:$8 sps:$4 sm:$0xff]   ;;  %v8303_v54 = vld [vmem:[#allocation12 + $0x220] ss:$8 sps:$4 sm:$0xff]  }
 0x581   :  { %v4863_v56 = vld [vmem:[#allocation7 + $0x2] sm:$0xff]  ;;  %v8308_v9 = vld [vmem:[#allocation12 + $0x234] ss:$8 sps:$4 sm:$0xff]  }
 0x582   :  { %v4880_v59 = vpack.c.bf16 %v9586_v29, %v4863_v56  ;;  %v8300_v1 = vld [vmem:[#allocation12 + $0x210] ss:$8 sps:$4 sm:$0xff]   ;;  %v8311_v10 = vld [vmem:[#allocation12 + $0x244] ss:$8 sps:$4 sm:$0xff]   ;;  %v8309_v11 = vld [vmem:[#allocation12 + $0x240] ss:$8 sps:$4 sm:$0xff]  }
 0x583   :  { %5814 = vmatpush1.bf16.msra.mxu1 %v8252_v18  ;;  %v4872_v8 = vld [vmem:[#allocation7 + $0x6] sm:$0xff]  ;;  %v8315_v18 = vld [vmem:[#allocation12 + $0x260] ss:$8 sps:$4 sm:$0xff]  }
 0x584   :  { %v9576_v21 = vld [vmem:[#allocation7 + $0x11] sm:$0xff]  ;;  %5815 = vmatprep.subr.bf16.mxu1 %v8257_v19  ;;  %v8317_v16 = vld [vmem:[#allocation12 + $0x264] ss:$8 sps:$4 sm:$0xff]  }
 0x585   :  { %v9578_v22 = vld [vmem:[#allocation7 + $0x10] sm:$0xff]  ;;  %v4888_v24 = vpack.c.bf16 %v9576_v21, %v9576_v21  ;;  %v4885_v53 = vpack.c.bf16 %v9576_v21, %v9570_v61  ;;  %v8323_v40 = vld [vmem:[#allocation12 + $0x284] ss:$8 sps:$4 sm:$0xff]   ;;  %v8369_v21 = vld [vmem:[#allocation12 + $0x380] ss:$8 sps:$4 sm:$0xff]  }
 0x586   :  { %v4884_v26 = vpack.c.bf16 %v9578_v22, %v9572_v7  ;;  %v4887_v27 = vpack.c.bf16 %v9578_v22, %v9578_v22  ;;  %v9588_v30 = vld [vmem:[#allocation7 + $0x12] sm:$0xff]  ;;  %v8437_v56 = vld [vmem:[#allocation14 + $0x64] ss:$8 sps:$4 sm:$0xff]  }
 0x587   :  { %v4886_v42 = vpack.c.bf16 %v9588_v30, %v9586_v29  ;;  %5802 = vmatprep.mubr.bf16.mxu1 %v4888_v24  ;;  %5816 = vmatpush1.bf16.msra.mxu1 %v8255_v25  ;;  %v4868_v57 = vld [vmem:[#allocation7 + $0x14] sm:$0xff]  ;;  %v4889_v62 = vpack.c.bf16 %v9588_v30, %v9588_v30  ;;  %v8306_v0 = vld [vmem:[#allocation12 + $0x230] ss:$8 sps:$4 sm:$0xff]   ;;  %v8371_v61 = vld [vmem:[#allocation12 + $0x384] ss:$8 sps:$4 sm:$0xff]  }
 0x588   :  { %5803 = vmatmul.mubr.bf16.gmra.mrb[44].mxu1 %v4887_v27  ;;  %5817 = vmatprep.subr.bf16.mxu1 %v8260_v31  ;;  %v4890_v63 = vpack.c.bf16 %v4868_v57, %v4868_v57  ;;  %v4873_v6 = vld [vmem:[#allocation7 + $0xe] sm:$0xff]  ;;  %v8321_v24 = vld [vmem:[#allocation12 + $0x280] ss:$8 sps:$4 sm:$0xff]   ;;  %v8329_v31 = vld [vmem:[#allocation12 + $0x2a4] ss:$8 sps:$4 sm:$0xff]  }
 0x589   :  { %5843 = vmatprep.mubr.bf16.mxu1 %v4881_v17  ;;  %v4883_v39 = vpack.c.bf16 %v4873_v6, %v4872_v8  ;;  %v8314_v12 = vld [vmem:[#allocation12 + $0x254] ss:$8 sps:$4 sm:$0xff]   ;;  %v8312_v13 = vld [vmem:[#allocation12 + $0x250] ss:$8 sps:$4 sm:$0xff]   ;;  %v8327_v17 = vld [vmem:[#allocation12 + $0x2a0] ss:$8 sps:$4 sm:$0xff]  }
 0x58a   :  { %v8320_v19 = vld [vmem:[#allocation12 + $0x274] ss:$8 sps:$4 sm:$0xff]   ;;  %v8318_v20 = vld [vmem:[#allocation12 + $0x270] ss:$8 sps:$4 sm:$0xff]   ;;  %v8345_v57 = vld [vmem:[#allocation12 + $0x300] ss:$8 sps:$4 sm:$0xff]  }
 0x58b   :  { %5818 = vmatpush1.bf16.msra.mxu1 %v8258_v32  ;;  %v8326_v25 = vld [vmem:[#allocation12 + $0x294] ss:$8 sps:$4 sm:$0xff]   ;;  %v8324_v27 = vld [vmem:[#allocation12 + $0x290] ss:$8 sps:$4 sm:$0xff]   ;;  %v8353_v6 = vld [vmem:[#allocation12 + $0x324] ss:$8 sps:$4 sm:$0xff]  }
 0x58c   :  { %5819 = vmatprep.subr.bf16.mxu1 %v8263_v33  ;;  %v8332_v32 = vld [vmem:[#allocation12 + $0x2b4] ss:$8 sps:$4 sm:$0xff]   ;;  %v8417_v33 = vld [vmem:[#allocation14] ss:$8 sps:$4 sm:$0xff]   ;;  %v8455_v29 = vld [vmem:[#allocation14 + $0xc4] ss:$8 sps:$4 sm:$0xff]  }
 0x58d   :  { %v8351_v8 = vld [vmem:[#allocation12 + $0x320] ss:$8 sps:$4 sm:$0xff]   ;;  %v8410_v22 = vld [vmem:[#allocation12 + $0x454] ss:$8 sps:$4 sm:$0xff]  }
 0x58e   :  { %v8405_v7 = vld [vmem:[#allocation12 + $0x440] ss:$8 sps:$4 sm:$0xff]  }
 0x58f   :  { %5820 = vmatpush1.bf16.msra.mxu1 %v8261_v34  ;;  %v8419_v34 = vld [vmem:[#allocation14 + $0x4] ss:$8 sps:$4 sm:$0xff]   ;;  %v8453_v30 = vld [vmem:[#allocation14 + $0xc0] ss:$8 sps:$4 sm:$0xff]  }
 0x590   :  { %5821 = vmatprep.subr.bf16.mxu1 %v8266_v35  ;;  %v8330_v35 = vld [vmem:[#allocation12 + $0x2b0] ss:$8 sps:$4 sm:$0xff]   ;;  %6319 = vmatprep.subr.bf16.mxu0 %v8419_v34 }
 0x591   :  { %6320 = vmatpush1.bf16.msra.mxu0 %v8417_v33  ;;  %v8386_v33 = vld [vmem:[#allocation12 + $0x3d4] ss:$8 sps:$4 sm:$0xff]   ;;  %v8384_v34 = vld [vmem:[#allocation12 + $0x3d0] ss:$8 sps:$4 sm:$0xff]  }
 0x593   :  { %5822 = vmatpush1.bf16.msra.mxu1 %v8264_v36  ;;  %v8422_v36 = vld [vmem:[#allocation14 + $0x14] ss:$8 sps:$4 sm:$0xff]  }
 0x594   :  { %5823 = vmatprep.subr.bf16.mxu1 %v8269_v37  ;;  %v8335_v37 = vld [vmem:[#allocation12 + $0x2c4] ss:$8 sps:$4 sm:$0xff]   ;;  %6321 = vmatprep.subr.bf16.mxu0 %v8422_v36  ;;  %v8387_v36 = vld [vmem:[#allocation12 + $0x3e0] ss:$8 sps:$4 sm:$0xff]  }
 0x597   :  { %5824 = vmatpush1.bf16.msra.mxu1 %v8267_v14  ;;  %v8420_v14 = vld [vmem:[#allocation14 + $0x10] ss:$8 sps:$4 sm:$0xff]  }
 0x598   :  { %5825 = vmatprep.subr.bf16.mxu1 %v8272_v38  ;;  %v8425_v38 = vld [vmem:[#allocation14 + $0x24] ss:$8 sps:$4 sm:$0xff]   ;;  %6322 = vmatpush1.bf16.msra.mxu0 %v8420_v14  ;;  %v8390_v14 = vld [vmem:[#allocation12 + $0x3f0] ss:$8 sps:$4 sm:$0xff]  }
 0x599   :  { %6323 = vmatprep.subr.bf16.mxu0 %v8425_v38  ;;  %v8395_v38 = vld [vmem:[#allocation12 + $0x404] ss:$8 sps:$4 sm:$0xff]  }
 0x59b   :  { %5826 = vmatpush1.bf16.msra.mxu1 %v8270_v44  ;;  %v8333_v44 = vld [vmem:[#allocation12 + $0x2c0] ss:$8 sps:$4 sm:$0xff]  }
 0x59c   :  { %5827 = vmatprep.subr.bf16.mxu1 %v8275_v46  ;;  %v8338_v46 = vld [vmem:[#allocation12 + $0x2d4] ss:$8 sps:$4 sm:$0xff]  }
 0x59f   :  { %5828 = vmatpush1.bf16.msra.mxu1 %v8273_v47  ;;  %v8423_v47 = vld [vmem:[#allocation14 + $0x20] ss:$8 sps:$4 sm:$0xff]  }
 0x5a0   :  { %5829 = vmatprep.subr.bf16.mxu1 %v8278_v48  ;;  %v8428_v48 = vld [vmem:[#allocation14 + $0x34] ss:$8 sps:$4 sm:$0xff]   ;;  %6324 = vmatpush1.bf16.msra.mxu0 %v8423_v47 }
 0x5a1   :  { %6325 = vmatprep.subr.bf16.mxu0 %v8428_v48  ;;  %v8398_v47 = vld [vmem:[#allocation12 + $0x414] ss:$8 sps:$4 sm:$0xff]  }
 0x5a3   :  { %5830 = vmatpush1.bf16.msra.mxu1 %v8276_v23  ;;  %v8336_v23 = vld [vmem:[#allocation12 + $0x2d0] ss:$8 sps:$4 sm:$0xff]  }
 0x5a4   :  { %5831 = vmatprep.subr.bf16.mxu1 %v8281_v15  ;;  %v8341_v15 = vld [vmem:[#allocation12 + $0x2e4] ss:$8 sps:$4 sm:$0xff]  }
 0x5a7   :  { %5832 = vmatpush1.bf16.msra.mxu1 %v8279_v28  ;;  %v8426_v28 = vld [vmem:[#allocation14 + $0x30] ss:$8 sps:$4 sm:$0xff]  }
 0x5a8   :  { %5833 = vmatprep.subr.bf16.mxu1 %v8284_v49  ;;  %v8431_v49 = vld [vmem:[#allocation14 + $0x44] ss:$8 sps:$4 sm:$0xff]   ;;  %6326 = vmatpush1.bf16.msra.mxu0 %v8426_v28 }
 0x5a9   :  { %6327 = vmatprep.subr.bf16.mxu0 %v8431_v49  ;;  %v4875_v28 = vld [vmem:[#allocation7 + $0x18] sm:$0xff] }
 0x5aa   :  { %v8399_v49 = vld [vmem:[#allocation12 + $0x420] ss:$8 sps:$4 sm:$0xff]  }
 0x5ab   :  { %5834 = vmatpush1.bf16.msra.mxu1 %v8282_v50  ;;  %v8339_v50 = vld [vmem:[#allocation12 + $0x2e0] ss:$8 sps:$4 sm:$0xff]  }
 0x5ac   :  { %5835 = vmatprep.subr.bf16.mxu1 %v8287_v51  ;;  %v8344_v51 = vld [vmem:[#allocation12 + $0x2f4] ss:$8 sps:$4 sm:$0xff]  }
 0x5af   :  { %5836 = vmatpush1.bf16.msra.mxu1 %v8285_v52  ;;  %v8429_v52 = vld [vmem:[#allocation14 + $0x40] ss:$8 sps:$4 sm:$0xff]  }
 0x5b0   :  { %5837 = vmatprep.subr.bf16.mxu1 %v8290_v41  ;;  %v8434_v41 = vld [vmem:[#allocation14 + $0x54] ss:$8 sps:$4 sm:$0xff]   ;;  %6328 = vmatpush1.bf16.msra.mxu0 %v8429_v52  ;;  %v8402_v52 = vld [vmem:[#allocation12 + $0x430] ss:$8 sps:$4 sm:$0xff]  }
 0x5b1   :  { %6329 = vmatprep.subr.bf16.mxu0 %v8434_v41  ;;  %v8609_v41 = vmov 0  }
 0x5b3   :  { %5838 = vmatpush1.bf16.msra.mxu1 %v8288_v43  ;;  %v8342_v43 = vld [vmem:[#allocation12 + $0x2f0] ss:$8 sps:$4 sm:$0xff]  }
 0x5b4   :  { %5839 = vmatprep.subr.bf16.mxu1 %v8293_v45  ;;  %v8347_v45 = vld [vmem:[#allocation12 + $0x304] ss:$8 sps:$4 sm:$0xff]  }
 0x5b7   :  { %5840 = vmatpush1.bf16.msra.mxu1 %v8291_v3  ;;  %v4869_v3 = vld [vmem:[#allocation7 + $0x5] sm:$0xff] }
 0x5b8   :  { %5841 = vmatprep.subr.bf16.mxu1 %v8296_v4  ;;  %v4870_v4 = vld [vmem:[#allocation7 + $0xd] sm:$0xff] }
 0x5bb   :  { %5842 = vmatpush1.bf16.msra.mxu1 %v8294_v5  ;;  %v8432_v5 = vld [vmem:[#allocation14 + $0x50] ss:$8 sps:$4 sm:$0xff]  }
 0x5bc   :  { %5862 = vmatprep.subr.bf16.mxu1 %v8299_v55  ;;  %v4874_v55 = vld [vmem:[#allocation7 + $0x16] sm:$0xff]  ;;  %6330 = vmatpush1.bf16.msra.mxu0 %v8432_v5  ;;  %v8414_v5 = vld [vmem:[#allocation12 + $0x470] ss:$8 sps:$4 sm:$0xff]  }
 0x5bd   :  { %6331 = vmatprep.subr.bf16.mxu0 %v8437_v56 }
 0x5be   :  { %5844 = vmatmul.mubr.bf16.vlgmr.msra.gmra.mrb[40].mxu1 %v4880_v59  ;;  %v8350_v59 = vld [vmem:[#allocation12 + $0x314] ss:$8 sps:$4 sm:$0xff]  }
 0x5bf   :  { %5853 = vmatprep.mubr.bf16.mxu1 %v4890_v63  ;;  %5863 = vmatpush1.bf16.msra.mxu1 %v8297_v58  ;;  %v4882_v58 = vpack.c.bf16 %v4870_v4, %v4869_v3  ;;  %v8435_v63 = vld [vmem:[#allocation14 + $0x60] ss:$8 sps:$4 sm:$0xff]   ;;  %v8416_v4 = vld [vmem:[#allocation12 + $0x474] ss:$8 sps:$4 sm:$0xff]  }
 0x5c0   :  { %5864 = vmatprep.subr.bf16.mxu1 %v8302_v60  ;;  %v4892_v60 = vpack.c.bf16 %v4874_v55, %v4874_v55  ;;  %6332 = vmatpush1.bf16.msra.mxu0 %v8435_v63  ;;  %v8411_v3 = vld [vmem:[#allocation12 + $0x460] ss:$8 sps:$4 sm:$0xff]  }
 0x5c1   :  { %v4877_v55 = vld [vmem:[#allocation7 + $0x1a] sm:$0xff] }
 0x5c2   :  { %v4895_v56 = vpack.c.bf16 %v4877_v55, %v4877_v55  ;;  %v8447_v63 = vld [vmem:[#allocation14 + $0xa0] ss:$8 sps:$4 sm:$0xff]  }
 0x5c3   :  { %5865 = vmatpush1.bf16.msra.mxu1 %v8300_v1  ;;  %v8440_v1 = vld [vmem:[#allocation14 + $0x74] ss:$8 sps:$4 sm:$0xff]  }
 0x5c4   :  { %5866 = vmatprep.subr.bf16.mxu1 %v8305_v2  ;;  %v8348_v2 = vld [vmem:[#allocation12 + $0x310] ss:$8 sps:$4 sm:$0xff]   ;;  %6333 = vmatprep.subr.bf16.mxu0 %v8440_v1  ;;  %v8449_v1 = vld [vmem:[#allocation14 + $0xa4] ss:$8 sps:$4 sm:$0xff]  }
 0x5c6   :  { %5854 = vmatmul.mubr.bf16.gmra.mrb[44].mxu1 %v4889_v62  ;;  %v8438_v62 = vld [vmem:[#allocation14 + $0x70] ss:$8 sps:$4 sm:$0xff]  }
 0x5c7   :  { %5867 = vmatpush1.bf16.msra.mxu1 %v8303_v54  ;;  %5894 = vmatprep.mubr.bf16.mxu1 %v4883_v39  ;;  %v4871_v54 = vld [vmem:[#allocation7 + $0x15] sm:$0xff] }
 0x5c8   :  { %5868 = vmatprep.subr.bf16.mxu1 %v8308_v9  ;;  %v4891_v9 = vpack.c.bf16 %v4871_v54, %v4871_v54  ;;  %v8356_v39 = vld [vmem:[#allocation12 + $0x334] ss:$8 sps:$4 sm:$0xff]   ;;  %6334 = vmatpush1.bf16.msra.mxu0 %v8438_v62  ;;  %v8456_v54 = vld [vmem:[#allocation14 + $0xd0] ss:$8 sps:$4 sm:$0xff]   ;;  %v8461_v62 = vld [vmem:[#allocation14 + $0xe4] ss:$8 sps:$4 sm:$0xff]  }
 0x5cb   :  { %5869 = vmatpush1.bf16.msra.mxu1 %v8306_v0  ;;  %v8354_v0 = vld [vmem:[#allocation12 + $0x330] ss:$8 sps:$4 sm:$0xff]  }
 0x5cc   :  { %5870 = vmatprep.subr.bf16.mxu1 %v8311_v10  ;;  %v8359_v10 = vld [vmem:[#allocation12 + $0x344] ss:$8 sps:$4 sm:$0xff]  }
 0x5cf   :  { %5871 = vmatpush1.bf16.msra.mxu1 %v8309_v11  ;;  %v8357_v11 = vld [vmem:[#allocation12 + $0x340] ss:$8 sps:$4 sm:$0xff]  }
 0x5d0   :  { %5872 = vmatprep.subr.bf16.mxu1 %v8314_v12  ;;  %v8362_v12 = vld [vmem:[#allocation12 + $0x354] ss:$8 sps:$4 sm:$0xff]  }
 0x5d3   :  { %5873 = vmatpush1.bf16.msra.mxu1 %v8312_v13  ;;  %v8360_v13 = vld [vmem:[#allocation12 + $0x350] ss:$8 sps:$4 sm:$0xff]  }
 0x5d4   :  { %5874 = vmatprep.subr.bf16.mxu1 %v8317_v16  ;;  %v8365_v16 = vld [vmem:[#allocation12 + $0x364] ss:$8 sps:$4 sm:$0xff]  }
 0x5d7   :  { %5875 = vmatpush1.bf16.msra.mxu1 %v8315_v18  ;;  %v8363_v18 = vld [vmem:[#allocation12 + $0x360] ss:$8 sps:$4 sm:$0xff]  }
 0x5d8   :  { %5876 = vmatprep.subr.bf16.mxu1 %v8320_v19  ;;  %v8368_v19 = vld [vmem:[#allocation12 + $0x374] ss:$8 sps:$4 sm:$0xff]  }
 0x5db   :  { %5877 = vmatpush1.bf16.msra.mxu1 %v8318_v20  ;;  %v8366_v20 = vld [vmem:[#allocation12 + $0x370] ss:$8 sps:$4 sm:$0xff]  }
 0x5dc   :  { %5878 = vmatprep.subr.bf16.mxu1 %v8323_v40  ;;  %v8372_v40 = vld [vmem:[#allocation12 + $0x390] ss:$8 sps:$4 sm:$0xff]  }
 0x5df   :  { %5879 = vmatpush1.bf16.msra.mxu1 %v8321_v24  ;;  %v8377_v24 = vld [vmem:[#allocation12 + $0x3a4] ss:$8 sps:$4 sm:$0xff]  }
 0x5e0   :  { %5880 = vmatprep.subr.bf16.mxu1 %v8326_v25  ;;  %v8375_v25 = vld [vmem:[#allocation12 + $0x3a0] ss:$8 sps:$4 sm:$0xff]  }
 0x5e3   :  { %5881 = vmatpush1.bf16.msra.mxu1 %v8324_v27  ;;  %v8380_v27 = vld [vmem:[#allocation12 + $0x3b4] ss:$8 sps:$4 sm:$0xff]  }
 0x5e4   :  { %5882 = vmatprep.subr.bf16.mxu1 %v8329_v31  ;;  %v8378_v31 = vld [vmem:[#allocation12 + $0x3b0] ss:$8 sps:$4 sm:$0xff]  }
 0x5e7   :  { %5883 = vmatpush1.bf16.msra.mxu1 %v8327_v17  ;;  %v8383_v17 = vld [vmem:[#allocation12 + $0x3c4] ss:$8 sps:$4 sm:$0xff]  }
 0x5e8   :  { %5884 = vmatprep.subr.bf16.mxu1 %v8332_v32  ;;  %v8381_v32 = vld [vmem:[#allocation12 + $0x3c0] ss:$8 sps:$4 sm:$0xff]  }
 0x5eb   :  { %5885 = vmatpush1.bf16.msra.mxu1 %v8330_v35  ;;  %v8389_v35 = vld [vmem:[#allocation12 + $0x3e4] ss:$8 sps:$4 sm:$0xff]  }
 0x5ec   :  { %5886 = vmatprep.subr.bf16.mxu1 %v8335_v37  ;;  %v8392_v37 = vld [vmem:[#allocation12 + $0x3f4] ss:$8 sps:$4 sm:$0xff]  }
 0x5ef   :  { %5887 = vmatpush1.bf16.msra.mxu1 %v8333_v44  ;;  %v4876_v44 = vld [vmem:[#allocation7 + $0x19] sm:$0xff] }
 0x5f0   :  { %5888 = vmatprep.subr.bf16.mxu1 %v8338_v46  ;;  %v8393_v46 = vld [vmem:[#allocation12 + $0x400] ss:$8 sps:$4 sm:$0xff]   ;;  %v4894_v48 = vpack.c.bf16 %v4876_v44, %v4876_v44 }
 0x5f3   :  { %5889 = vmatpush1.bf16.msra.mxu1 %v8336_v23  ;;  %v8396_v23 = vld [vmem:[#allocation12 + $0x410] ss:$8 sps:$4 sm:$0xff]  }
 0x5f4   :  { %5890 = vmatprep.subr.bf16.mxu1 %v8341_v15  ;;  %v8401_v15 = vld [vmem:[#allocation12 + $0x424] ss:$8 sps:$4 sm:$0xff]  }
 0x5f7   :  { %5891 = vmatpush1.bf16.msra.mxu1 %v8339_v50  ;;  %v4893_v50 = vpack.c.bf16 %v4875_v28, %v4875_v28 }
 0x5f8   :  { %5892 = vmatprep.subr.bf16.mxu1 %v8344_v51  ;;  %v8404_v51 = vld [vmem:[#allocation12 + $0x434] ss:$8 sps:$4 sm:$0xff]  }
 0x5fb   :  { %5893 = vmatpush1.bf16.msra.mxu1 %v8342_v43  ;;  %v8407_v43 = vld [vmem:[#allocation12 + $0x444] ss:$8 sps:$4 sm:$0xff]  }
 0x5fc   :  { %5913 = vmatprep.subr.bf16.mxu1 %v8347_v45  ;;  %v8413_v45 = vld [vmem:[#allocation12 + $0x464] ss:$8 sps:$4 sm:$0xff]  }
 0x5fe   :  { %5895 = vmatmul.mubr.bf16.vlgmr.msra.gmra.mrb[40].mxu1 %v4882_v58  ;;  %v8443_v58 = vld [vmem:[#allocation14 + $0x84] ss:$8 sps:$4 sm:$0xff]  }
 0x5ff   :  { %5904 = vmatprep.mubr.bf16.mxu1 %v4892_v60  ;;  %5914 = vmatpush1.bf16.msra.mxu1 %v8345_v57  ;;  %v8441_v57 = vld [vmem:[#allocation14 + $0x80] ss:$8 sps:$4 sm:$0xff]   ;;  %v8444_v60 = vld [vmem:[#allocation14 + $0x90] ss:$8 sps:$4 sm:$0xff]  }
 0x600   :  { %5915 = vmatprep.subr.bf16.mxu1 %v8350_v59  ;;  %v8446_v59 = vld [vmem:[#allocation14 + $0x94] ss:$8 sps:$4 sm:$0xff]   ;;  %6335 = vmatprep.subr.bf16.mxu0 %v8443_v58 }
 0x601   :  { %6336 = vmatpush1.bf16.msra.mxu0 %v8441_v57 }
 0x602   :  { %6337 = vmatprep.subr.bf16.mxu0 %v8446_v59 }
 0x603   :  { %5916 = vmatpush1.bf16.msra.mxu1 %v8348_v2  ;;  %v8452_v2 = vld [vmem:[#allocation14 + $0xb4] ss:$8 sps:$4 sm:$0xff]  }
 0x604   :  { %5917 = vmatprep.subr.bf16.mxu1 %v8353_v6  ;;  %v8450_v6 = vld [vmem:[#allocation14 + $0xb0] ss:$8 sps:$4 sm:$0xff]  }
 0x605   :  { %6338 = vmatpush1.bf16.msra.mxu0 %v8444_v60 }
 0x606   :  { %5905 = vmatmul.mubr.bf16.gmra.mrb[44].mxu1 %v4891_v9  ;;  %6339 = vmatprep.subr.bf16.mxu0 %v8449_v1  ;;  %v8464_v9 = vld [vmem:[#allocation14 + $0xf4] ss:$8 sps:$4 sm:$0xff]  }
 0x607   :  { %5918 = vmatpush1.bf16.msra.mxu1 %v8351_v8  ;;  %5945 = vmatprep.mubr.bf16.mxu1 %v4885_v53  ;;  %v8374_v53 = vld [vmem:[#allocation12 + $0x394] ss:$8 sps:$4 sm:$0xff]   ;;  %v8459_v8 = vld [vmem:[#allocation14 + $0xe0] ss:$8 sps:$4 sm:$0xff]  }
 0x608   :  { %5919 = vmatprep.subr.bf16.mxu1 %v8356_v39  ;;  %v8465_v39 = vld [vmem:[#allocation15 + $0x40] sm:$0xff]  }
 0x609   :  { %6340 = vmatpush1.bf16.msra.mxu0 %v8447_v63 }
 0x60a   :  { %6341 = vmatprep.subr.bf16.mxu0 %v8452_v2 }
 0x60b   :  { %5920 = vmatpush1.bf16.msra.mxu1 %v8354_v0  ;;  %v8466_v0 = vld [vmem:[#allocation15] sm:$0xff]  }
 0x60c   :  { %5921 = vmatprep.subr.bf16.mxu1 %v8359_v10  ;;  %v8467_v10 = vld [vmem:[#allocation15 + $0x48] sm:$0xff]  }
 0x60d   :  { %6342 = vmatpush1.bf16.msra.mxu0 %v8450_v6 }
 0x60e   :  { %6343 = vmatprep.subr.bf16.mxu0 %v8455_v29 }
 0x60f   :  { %5922 = vmatpush1.bf16.msra.mxu1 %v8357_v11  ;;  %v8462_v11 = vld [vmem:[#allocation14 + $0xf0] ss:$8 sps:$4 sm:$0xff]  }
 0x610   :  { %5923 = vmatprep.subr.bf16.mxu1 %v8362_v12  ;;  %v8468_v12 = vld [vmem:[#allocation15 + $0x8] sm:$0xff]  }
 0x611   :  { %6344 = vmatpush1.bf16.msra.mxu0 %v8453_v30 }
 0x613   :  { %5924 = vmatpush1.bf16.msra.mxu1 %v8360_v13  ;;  %v8469_v13 = vld [vmem:[#allocation15 + $0x50] sm:$0xff]  }
 0x614   :  { %5925 = vmatprep.subr.bf16.mxu1 %v8365_v16  ;;  %v8470_v16 = vld [vmem:[#allocation15 + $0x10] sm:$0xff]  }
 0x617   :  { %5926 = vmatpush1.bf16.msra.mxu1 %v8363_v18  ;;  %v8471_v18 = vld [vmem:[#allocation15 + $0x58] sm:$0xff]  }
 0x618   :  { %5927 = vmatprep.subr.bf16.mxu1 %v8368_v19  ;;  %v8472_v19 = vld [vmem:[#allocation15 + $0x18] sm:$0xff]  }
 0x61b   :  { %5928 = vmatpush1.bf16.msra.mxu1 %v8366_v20  ;;  %v8473_v20 = vld [vmem:[#allocation15 + $0x60] sm:$0xff]  }
 0x61c   :  { %5929 = vmatprep.subr.bf16.mxu1 %v8371_v61  ;;  %v8474_v61 = vld [vmem:[#allocation15 + $0x20] sm:$0xff]  }
 0x61f   :  { %5930 = vmatpush1.bf16.msra.mxu1 %v8369_v21  ;;  %v8475_v21 = vld [vmem:[#allocation15 + $0x68] sm:$0xff]  }
 0x620   :  { %5931 = vmatprep.subr.bf16.mxu1 %v8374_v53  ;;  %v8476_v53 = vld [vmem:[#allocation15 + $0x28] sm:$0xff]  }
 0x623   :  { %5932 = vmatpush1.bf16.msra.mxu1 %v8372_v40  ;;  %v6017_v40 = vlaneseq }
 0x624   :  { %5933 = vmatprep.subr.bf16.mxu1 %v8377_v24 }
 0x625   :  { %v6018_v24 = vshrl.u32 %v6017_v40, 7 }
 0x627   :  { %5934 = vmatpush1.bf16.msra.mxu1 %v8375_v25  ;;  %v9606_v25 = vsub.s32 0, %v6018_v24 }
 0x628   :  { %5935 = vmatprep.subr.bf16.mxu1 %v8380_v27  ;;  %v6015_v27 = vld [vmem:[%s9655_s11] sm:$0x3] }
 0x62b   :  { %5936 = vmatpush1.bf16.msra.mxu1 %v8378_v31  ;;  %v9611_v31 = vsub.s32 1, %v6018_v24 }
 0x62c   :  { %5937 = vmatprep.subr.bf16.mxu1 %v8383_v17  ;;  %v6033_v17 = vld [vmem:[%s9656_s12] sm:$0x3] }
 0x62f   :  { %5938 = vmatpush1.bf16.msra.mxu1 %v8381_v32  ;;  %v6020_v32 = vrot.slane %v6015_v27, %v9606_v25 }
 0x630   :  { %5939 = vmatprep.subr.bf16.mxu1 %v8386_v33  ;;  %v6024_v33 = vrot.slane %v6015_v27, %v9611_v31 }
 0x633   :  { %5940 = vmatpush1.bf16.msra.mxu1 %v8384_v34  ;;  %v6038_v34 = vrot.slane %v6033_v17, %v9606_v25 }
 0x634   :  { %5941 = vmatprep.subr.bf16.mxu1 %v8389_v35 }
 0x637   :  { %5942 = vmatpush1.bf16.msra.mxu1 %v8387_v36  ;;  %v6042_v36 = vrot.slane %v6033_v17, %v9611_v31 }
 0x638   :  { %5943 = vmatprep.subr.bf16.mxu1 %v8392_v37 }
 0x63b   :  { %5944 = vmatpush1.bf16.msra.mxu1 %v8390_v14 }
 0x63c   :  { %5964 = vmatprep.subr.bf16.mxu1 %v8395_v38 }
 0x63e   :  { %5946 = vmatmul.mubr.bf16.vlgmr.msra.gmra.mrb[40].mxu1 %v4884_v26  ;;  %v8408_v26 = vld [vmem:[#allocation12 + $0x450] ss:$8 sps:$4 sm:$0xff]  }
 0x63f   :  { %5955 = vmatprep.mubr.bf16.mxu1 %v4894_v48  ;;  %5965 = vmatpush1.bf16.msra.mxu1 %v8393_v46 }
 0x640   :  { %5966 = vmatprep.subr.bf16.mxu1 %v8398_v47 }
 0x643   :  { %5967 = vmatpush1.bf16.msra.mxu1 %v8396_v23 }
 0x644   :  { %5968 = vmatprep.subr.bf16.mxu1 %v8401_v15 }
 0x646   :  { %5956 = vmatmul.mubr.bf16.gmra.mrb[44].mxu1 %v4893_v50 }
 0x647   :  { %5969 = vmatpush1.bf16.msra.mxu1 %v8399_v49  ;;  %5996 = vmatprep.mubr.bf16.mxu1 %v8609_v41 }
 0x648   :  { %5970 = vmatprep.subr.bf16.mxu1 %v8404_v51 }
 0x64b   :  { %5971 = vmatpush1.bf16.msra.mxu1 %v8402_v52 }
 0x64c   :  { %5972 = vmatprep.subr.bf16.mxu1 %v8407_v43 }
 0x64f   :  { %5973 = vmatpush1.bf16.msra.mxu1 %v8405_v7 }
 0x650   :  { %5974 = vmatprep.subr.bf16.mxu1 %v8410_v22 }
 0x653   :  { %5975 = vmatpush1.bf16.msra.mxu1 %v8408_v26 }
 0x654   :  { %5976 = vmatprep.subr.bf16.mxu1 %v8413_v45 }
 0x657   :  { %5977 = vmatpush1.bf16.msra.mxu1 %v8411_v3 }
 0x658   :  { %5978 = vmatprep.subr.bf16.mxu1 %v8416_v4 }
 0x65b   :  { %5979 = vmatpush1.bf16.msra.mxu1 %v8414_v5 }
 0x65c   :  { %7322 = vmatprep.subr.bf16.mxu1 %v8465_v39 }
 0x65e   :  { %5997 = vmatmul.mubr.bf16.vlgmr.msra.gmra.mrb[40].mxu1 %v4886_v42  ;;  %v8458_v42 = vld [vmem:[#allocation14 + $0xd4] ss:$8 sps:$4 sm:$0xff]  }
 0x65f   :  { %6006 = vmatprep.mubr.bf16.mxu1 %v8609_v41  ;;  %6345 = vmatprep.subr.bf16.mxu0 %v8458_v42 }
 0x660   :  { %6346 = vmatpush1.bf16.msra.mxu0 %v8456_v54  ;;  %7323 = vmatpush3.bf16.msra.mxu1 %v8466_v0  ;;  %v8477_v0 = vld [vmem:[#allocation15 + $0x70] sm:$0xff]  }
 0x661   :  { %6347 = vmatprep.subr.bf16.mxu0 %v8461_v62  ;;  %7324 = vmatprep.subr.bf16.mxu1 %v8467_v10  ;;  %v8478_v10 = vld [vmem:[#allocation15 + $0x30] sm:$0xff]  }
 0x664   :  { %6348 = vmatpush1.bf16.msra.mxu0 %v8459_v8  ;;  %7325 = vmatpush3.bf16.msra.mxu1 %v8468_v12  ;;  %v8480_v12 = vld [vmem:[#allocation15 + $0x38] sm:$0xff]  }
 0x665   :  { %6349 = vmatprep.subr.bf16.mxu0 %v8464_v9  ;;  %7326 = vmatprep.subr.bf16.mxu1 %v8469_v13  ;;  %v6147_v13 = vld [vmem:[%s9658_s14] sm:$0x3]  ;;  %s8610_s14 = smov [#allocation17]  }
 0x666   :  { %6007 = vmatmul.mubr.bf16.gmra.mrb[44].mxu1 %v4895_v56  ;;  %s6546_s5 = sshll.u32 %s8610_s14, 4  ;;  %s6547_s5 = int_to_ptr.vmem [resolvable:$true] %s6546_s5 }
 0x667   :  { %s8570_s6 = scalar_lea.vmem %s6547_s5, 32  ;;  %p8575_p5 = scmp.lt.s32.totalorder %s6547_s5, %s6547_s5 }
 0x668   :  { %6350 = vmatpush1.bf16.msra.mxu0 %v8462_v11  ;;  %7327 = vmatpush3.bf16.msra.mxu1 %v8470_v16  ;;  %v8479_v11 = vld [vmem:[#allocation15 + $0x78] sm:$0xff]   ;;  %v6152_v16 = vrot.slane %v6147_v13, %v9606_v25  ;;  %p8571_p4 = scmp.ne.s32.totalorder %s6547_s5, %s8570_s6  ;;  %p8576_p6 = scmp.lt.s32.totalorder %s8570_s6, %s8570_s6 }
 0x669   :  { %7328 = vmatprep.subr.bf16.mxu1 %v8471_v18  ;;  %v6156_v18 = vrot.slane %v6147_v13, %v9611_v31 }
 0x66a   :  { %p8577_p7 = por %p8576_p6, %p8575_p5 }
 0x66c   :  { %7329 = vmatpush3.bf16.msra.mxu1 %v8472_v19  ;;  %p8578_p8 = pnand %p8577_p7, %p8571_p4 }
 0x66d   :  { %7330 = vmatprep.subr.bf16.mxu1 %v8473_v20 }
 0x670   :  { %7331 = vmatpush3.bf16.msra.mxu1 %v8474_v61 }
 0x671   :  { %7332 = vmatprep.subr.bf16.mxu1 %v8475_v21 }
 0x674   :  { %7333 = vmatpush3.bf16.msra.mxu1 %v8476_v53 }
 0x675   :  { %7334 = vmatprep.subr.bf16.mxu1 %v8477_v0 }
 0x678   :  { %7335 = vmatpush3.bf16.msra.mxu1 %v8478_v10 }
 0x679   :  { %7336 = vmatprep.subr.bf16.mxu1 %v8479_v11 }
 0x67c   :  { %7337 = vmatpush3.bf16.msra.mxu1 %v8480_v12 }
 0x731   :  { %v5998_v35 = vpop.f32.mrb[40].mxu1 }
 0x732   :  { %v6027_v37 = vmul.f32 %v6020_v32, %v5998_v35  ;;  %v6000_v14 = vpop.f32.mrb[41].mxu1 }
 0x733   :  { %v6028_v38 = vmul.f32 %v6024_v33, %v6000_v14  ;;  %v6002_v44 = vpop.f32.mrb[42].mxu1 }
 0x734   :  { %v6045_v46 = vadd.f32 %v6038_v34, %v6027_v37  ;;  %v6004_v47 = vpop.f32.mrb[43].mxu1 }
 0x735   :  { %v6046_v48 = vadd.f32 %v6042_v36, %v6028_v38 }
 0x736   :  { %v6051_v23 = vmax.f32 %v6045_v46, 0.0 }
 0x737   :  { %v6052_v15 = vmax.f32 %v6046_v48, 0.0 }
 0x738   :  { %6057 = vst [vmem:[#allocation8] sm:$0xff] %v6051_v23 }
 0x739   :  { %6058 = vst [vmem:[#allocation8 + $0x8] sm:$0xff] %v6052_v15  ;;  %v6008_v28 = vpop.f32.mrb[44].mxu1 }
 0x73a   :  { %v6031_v49 = vmul.f32 %v6020_v32, %v6008_v28  ;;  %v6010_v50 = vpop.f32.mrb[45].mxu1 }
 0x73b   :  { %v6032_v51 = vmul.f32 %v6024_v33, %v6010_v50  ;;  %v6012_v52 = vpop.f32.mrb[46].mxu1 }
 0x73c   :  { %v6049_v41 = vadd.f32 %v6038_v34, %v6031_v49  ;;  %v6013_v43 = vpop.f32.mrb[47].mxu1  ;;  %v7071_v34 = vld [vmem:[%s9660_s16] ss:$0 sm:$0xff] }
 0x73d   :  { %v6050_v7 = vadd.f32 %v6042_v36, %v6032_v51 }
 0x73e   :  { %v6055_v22 = vmax.f32 %v6049_v41, 0.0 }
 0x73f   :  { %v6056_v26 = vmax.f32 %v6050_v7, 0.0 }
 0x740   :  { %6061 = vst [vmem:[#allocation8 + $0x20] sm:$0xff] %v6055_v22  ;;  %v6063_v45 = vld [vmem:[#allocation8] ss:$8 sm:$0x3] }
 0x741   :  { %6062 = vst [vmem:[#allocation8 + $0x28] sm:$0xff] %v6056_v26  ;;  %v6065_v3 = vld [vmem:[#allocation8 + $0x1] ss:$8 sm:$0x3] }
 0x742   :  { %v6068_v4 = vld [vmem:[#allocation8 + $0x4] ss:$8 sm:$0x3]  ;;  %v6070_v5 = vld [vmem:[#allocation8 + $0x5] ss:$8 sm:$0x3]  ;;  %v6066_v55 = vmax.f32 %v6063_v45, %v6065_v3 }
 0x743   :  { %v6071_v56 = vmax.f32 %v6068_v4, %v6070_v5 }
 0x745   :  { %v6072_v1 = vmax.f32 %v6066_v55, %v6071_v56 }
 0x747   :  { %v6092_v29 = vrot.slane %v6072_v1, %v9606_v25  ;;  %v6096_v30 = vrot.slane %v6072_v1, %v9611_v31 }
 0x748   :  { %v6076_v57 = vld [vmem:[#allocation8 + $0x20] ss:$8 sm:$0x3]  ;;  %v6078_v58 = vld [vmem:[#allocation8 + $0x21] ss:$8 sm:$0x3] }
 0x749   :  { %v6079_v59 = vmax.f32 %v6076_v57, %v6078_v58  ;;  %v6081_v60 = vld [vmem:[#allocation8 + $0x24] ss:$8 sm:$0x3]  ;;  %v6083_v63 = vld [vmem:[#allocation8 + $0x25] ss:$8 sm:$0x3] }
 0x74a   :  { %v6084_v2 = vmax.f32 %v6081_v60, %v6083_v63 }
 0x74c   :  { %v6085_v6 = vmax.f32 %v6079_v59, %v6084_v2 }
 0x74e   :  { %v6103_v42 = vrot.slane %v6085_v6, %v9606_v25  ;;  %v6107_v54 = vrot.slane %v6085_v6, %v9611_v31 }
 0x750   :  { %v6111_v62 = vsel %vm6110_vm3, %v6092_v29, %v6103_v42  ;;  %v6112_v8 = vsel %vm6110_vm3, %v6096_v30, %v6107_v54 }
 0x751   :  { %v6113_v9 = vpack.c.bf16 %v6111_v62, %v6111_v62  ;;  %v6114_v39 = vpack.c.bf16 %v6112_v8, %v6112_v8 }
 0x753   :  { %6351 = vmatprep.mubr.bf16.mxu0 %v6114_v39 }
 0x754   :  { %6352 = vmatmul.mubr.bf16.vlgmr.msra.gmra.mrb[56].mxu0 %v6113_v9 }
 0x827   :  { %v6353_v19 = vpop.f32.mrb[56].mxu0 }
 0x828   :  { %v6354_v20 = vadd.f32 %v6353_v19, %v6152_v16  ;;  %v6355_v61 = vpop.f32.mrb[57].mxu0 }
 0x829   :  { %v6356_v21 = vadd.f32 %v6355_v61, %v6156_v18  ;;  %v6357_v53 = vpop.f32.mrb[58].mxu0 }
 0x82a   :  { %v6360_v40 = vmax.f32 %v6354_v20, 0.0  ;;  %v6358_v24 = vpop.f32.mrb[59].mxu0 }
 0x82b   :  { %v6361_v27 = vmax.f32 %v6356_v21, 0.0 }
 0x82c   :  { %v6362_v32 = vpack.c.bf16 %v6360_v40, %v6360_v40 }
 0x82d   :  { %v6363_v17 = vpack.c.bf16 %v6361_v27, %v6361_v27 }
 0x82f   :  { %6531 = vmatprep.mubr.bf16.mxu1 %v6363_v17 }
 0x830   :  { %6532 = vmatmul.mubr.bf16.vlgmr.msra.gmra.mrb[48].mxu1 %v6362_v32 }
 0x903   :  { %v7338_v33 = vpop.f32.mrb[48].mxu1 }
 0x904   :  { %v7339_v25 = vpop.f32.mrb[49].mxu1 }
 0x905   :  { %v7340_v31 = vadd.f32 %v7339_v25, %v7338_v33  ;;  %v7341_v35 = vpop.f32.mrb[50].mxu1 }
 0x906   :  { %v7342_v36 = vpop.f32.mrb[51].mxu1 }
 0x907   :  { %v6534_v37 = vadd.f32 %v7340_v31, %v7071_v34 }
 0x909   :  { %6539 = vst [vmem:[#allocation17] sm:$0x3] %v6534_v37 }
 0x90a   :  { %8581 = shalt.err (!%p8578_p8)
}
 0x90b   :  { %s8582_s16 = scalar_lea.hbm %s9661_s17, 32 }
 0x90c   :  { %p8583_p9 = scmp.ne.s32.totalorder %s9661_s17, %s8582_s16  ;;  %p8586_p10 = scmp.lt.u32.totalorder %s8582_s16, %s9661_s17 }
 0x90e   :  { %p8588_p11 = pnand %p8586_p10, %p8583_p9 }
 0x910   :  { %8591 = shalt.err (!%p8588_p11)
}
 0x911   :  { %6549 = dma.vmem_to_hbm [thread:$0]  %s6547_s5, 32, %s9661_s17, [#allocation11]  }
 0x912   :  { %8598 = dma.done.wait [#allocation11], 32  }
 0x913   :  { %8599 = vsyncadd [#allocation11], 4294967264 }
 0x914   :  { %6553 = vsyncpa [#allocation10], 1 }
 0x915   :  { %6554 = vsyncpa [#allocation13], 1 }
 0x916   :  { %6555 = vsyncpa [#allocation16], 1 }
 0x917   :  { %6556 = vsyncpa [#allocation11], 1 }

</bundles_post_ra>
